<compile_context>
chip_gen: v7x
topology: tpu7x:2x2x1
jax: 0.10.0
libtpu: 0.0.40
codegen_flags: <defaults>
</compile_context>

<pallas_src>
import jax
import jax.numpy as jnp
from jax.experimental import pallas as pl
from jax.experimental.pallas import tpu as pltpu

# ---------------- dimensions ----------------
IN_DIM = 784
IN_PAD = 896            # 7 * 128 -> lane-dense input/output width
H1 = 256
H2 = 256
H3 = 512
Z_DIM = 16
LAT_PAD = 128           # packed [mu | logvar | z | zeros] slab width
EPS_PAD = 128           # eps padded to a full lane width
TILE_B = 128            # rows per grid step (multiple of 16 for bf16 packing)
BATCH = 256             # 2 grid steps


# ---------------- Pallas kernel ----------------
def vade_fwd_kernel(
    x_ref, eps_ref,
    # encoder params (bf16 weights, f32 biases)
    ew1, eb1, ew2, eb2, ew3, eb3, ewmlv, ebmlv,
    # decoder params
    dw1, db1, dw2, db2, dw3, db3, dw4, db4,
    # outputs
    xhat_ref, lat_ref,
):
    f32 = jnp.float32
    bf16 = jnp.bfloat16

    x = x_ref[...]                                     # bf16 (TILE_B, IN_PAD)

    # ---- encoder (bf16 MXU operands, f32 accumulation / elementwise) ----
    h = jnp.dot(x, ew1[...], preferred_element_type=f32) + eb1[...]
    h = jnp.maximum(h, 0.0).astype(bf16)
    h = jnp.dot(h, ew2[...], preferred_element_type=f32) + eb2[...]
    h = jnp.maximum(h, 0.0).astype(bf16)
    h = jnp.dot(h, ew3[...], preferred_element_type=f32) + eb3[...]
    h = jnp.maximum(h, 0.0).astype(bf16)

    # fused mu/logvar projection: one (H3, 2*Z_DIM) matmul
    mlv = jnp.dot(h, ewmlv[...], preferred_element_type=f32) + ebmlv[...]
    mu = mlv[:, :Z_DIM]
    logvar = mlv[:, Z_DIM:]

    # ---- reparameterize: z = mu + eps * exp(0.5 * logvar)  (f32) ----
    eps = eps_ref[:, :Z_DIM]
    std = jnp.exp(0.5 * logvar)
    z = mu + eps * std

    # ---- decoder ----
    d = jnp.dot(z.astype(bf16), dw1[...], preferred_element_type=f32) + db1[...]
    d = jnp.maximum(d, 0.0).astype(bf16)
    d = jnp.dot(d, dw2[...], preferred_element_type=f32) + db2[...]
    d = jnp.maximum(d, 0.0).astype(bf16)
    d = jnp.dot(d, dw3[...], preferred_element_type=f32) + db3[...]
    d = jnp.maximum(d, 0.0).astype(bf16)
    logits = jnp.dot(d, dw4[...], preferred_element_type=f32) + db4[...]
    xhat_ref[...] = jax.nn.sigmoid(logits)             # exp on EUP, lane-dense store

    # pack mu | logvar | z into one 128-wide slab -> single unmasked store
    pad = jnp.zeros((mu.shape[0], LAT_PAD - 3 * Z_DIM), f32)
    lat_ref[...] = jnp.concatenate([mu, logvar, z, pad], axis=-1)


# ---------------- wrapper ----------------
def vade_forward(x, eps, kparams):
    """Fused VadeCNN forward. Returns (x_hat, mu, logvar, z)."""
    B = x.shape[0]
    B_pad = pl.cdiv(B, TILE_B) * TILE_B
    grid = (B_pad // TILE_B,)

    # lane-dense, bf16 input tile (pad feature dim to IN_PAD, batch to B_pad)
    x_pad = jnp.pad(x, ((0, B_pad - B), (0, IN_PAD - IN_DIM))).astype(jnp.bfloat16)
    eps_pad = jnp.pad(eps, ((0, B_pad - B), (0, EPS_PAD - Z_DIM)))

    def resident(shape):
        # weight/bias stays at the same block for every grid step -> DMA'd once
        return pl.BlockSpec(shape, lambda i: (0, 0))

    in_specs = [
        pl.BlockSpec((TILE_B, IN_PAD), lambda i: (i, 0)),    # x tile
        pl.BlockSpec((TILE_B, EPS_PAD), lambda i: (i, 0)),   # eps tile (lane-dense)
    ] + [resident(p.shape) for p in kparams]

    out_specs = (
        pl.BlockSpec((TILE_B, IN_PAD), lambda i: (i, 0)),    # x_hat (padded)
        pl.BlockSpec((TILE_B, LAT_PAD), lambda i: (i, 0)),   # [mu|logvar|z|0]
    )
    out_shape = (
        jax.ShapeDtypeStruct((B_pad, IN_PAD), jnp.float32),
        jax.ShapeDtypeStruct((B_pad, LAT_PAD), jnp.float32),
    )

    flops = 2 * B_pad * (IN_PAD * H1 + H1 * H2 + H2 * H3 + H3 * 2 * Z_DIM
                         + Z_DIM * H3 + H3 * H2 + H2 * H1 + H1 * IN_PAD)
    transcendentals = B_pad * (Z_DIM + IN_PAD)
    param_bytes = sum(p.size * p.dtype.itemsize for p in kparams)
    bytes_accessed = (x_pad.size * 2 + eps_pad.size * 4 + param_bytes
                      + B_pad * IN_PAD * 4 + B_pad * LAT_PAD * 4)

    xhat_pad, lat = pl.pallas_call(
        vade_fwd_kernel,
        grid=grid,
        in_specs=in_specs,
        out_specs=out_specs,
        out_shape=out_shape,
        compiler_params=pltpu.CompilerParams(
            dimension_semantics=("parallel",)),
        cost_estimate=pl.CostEstimate(
            flops=flops, transcendentals=transcendentals,
            bytes_accessed=bytes_accessed),
    )(x_pad, eps_pad, *kparams)

    x_hat = xhat_pad[:B, :IN_DIM]
    mu = lat[:B, 0:Z_DIM]
    logvar = lat[:B, Z_DIM:2 * Z_DIM]
    z = lat[:B, 2 * Z_DIM:3 * Z_DIM]
    return x_hat, mu, logvar, z


# ---------------- deterministic parameter init (f32, original dims) ----------------
def make_params(key):
    dims_enc = [(IN_DIM, H1), (H1, H2), (H2, H3), (H3, Z_DIM), (H3, Z_DIM)]
    dims_dec = [(Z_DIM, H3), (H3, H2), (H2, H1), (H1, IN_DIM)]
    params = []
    keys = jax.random.split(key, len(dims_enc) + len(dims_dec))
    for k, (din, dout) in zip(keys, dims_enc + dims_dec):
        scale = 1.0 / jnp.sqrt(jnp.float32(din))
        w = jax.random.normal(k, (din, dout), jnp.float32) * scale
        b = jnp.zeros((1, dout), jnp.float32)
        params.append(w)
        params.append(b)
    return tuple(params)


# ---------------- kernel-layout params: pad, fuse, cast ----------------
def prepare_kernel_params(params):
    (ew1, eb1, ew2, eb2, ew3, eb3, ewmu, ebmu, ewlv, eblv,
     dw1, db1, dw2, db2, dw3, db3, dw4, db4) = params
    bf16 = jnp.bfloat16
    pad_in = IN_PAD - IN_DIM
    ew1p = jnp.pad(ew1, ((0, pad_in), (0, 0))).astype(bf16)      # zero rows match zero x cols
    ewmlv = jnp.concatenate([ewmu, ewlv], axis=1).astype(bf16)   # fused mu/logvar projection
    ebmlv = jnp.concatenate([ebmu, eblv], axis=1)
    dw4p = jnp.pad(dw4, ((0, 0), (0, pad_in))).astype(bf16)      # padded cols sliced away
    db4p = jnp.pad(db4, ((0, 0), (0, pad_in)))
    return (ew1p, eb1, ew2.astype(bf16), eb2, ew3.astype(bf16), eb3,
            ewmlv, ebmlv,
            dw1.astype(bf16), db1, dw2.astype(bf16), db2,
            dw3.astype(bf16), db3, dw4p, db4p)


# ---------------- pure-JAX reference (same bf16-operand / f32-accumulate scheme) ----------------
def reference_forward(x, eps, params):
    (ew1, eb1, ew2, eb2, ew3, eb3, ewmu, ebmu, ewlv, eblv,
     dw1, db1, dw2, db2, dw3, db3, dw4, db4) = params
    bf16 = jnp.bfloat16

    def lin(a, w, b):
        return jnp.dot(a.astype(bf16), w.astype(bf16),
                       preferred_element_type=jnp.float32) + b

    h = jax.nn.relu(lin(x, ew1, eb1))
    h = jax.nn.relu(lin(h, ew2, eb2))
    h = jax.nn.relu(lin(h, ew3, eb3))
    mu = lin(h, ewmu, ebmu)
    logvar = lin(h, ewlv, eblv)
    z = mu + eps * jnp.exp(0.5 * logvar)
    d = jax.nn.relu(lin(z, dw1, db1))
    d = jax.nn.relu(lin(d, dw2, db2))
    d = jax.nn.relu(lin(d, dw3, db3))
    x_hat = jax.nn.sigmoid(lin(d, dw4, db4))
    return x_hat, mu, logvar, z


if __name__ == "__main__":
    key = jax.random.PRNGKey(0)
    k_x, k_eps, k_p = jax.random.split(key, 3)

    x = jax.random.uniform(k_x, (BATCH, IN_DIM), jnp.float32)     # "image" in [0,1)
    eps = jax.random.normal(k_eps, (BATCH, Z_DIM), jnp.float32)   # reparam noise
    params = make_params(k_p)
    kparams = prepare_kernel_params(params)

    outs = jax.jit(vade_forward)(x, eps, kparams)
    outs = jax.block_until_ready(outs)

    refs = reference_forward(x, eps, params)
    for name, o, r in zip(("x_hat", "mu", "logvar", "z"), outs, refs):
        assert o.shape == r.shape and o.dtype == r.dtype, f"shape/dtype mismatch: {name}"
        assert jnp.allclose(o, r, atol=2e-3, rtol=2e-3), f"mismatch vs reference: {name}"

    print("KERNEL_OK")
</pallas_src>

<mosaic_0001>
module attributes {stable_mosaic.version = 11 : i64} {
  func.func @vade_fwd_kernel(%arg0: i32, %arg1: memref<128x896xbf16, #tpu.memory_space<vmem>>, %arg2: memref<128x128xf32, #tpu.memory_space<vmem>>, %arg3: memref<896x256xbf16, #tpu.memory_space<vmem>>, %arg4: memref<1x256xf32, #tpu.memory_space<vmem>>, %arg5: memref<256x256xbf16, #tpu.memory_space<vmem>>, %arg6: memref<1x256xf32, #tpu.memory_space<vmem>>, %arg7: memref<256x512xbf16, #tpu.memory_space<vmem>>, %arg8: memref<1x512xf32, #tpu.memory_space<vmem>>, %arg9: memref<512x32xbf16, #tpu.memory_space<vmem>>, %arg10: memref<1x32xf32, #tpu.memory_space<vmem>>, %arg11: memref<16x512xbf16, #tpu.memory_space<vmem>>, %arg12: memref<1x512xf32, #tpu.memory_space<vmem>>, %arg13: memref<512x256xbf16, #tpu.memory_space<vmem>>, %arg14: memref<1x256xf32, #tpu.memory_space<vmem>>, %arg15: memref<256x256xbf16, #tpu.memory_space<vmem>>, %arg16: memref<1x256xf32, #tpu.memory_space<vmem>>, %arg17: memref<256x896xbf16, #tpu.memory_space<vmem>>, %arg18: memref<1x896xf32, #tpu.memory_space<vmem>>, %arg19: memref<128x896xf32, #tpu.memory_space<vmem>>, %arg20: memref<128x128xf32, #tpu.memory_space<vmem>>) attributes {dimension_semantics = [#tpu.dimension_semantics<parallel>], iteration_bounds = array<i64: 2>, scalar_prefetch = 0 : i64, scratch_operands = 0 : i64, tpu.core_type = #tpu.core_type<tc>, window_params = [{transform_indices = @transform_0, window_bounds = array<i64: 128, 896>}, {transform_indices = @transform_1, window_bounds = array<i64: 128, 128>}, {pipeline_mode = #tpu.pipeline_mode<synchronous>, transform_indices = @transform_2, window_bounds = array<i64: 896, 256>}, {pipeline_mode = #tpu.pipeline_mode<synchronous>, transform_indices = @transform_3, window_bounds = array<i64: 1, 256>}, {pipeline_mode = #tpu.pipeline_mode<synchronous>, transform_indices = @transform_4, window_bounds = array<i64: 256, 256>}, {pipeline_mode = #tpu.pipeline_mode<synchronous>, transform_indices = @transform_5, window_bounds = array<i64: 1, 256>}, {pipeline_mode = #tpu.pipeline_mode<synchronous>, transform_indices = @transform_6, window_bounds = array<i64: 256, 512>}, {pipeline_mode = #tpu.pipeline_mode<synchronous>, transform_indices = @transform_7, window_bounds = array<i64: 1, 512>}, {pipeline_mode = #tpu.pipeline_mode<synchronous>, transform_indices = @transform_8, window_bounds = array<i64: 512, 32>}, {pipeline_mode = #tpu.pipeline_mode<synchronous>, transform_indices = @transform_9, window_bounds = array<i64: 1, 32>}, {pipeline_mode = #tpu.pipeline_mode<synchronous>, transform_indices = @transform_10, window_bounds = array<i64: 16, 512>}, {pipeline_mode = #tpu.pipeline_mode<synchronous>, transform_indices = @transform_11, window_bounds = array<i64: 1, 512>}, {pipeline_mode = #tpu.pipeline_mode<synchronous>, transform_indices = @transform_12, window_bounds = array<i64: 512, 256>}, {pipeline_mode = #tpu.pipeline_mode<synchronous>, transform_indices = @transform_13, window_bounds = array<i64: 1, 256>}, {pipeline_mode = #tpu.pipeline_mode<synchronous>, transform_indices = @transform_14, window_bounds = array<i64: 256, 256>}, {pipeline_mode = #tpu.pipeline_mode<synchronous>, transform_indices = @transform_15, window_bounds = array<i64: 1, 256>}, {pipeline_mode = #tpu.pipeline_mode<synchronous>, transform_indices = @transform_16, window_bounds = array<i64: 256, 896>}, {pipeline_mode = #tpu.pipeline_mode<synchronous>, transform_indices = @transform_17, window_bounds = array<i64: 1, 896>}, {transform_indices = @transform_18, window_bounds = array<i64: 128, 896>}, {transform_indices = @transform_19, window_bounds = array<i64: 128, 128>}]} {
    %c0 = arith.constant 0 : index
    %c0_0 = arith.constant 0 : index
    %0 = vector.load %arg1[%c0, %c0_0] : memref<128x896xbf16, #tpu.memory_space<vmem>>, vector<128x896xbf16>
    %c0_1 = arith.constant 0 : index
    %c0_2 = arith.constant 0 : index
    %1 = vector.load %arg3[%c0_1, %c0_2] : memref<896x256xbf16, #tpu.memory_space<vmem>>, vector<896x256xbf16>
    %cst = arith.constant dense<0.000000e+00> : vector<128x256xf32>
    %2 = tpu.matmul %0, %1, %cst {dimension_numbers = #tpu.dot_dimension_numbers<[1], [0], [0], [1], [0, 0, 1, 1], [], []>} : vector<128x896xbf16>, vector<896x256xbf16>, vector<128x256xf32> -> vector<128x256xf32>
    %c0_3 = arith.constant 0 : index
    %c0_4 = arith.constant 0 : index
    %3 = vector.load %arg4[%c0_3, %c0_4] : memref<1x256xf32, #tpu.memory_space<vmem>>, vector<1x256xf32>
    %4 = vector.broadcast %3 : vector<1x256xf32> to vector<128x256xf32>
    %5 = arith.addf %2, %4 : vector<128x256xf32>
    %cst_5 = arith.constant 0.000000e+00 : f32
    %6 = vector.broadcast %cst_5 : f32 to vector<128x256xf32>
    %7 = arith.maximumf %5, %6 : vector<128x256xf32>
    %8 = arith.truncf %7 : vector<128x256xf32> to vector<128x256xbf16>
    %c0_6 = arith.constant 0 : index
    %c0_7 = arith.constant 0 : index
    %9 = vector.load %arg5[%c0_6, %c0_7] : memref<256x256xbf16, #tpu.memory_space<vmem>>, vector<256x256xbf16>
    %cst_8 = arith.constant dense<0.000000e+00> : vector<128x256xf32>
    %10 = tpu.matmul %8, %9, %cst_8 {dimension_numbers = #tpu.dot_dimension_numbers<[1], [0], [0], [1], [0, 0, 1, 1], [], []>} : vector<128x256xbf16>, vector<256x256xbf16>, vector<128x256xf32> -> vector<128x256xf32>
    %c0_9 = arith.constant 0 : index
    %c0_10 = arith.constant 0 : index
    %11 = vector.load %arg6[%c0_9, %c0_10] : memref<1x256xf32, #tpu.memory_space<vmem>>, vector<1x256xf32>
    %12 = vector.broadcast %11 : vector<1x256xf32> to vector<128x256xf32>
    %13 = arith.addf %10, %12 : vector<128x256xf32>
    %cst_11 = arith.constant 0.000000e+00 : f32
    %14 = vector.broadcast %cst_11 : f32 to vector<128x256xf32>
    %15 = arith.maximumf %13, %14 : vector<128x256xf32>
    %16 = arith.truncf %15 : vector<128x256xf32> to vector<128x256xbf16>
    %c0_12 = arith.constant 0 : index
    %c0_13 = arith.constant 0 : index
    %17 = vector.load %arg7[%c0_12, %c0_13] : memref<256x512xbf16, #tpu.memory_space<vmem>>, vector<256x512xbf16>
    %cst_14 = arith.constant dense<0.000000e+00> : vector<128x512xf32>
    %18 = tpu.matmul %16, %17, %cst_14 {dimension_numbers = #tpu.dot_dimension_numbers<[1], [0], [0], [1], [0, 0, 1, 1], [], []>} : vector<128x256xbf16>, vector<256x512xbf16>, vector<128x512xf32> -> vector<128x512xf32>
    %c0_15 = arith.constant 0 : index
    %c0_16 = arith.constant 0 : index
    %19 = vector.load %arg8[%c0_15, %c0_16] : memref<1x512xf32, #tpu.memory_space<vmem>>, vector<1x512xf32>
    %20 = vector.broadcast %19 : vector<1x512xf32> to vector<128x512xf32>
    %21 = arith.addf %18, %20 : vector<128x512xf32>
    %cst_17 = arith.constant 0.000000e+00 : f32
    %22 = vector.broadcast %cst_17 : f32 to vector<128x512xf32>
    %23 = arith.maximumf %21, %22 : vector<128x512xf32>
    %24 = arith.truncf %23 : vector<128x512xf32> to vector<128x512xbf16>
    %c0_18 = arith.constant 0 : index
    %c0_19 = arith.constant 0 : index
    %25 = vector.load %arg9[%c0_18, %c0_19] : memref<512x32xbf16, #tpu.memory_space<vmem>>, vector<512x32xbf16>
    %cst_20 = arith.constant dense<0.000000e+00> : vector<128x32xf32>
    %26 = tpu.matmul %24, %25, %cst_20 {dimension_numbers = #tpu.dot_dimension_numbers<[1], [0], [0], [1], [0, 0, 1, 1], [], []>} : vector<128x512xbf16>, vector<512x32xbf16>, vector<128x32xf32> -> vector<128x32xf32>
    %c0_21 = arith.constant 0 : index
    %c0_22 = arith.constant 0 : index
    %27 = vector.load %arg10[%c0_21, %c0_22] : memref<1x32xf32, #tpu.memory_space<vmem>>, vector<1x32xf32>
    %28 = vector.broadcast %27 : vector<1x32xf32> to vector<128x32xf32>
    %29 = arith.addf %26, %28 : vector<128x32xf32>
    %30 = vector.extract_strided_slice %29 {offsets = [0, 0], sizes = [128, 16], strides = [1, 1]} : vector<128x32xf32> to vector<128x16xf32>
    %31 = vector.extract_strided_slice %29 {offsets = [0, 16], sizes = [128, 16], strides = [1, 1]} : vector<128x32xf32> to vector<128x16xf32>
    %c0_23 = arith.constant 0 : index
    %c0_24 = arith.constant 0 : index
    %32 = vector.load %arg2[%c0_23, %c0_24] : memref<128x128xf32, #tpu.memory_space<vmem>>, vector<128x16xf32>
    %cst_25 = arith.constant 5.000000e-01 : f32
    %33 = vector.broadcast %cst_25 : f32 to vector<128x16xf32>
    %34 = arith.mulf %33, %31 : vector<128x16xf32>
    %35 = math.exp %34 : vector<128x16xf32>
    %36 = arith.mulf %32, %35 : vector<128x16xf32>
    %37 = arith.addf %30, %36 : vector<128x16xf32>
    %38 = arith.truncf %37 : vector<128x16xf32> to vector<128x16xbf16>
    %c0_26 = arith.constant 0 : index
    %c0_27 = arith.constant 0 : index
    %39 = vector.load %arg11[%c0_26, %c0_27] : memref<16x512xbf16, #tpu.memory_space<vmem>>, vector<16x512xbf16>
    %cst_28 = arith.constant dense<0.000000e+00> : vector<128x512xf32>
    %40 = tpu.matmul %38, %39, %cst_28 {dimension_numbers = #tpu.dot_dimension_numbers<[1], [0], [0], [1], [0, 0, 1, 1], [], []>} : vector<128x16xbf16>, vector<16x512xbf16>, vector<128x512xf32> -> vector<128x512xf32>
    %c0_29 = arith.constant 0 : index
    %c0_30 = arith.constant 0 : index
    %41 = vector.load %arg12[%c0_29, %c0_30] : memref<1x512xf32, #tpu.memory_space<vmem>>, vector<1x512xf32>
    %42 = vector.broadcast %41 : vector<1x512xf32> to vector<128x512xf32>
    %43 = arith.addf %40, %42 : vector<128x512xf32>
    %cst_31 = arith.constant 0.000000e+00 : f32
    %44 = vector.broadcast %cst_31 : f32 to vector<128x512xf32>
    %45 = arith.maximumf %43, %44 : vector<128x512xf32>
    %46 = arith.truncf %45 : vector<128x512xf32> to vector<128x512xbf16>
    %c0_32 = arith.constant 0 : index
    %c0_33 = arith.constant 0 : index
    %47 = vector.load %arg13[%c0_32, %c0_33] : memref<512x256xbf16, #tpu.memory_space<vmem>>, vector<512x256xbf16>
    %cst_34 = arith.constant dense<0.000000e+00> : vector<128x256xf32>
    %48 = tpu.matmul %46, %47, %cst_34 {dimension_numbers = #tpu.dot_dimension_numbers<[1], [0], [0], [1], [0, 0, 1, 1], [], []>} : vector<128x512xbf16>, vector<512x256xbf16>, vector<128x256xf32> -> vector<128x256xf32>
    %c0_35 = arith.constant 0 : index
    %c0_36 = arith.constant 0 : index
    %49 = vector.load %arg14[%c0_35, %c0_36] : memref<1x256xf32, #tpu.memory_space<vmem>>, vector<1x256xf32>
    %50 = vector.broadcast %49 : vector<1x256xf32> to vector<128x256xf32>
    %51 = arith.addf %48, %50 : vector<128x256xf32>
    %cst_37 = arith.constant 0.000000e+00 : f32
    %52 = vector.broadcast %cst_37 : f32 to vector<128x256xf32>
    %53 = arith.maximumf %51, %52 : vector<128x256xf32>
    %54 = arith.truncf %53 : vector<128x256xf32> to vector<128x256xbf16>
    %c0_38 = arith.constant 0 : index
    %c0_39 = arith.constant 0 : index
    %55 = vector.load %arg15[%c0_38, %c0_39] : memref<256x256xbf16, #tpu.memory_space<vmem>>, vector<256x256xbf16>
    %cst_40 = arith.constant dense<0.000000e+00> : vector<128x256xf32>
    %56 = tpu.matmul %54, %55, %cst_40 {dimension_numbers = #tpu.dot_dimension_numbers<[1], [0], [0], [1], [0, 0, 1, 1], [], []>} : vector<128x256xbf16>, vector<256x256xbf16>, vector<128x256xf32> -> vector<128x256xf32>
    %c0_41 = arith.constant 0 : index
    %c0_42 = arith.constant 0 : index
    %57 = vector.load %arg16[%c0_41, %c0_42] : memref<1x256xf32, #tpu.memory_space<vmem>>, vector<1x256xf32>
    %58 = vector.broadcast %57 : vector<1x256xf32> to vector<128x256xf32>
    %59 = arith.addf %56, %58 : vector<128x256xf32>
    %cst_43 = arith.constant 0.000000e+00 : f32
    %60 = vector.broadcast %cst_43 : f32 to vector<128x256xf32>
    %61 = arith.maximumf %59, %60 : vector<128x256xf32>
    %62 = arith.truncf %61 : vector<128x256xf32> to vector<128x256xbf16>
    %c0_44 = arith.constant 0 : index
    %c0_45 = arith.constant 0 : index
    %63 = vector.load %arg17[%c0_44, %c0_45] : memref<256x896xbf16, #tpu.memory_space<vmem>>, vector<256x896xbf16>
    %cst_46 = arith.constant dense<0.000000e+00> : vector<128x896xf32>
    %64 = tpu.matmul %62, %63, %cst_46 {dimension_numbers = #tpu.dot_dimension_numbers<[1], [0], [0], [1], [0, 0, 1, 1], [], []>} : vector<128x256xbf16>, vector<256x896xbf16>, vector<128x896xf32> -> vector<128x896xf32>
    %c0_47 = arith.constant 0 : index
    %c0_48 = arith.constant 0 : index
    %65 = vector.load %arg18[%c0_47, %c0_48] : memref<1x896xf32, #tpu.memory_space<vmem>>, vector<1x896xf32>
    %66 = vector.broadcast %65 : vector<1x896xf32> to vector<128x896xf32>
    %67 = arith.addf %64, %66 : vector<128x896xf32>
    %68 = arith.negf %67 : vector<128x896xf32>
    %69 = math.exp %68 : vector<128x896xf32>
    %cst_49 = arith.constant 1.000000e+00 : f32
    %70 = vector.broadcast %cst_49 : f32 to vector<128x896xf32>
    %71 = arith.addf %70, %69 : vector<128x896xf32>
    %72 = arith.divf %70, %71 : vector<128x896xf32>
    %c0_50 = arith.constant 0 : index
    %c0_51 = arith.constant 0 : index
    %73 = vector.load %arg19[%c0_50, %c0_51] : memref<128x896xf32, #tpu.memory_space<vmem>>, vector<128x896xf32>
    tpu.vector_store %arg19[%c0_50, %c0_51], %72 {strides = array<i32>} : memref<128x896xf32, #tpu.memory_space<vmem>>, vector<128x896xf32>,
    %cst_52 = arith.constant 0.000000e+00 : f32
    %74 = vector.broadcast %cst_52 : f32 to vector<128x80xf32>
    %75 = tpu.concatenate %30, %31, %37, %74 in 1 : vector<128x16xf32>, vector<128x16xf32>, vector<128x16xf32>, vector<128x80xf32> -> vector<128x128xf32>
    %c0_53 = arith.constant 0 : index
    %c0_54 = arith.constant 0 : index
    %76 = vector.load %arg20[%c0_53, %c0_54] : memref<128x128xf32, #tpu.memory_space<vmem>>, vector<128x128xf32>
    tpu.vector_store %arg20[%c0_53, %c0_54], %75 {strides = array<i32>} : memref<128x128xf32, #tpu.memory_space<vmem>>, vector<128x128xf32>,
    return
  }
  func.func @transform_0(%arg0: i32) -> (i32, i32) {
    %c0_i32 = arith.constant 0 : i32
    %c0_i32_0 = arith.constant 0 : i32
    return %arg0, %c0_i32 : i32, i32
  }
  func.func @transform_1(%arg0: i32) -> (i32, i32) {
    %c0_i32 = arith.constant 0 : i32
    %c0_i32_0 = arith.constant 0 : i32
    return %arg0, %c0_i32 : i32, i32
  }
  func.func @transform_2(%arg0: i32) -> (i32, i32) {
    %c0_i32 = arith.constant 0 : i32
    %c0_i32_0 = arith.constant 0 : i32
    %c0_i32_1 = arith.constant 0 : i32
    return %c0_i32, %c0_i32_0 : i32, i32
  }
  func.func @transform_3(%arg0: i32) -> (i32, i32) {
    %c0_i32 = arith.constant 0 : i32
    %c0_i32_0 = arith.constant 0 : i32
    %c0_i32_1 = arith.constant 0 : i32
    return %c0_i32, %c0_i32_0 : i32, i32
  }
  func.func @transform_4(%arg0: i32) -> (i32, i32) {
    %c0_i32 = arith.constant 0 : i32
    %c0_i32_0 = arith.constant 0 : i32
    %c0_i32_1 = arith.constant 0 : i32
    return %c0_i32, %c0_i32_0 : i32, i32
  }
  func.func @transform_5(%arg0: i32) -> (i32, i32) {
    %c0_i32 = arith.constant 0 : i32
    %c0_i32_0 = arith.constant 0 : i32
    %c0_i32_1 = arith.constant 0 : i32
    return %c0_i32, %c0_i32_0 : i32, i32
  }
  func.func @transform_6(%arg0: i32) -> (i32, i32) {
    %c0_i32 = arith.constant 0 : i32
    %c0_i32_0 = arith.constant 0 : i32
    %c0_i32_1 = arith.constant 0 : i32
    return %c0_i32, %c0_i32_0 : i32, i32
  }
  func.func @transform_7(%arg0: i32) -> (i32, i32) {
    %c0_i32 = arith.constant 0 : i32
    %c0_i32_0 = arith.constant 0 : i32
    %c0_i32_1 = arith.constant 0 : i32
    return %c0_i32, %c0_i32_0 : i32, i32
  }
  func.func @transform_8(%arg0: i32) -> (i32, i32) {
    %c0_i32 = arith.constant 0 : i32
    %c0_i32_0 = arith.constant 0 : i32
    %c0_i32_1 = arith.constant 0 : i32
    return %c0_i32, %c0_i32_0 : i32, i32
  }
  func.func @transform_9(%arg0: i32) -> (i32, i32) {
    %c0_i32 = arith.constant 0 : i32
    %c0_i32_0 = arith.constant 0 : i32
    %c0_i32_1 = arith.constant 0 : i32
    return %c0_i32, %c0_i32_0 : i32, i32
  }
  func.func @transform_10(%arg0: i32) -> (i32, i32) {
    %c0_i32 = arith.constant 0 : i32
    %c0_i32_0 = arith.constant 0 : i32
    %c0_i32_1 = arith.constant 0 : i32
    return %c0_i32, %c0_i32_0 : i32, i32
  }
  func.func @transform_11(%arg0: i32) -> (i32, i32) {
    %c0_i32 = arith.constant 0 : i32
    %c0_i32_0 = arith.constant 0 : i32
    %c0_i32_1 = arith.constant 0 : i32
    return %c0_i32, %c0_i32_0 : i32, i32
  }
  func.func @transform_12(%arg0: i32) -> (i32, i32) {
    %c0_i32 = arith.constant 0 : i32
    %c0_i32_0 = arith.constant 0 : i32
    %c0_i32_1 = arith.constant 0 : i32
    return %c0_i32, %c0_i32_0 : i32, i32
  }
  func.func @transform_13(%arg0: i32) -> (i32, i32) {
    %c0_i32 = arith.constant 0 : i32
    %c0_i32_0 = arith.constant 0 : i32
    %c0_i32_1 = arith.constant 0 : i32
    return %c0_i32, %c0_i32_0 : i32, i32
  }
  func.func @transform_14(%arg0: i32) -> (i32, i32) {
    %c0_i32 = arith.constant 0 : i32
    %c0_i32_0 = arith.constant 0 : i32
    %c0_i32_1 = arith.constant 0 : i32
    return %c0_i32, %c0_i32_0 : i32, i32
  }
  func.func @transform_15(%arg0: i32) -> (i32, i32) {
    %c0_i32 = arith.constant 0 : i32
    %c0_i32_0 = arith.constant 0 : i32
    %c0_i32_1 = arith.constant 0 : i32
    return %c0_i32, %c0_i32_0 : i32, i32
  }
  func.func @transform_16(%arg0: i32) -> (i32, i32) {
    %c0_i32 = arith.constant 0 : i32
    %c0_i32_0 = arith.constant 0 : i32
    %c0_i32_1 = arith.constant 0 : i32
    return %c0_i32, %c0_i32_0 : i32, i32
  }
  func.func @transform_17(%arg0: i32) -> (i32, i32) {
    %c0_i32 = arith.constant 0 : i32
    %c0_i32_0 = arith.constant 0 : i32
    %c0_i32_1 = arith.constant 0 : i32
    return %c0_i32, %c0_i32_0 : i32, i32
  }
  func.func @transform_18(%arg0: i32) -> (i32, i32) {
    %c0_i32 = arith.constant 0 : i32
    %c0_i32_0 = arith.constant 0 : i32
    return %arg0, %c0_i32 : i32, i32
  }
  func.func @transform_19(%arg0: i32) -> (i32, i32) {
    %c0_i32 = arith.constant 0 : i32
    %c0_i32_0 = arith.constant 0 : i32
    return %arg0, %c0_i32 : i32, i32
  }
}

</mosaic_0001>

<bundles_post_ra>
// kernel: vade_forward.1
= control target key start
LH: loop header
LB: loop body
LE: loop exit
PB: predicated region body
PF: predicated region fallthrough
CT: control target
= control target key end

     0   :  { %s12669_s0 = inlined_call_operand.vmem [shape: bf16[256,896], index: 0, kind: input, shape index: {}]   ;;  %s12670_s1 = inlined_call_operand.vmem [shape: f32[256,128], index: 1, kind: input, shape index: {}]   ;;  %s12671_s2 = inlined_call_operand.vmem [shape: bf16[896,256], index: 2, kind: input, shape index: {}]   ;;  %s12672_s3 = inlined_call_operand.vmem [shape: f32[1,256], index: 3, kind: input, shape index: {}]   ;;  %s12673_s4 = inlined_call_operand.vmem [shape: bf16[256,256], index: 4, kind: input, shape index: {}]   ;;  %s12674_s5 = inlined_call_operand.vmem [shape: f32[1,256], index: 5, kind: input, shape index: {}]   ;;  %s12675_s6 = inlined_call_operand.vmem [shape: bf16[256,512], index: 6, kind: input, shape index: {}]   ;;  %s12676_s7 = inlined_call_operand.vmem [shape: f32[1,512], index: 7, kind: input, shape index: {}]   ;;  %s12677_s8 = inlined_call_operand.vmem [shape: bf16[512,32], index: 8, kind: input, shape index: {}]   ;;  %s12678_s9 = inlined_call_operand.vmem [shape: f32[1,32], index: 9, kind: input, shape index: {}]   ;;  %s12679_s10 = inlined_call_operand.vmem [shape: bf16[16,512], index: 10, kind: input, shape index: {}]   ;;  %s12680_s11 = inlined_call_operand.vmem [shape: f32[1,512], index: 11, kind: input, shape index: {}]   ;;  %s12681_s12 = inlined_call_operand.vmem [shape: bf16[512,256], index: 12, kind: input, shape index: {}]   ;;  %s12682_s13 = inlined_call_operand.vmem [shape: f32[1,256], index: 13, kind: input, shape index: {}]   ;;  %s12683_s14 = inlined_call_operand.vmem [shape: bf16[256,256], index: 14, kind: input, shape index: {}]   ;;  %s12684_s15 = inlined_call_operand.vmem [shape: f32[1,256], index: 15, kind: input, shape index: {}]   ;;  %s12685_s16 = inlined_call_operand.vmem [shape: bf16[256,896], index: 16, kind: input, shape index: {}]   ;;  %s12686_s17 = inlined_call_operand.vmem [shape: f32[1,896], index: 17, kind: input, shape index: {}]   ;;  %s12687_s18 = inlined_call_operand.vmem [shape: f32[256,896], index: 18, kind: output, shape index: {0}]   ;;  %s12688_s19 = inlined_call_operand.vmem [shape: f32[256,128], index: 19, kind: output, shape index: {1}]  }
   0x1   :  { %12690 = sst [smem:[#allocation3_spill]] %s12669_s0  ;;  %s9884_s0 = smov 0  }
   0x2   :  { %12691 = sst [smem:[#allocation4_spill]] %s12670_s1 }
   0x3   :  { %12692 = sst [smem:[#allocation5_spill]] %s12671_s2 }
   0x4   :  { %12693 = sst [smem:[#allocation6_spill]] %s12672_s3 }
   0x5 LB: > { %s7509_s30 = sadd.s32 4294967295, %s9779_s0   ;;  %p7513_p0 = scmp.ge.s32.totalorder %s9779_s0, 1  ;;  %s9779_s0 = sphi %s9884_s0, %s30_s0  }
   0x6   : > { %p553_p1 = scmp.lt.s32.totalorder %s9779_s0, 3 }
   0x8   : > { %p554_p2 = pnand %p7513_p0, %p553_p1 }
   0xa   : > { %557 = sbr.rel (%p554_p2) target bundleno = 2556 (0x9fc), region = 92 }
  0x11   : > { %s12694_s1 = sld [smem:[#allocation5_spill]]  ;;  %s7514_s28 = sshll.u32 %s7509_s30, 4  ;;  %vm3948_vm0 = vcmask 130048   ;;  %vm7355_vm1 = vcmask 261120   ;;  %vm7372_vm2 = vcmask 392192  }
  0x12   : > { %p622_p3 = scmp.lt.s32.totalorder %s7514_s28, 31  ;;  %s12695_s23 = sld [smem:[#allocation3_spill]] }
  0x13   : > { %s12696_s27 = sld [smem:[#allocation6_spill]]  ;;  %s9782_s29 = smov 112  }
  0x14   : > { %s12701_s28 = smov (!%p622_p3, %s7514_s28), 31  ;;  %s12697_s22 = sld [smem:[#allocation4_spill]] }
  0x15   : > { %s8545_s26 = smul.u32 28, %s12701_s28  ;;  %s7517_s20 = sshll.u32 %s12701_s28, 3 }
  0x16   : > { %s9783_s2 = smov 32  }
  0x17   : > { %v8558_v0 = vld [vmem:[%s12694_s1 + $0x4] ss:$8 sps:$4 sm:$0xff]   ;;  %v8560_v1 = vld [vmem:[%s12694_s1] ss:$8 sps:$4 sm:$0xff]   ;;  %v8561_v2 = vld [vmem:[%s12694_s1 + $0x14] ss:$8 sps:$4 sm:$0xff]  }
  0x18   : > { %1684 = vmatprep.subr.bf16.mxu0 %v8558_v0  ;;  %v8563_v3 = vld [vmem:[%s12694_s1 + $0x10] ss:$8 sps:$4 sm:$0xff]   ;;  %v8564_v4 = vld [vmem:[%s12694_s1 + $0x24] ss:$8 sps:$4 sm:$0xff]   ;;  %v8566_v5 = vld [vmem:[%s12694_s1 + $0x20] ss:$8 sps:$4 sm:$0xff]   ;;  %s9934_s30 = scalar_lea.vmem %s12695_s23, %s8545_s26 }
  0x19   : > { %1685 = vmatpush1.bf16.msra.mxu0 %v8560_v1  ;;  %v8567_v6 = vld [vmem:[%s12694_s1 + $0x34] ss:$8 sps:$4 sm:$0xff]   ;;  %v8569_v7 = vld [vmem:[%s12694_s1 + $0x30] ss:$8 sps:$4 sm:$0xff]   ;;  %v8570_v8 = vld [vmem:[%s12694_s1 + $0x44] ss:$8 sps:$4 sm:$0xff]  }
  0x1a   : > { %1686 = vmatprep.subr.bf16.mxu0 %v8561_v2  ;;  %v8572_v9 = vld [vmem:[%s12694_s1 + $0x40] ss:$8 sps:$4 sm:$0xff]   ;;  %v8573_v10 = vld [vmem:[%s12694_s1 + $0x54] ss:$8 sps:$4 sm:$0xff]   ;;  %v8575_v11 = vld [vmem:[%s12694_s1 + $0x50] ss:$8 sps:$4 sm:$0xff]  }
  0x1b   : > { %v8576_v12 = vld [vmem:[%s12694_s1 + $0x64] ss:$8 sps:$4 sm:$0xff]   ;;  %v8578_v14 = vld [vmem:[%s12694_s1 + $0x60] ss:$8 sps:$4 sm:$0xff]   ;;  %v8579_v15 = vld [vmem:[%s12694_s1 + $0x74] ss:$8 sps:$4 sm:$0xff]  }
  0x1c   : > { %v8608_v13 = vld [vmem:[%s9934_s30 + $0x4] ss:$28 sps:$4 sm:$0xff]   ;;  %v8581_v16 = vld [vmem:[%s12694_s1 + $0x70] ss:$8 sps:$4 sm:$0xff]   ;;  %v8585_v19 = vld [vmem:[%s12694_s1 + $0x94] ss:$8 sps:$4 sm:$0xff]  }
  0x1d   : > { %1687 = vmatpush1.bf16.msra.mxu0 %v8563_v3  ;;  %1716 = vmatprep.mubr.bf16.mxu0 %v8608_v13  ;;  %v8582_v17 = vld [vmem:[%s12694_s1 + $0x84] ss:$8 sps:$4 sm:$0xff]   ;;  %v8584_v18 = vld [vmem:[%s12694_s1 + $0x80] ss:$8 sps:$4 sm:$0xff]   ;;  %v8587_v20 = vld [vmem:[%s12694_s1 + $0x90] ss:$8 sps:$4 sm:$0xff]  }
  0x1e   : > { %1688 = vmatprep.subr.bf16.mxu0 %v8564_v4  ;;  %v8588_v21 = vld [vmem:[%s12694_s1 + $0xa4] ss:$8 sps:$4 sm:$0xff]   ;;  %v8590_v22 = vld [vmem:[%s12694_s1 + $0xa0] ss:$8 sps:$4 sm:$0xff]   ;;  %v8591_v23 = vld [vmem:[%s12694_s1 + $0xb4] ss:$8 sps:$4 sm:$0xff]  }
  0x1f   : > { %v8593_v24 = vld [vmem:[%s12694_s1 + $0xb0] ss:$8 sps:$4 sm:$0xff]   ;;  %v8594_v25 = vld [vmem:[%s12694_s1 + $0xc4] ss:$8 sps:$4 sm:$0xff]   ;;  %v8596_v26 = vld [vmem:[%s12694_s1 + $0xc0] ss:$8 sps:$4 sm:$0xff]  }
  0x20   : > { %v8597_v27 = vld [vmem:[%s12694_s1 + $0xd4] ss:$8 sps:$4 sm:$0xff]   ;;  %v8599_v28 = vld [vmem:[%s12694_s1 + $0xd0] ss:$8 sps:$4 sm:$0xff]   ;;  %v8600_v29 = vld [vmem:[%s12694_s1 + $0xe4] ss:$8 sps:$4 sm:$0xff]  }
  0x21   : > { %1689 = vmatpush1.bf16.msra.mxu0 %v8566_v5  ;;  %v8602_v30 = vld [vmem:[%s12694_s1 + $0xe0] ss:$8 sps:$4 sm:$0xff]   ;;  %v8603_v31 = vld [vmem:[%s12694_s1 + $0xf4] ss:$8 sps:$4 sm:$0xff]   ;;  %v8605_v32 = vld [vmem:[%s12694_s1 + $0xf0] ss:$8 sps:$4 sm:$0xff]  }
  0x22   : > { %1690 = vmatprep.subr.bf16.mxu0 %v8567_v6  ;;  %v8611_v33 = vld [vmem:[%s12694_s1 + $0x104] ss:$8 sps:$4 sm:$0xff]   ;;  %v8606_v34 = vld [vmem:[%s9934_s30] ss:$28 sps:$4 sm:$0xff]   ;;  %v8612_v38 = vld [vmem:[%s12694_s1 + $0x110] ss:$8 sps:$4 sm:$0xff]  }
  0x23   : > { %v8609_v35 = vld [vmem:[%s12694_s1 + $0x100] ss:$8 sps:$4 sm:$0xff]   ;;  %v8615_v36 = vld [vmem:[%s9934_s30 + $0x3c] ss:$28 sps:$4 sm:$0xff]   ;;  %v8620_v39 = vld [vmem:[%s12694_s1 + $0x124] ss:$8 sps:$4 sm:$0xff]  }
  0x24   : > { %v8614_v37 = vld [vmem:[%s12694_s1 + $0x114] ss:$8 sps:$4 sm:$0xff]   ;;  %v8618_v41 = vld [vmem:[%s12694_s1 + $0x120] ss:$8 sps:$4 sm:$0xff]   ;;  %v8621_v44 = vld [vmem:[%s12694_s1 + $0x130] ss:$8 sps:$4 sm:$0xff]  }
  0x25   : > { %1691 = vmatpush1.bf16.msra.mxu0 %v8569_v7  ;;  %v8617_v40 = vld [vmem:[%s9934_s30 + $0x38] ss:$28 sps:$4 sm:$0xff]   ;;  %v8629_v45 = vld [vmem:[%s12694_s1 + $0x144] ss:$8 sps:$4 sm:$0xff]   ;;  %v8627_v47 = vld [vmem:[%s12694_s1 + $0x140] ss:$8 sps:$4 sm:$0xff]  }
  0x26   : > { %1692 = vmatprep.subr.bf16.mxu0 %v8570_v8  ;;  %v8624_v42 = vld [vmem:[%s9934_s30 + $0x74] ss:$28 sps:$4 sm:$0xff]   ;;  %v8633_v48 = vld [vmem:[%s9934_s30 + $0xac] ss:$28 sps:$4 sm:$0xff]   ;;  %v8642_v54 = vld [vmem:[%s9934_s30 + $0xe4] ss:$28 sps:$4 sm:$0xff]  }
  0x27   : > { %v8623_v43 = vld [vmem:[%s12694_s1 + $0x134] ss:$8 sps:$4 sm:$0xff]   ;;  %v8626_v46 = vld [vmem:[%s9934_s30 + $0x70] ss:$28 sps:$4 sm:$0xff]   ;;  %v8635_v52 = vld [vmem:[%s9934_s30 + $0xa8] ss:$28 sps:$4 sm:$0xff]  }
  0x28   : > { %v8632_v49 = vld [vmem:[%s12694_s1 + $0x154] ss:$8 sps:$4 sm:$0xff]   ;;  %v8630_v50 = vld [vmem:[%s12694_s1 + $0x150] ss:$8 sps:$4 sm:$0xff]   ;;  %v8638_v51 = vld [vmem:[%s12694_s1 + $0x164] ss:$8 sps:$4 sm:$0xff]  }
  0x29   : > { %1693 = vmatpush1.bf16.msra.mxu0 %v8572_v9  ;;  %v8636_v53 = vld [vmem:[%s12694_s1 + $0x160] ss:$8 sps:$4 sm:$0xff]   ;;  %v8641_v55 = vld [vmem:[%s12694_s1 + $0x174] ss:$8 sps:$4 sm:$0xff]   ;;  %v8639_v56 = vld [vmem:[%s12694_s1 + $0x170] ss:$8 sps:$4 sm:$0xff]  }
  0x2a   : > { %1694 = vmatprep.subr.bf16.mxu0 %v8573_v10  ;;  %v8647_v57 = vld [vmem:[%s12694_s1 + $0x184] ss:$8 sps:$4 sm:$0xff]   ;;  %v8644_v58 = vld [vmem:[%s9934_s30 + $0xe0] ss:$28 sps:$4 sm:$0xff]   ;;  %v8648_v62 = vld [vmem:[%s12694_s1 + $0x190] ss:$8 sps:$4 sm:$0xff]  }
  0x2b   : > { %v8645_v59 = vld [vmem:[%s12694_s1 + $0x180] ss:$8 sps:$4 sm:$0xff]   ;;  %v8651_v60 = vld [vmem:[%s9934_s30 + $0x11c] ss:$28 sps:$4 sm:$0xff]   ;;  %v8656_v63 = vld [vmem:[%s12694_s1 + $0x1a4] ss:$8 sps:$4 sm:$0xff]  }
  0x2c   : > { %v8650_v61 = vld [vmem:[%s12694_s1 + $0x194] ss:$8 sps:$4 sm:$0xff]   ;;  %v8654_v1 = vld [vmem:[%s12694_s1 + $0x1a0] ss:$8 sps:$4 sm:$0xff]   ;;  %v8657_v4 = vld [vmem:[%s12694_s1 + $0x1b0] ss:$8 sps:$4 sm:$0xff]  }
  0x2d   : > { %1695 = vmatpush1.bf16.msra.mxu0 %v8575_v11  ;;  %v8653_v0 = vld [vmem:[%s9934_s30 + $0x118] ss:$28 sps:$4 sm:$0xff]   ;;  %v8665_v5 = vld [vmem:[%s12694_s1 + $0x1c4] ss:$8 sps:$4 sm:$0xff]   ;;  %v8663_v7 = vld [vmem:[%s12694_s1 + $0x1c0] ss:$8 sps:$4 sm:$0xff]  }
  0x2e   : > { %1696 = vmatprep.subr.bf16.mxu0 %v8576_v12  ;;  %v8660_v2 = vld [vmem:[%s9934_s30 + $0x154] ss:$28 sps:$4 sm:$0xff]   ;;  %v8669_v8 = vld [vmem:[%s9934_s30 + $0x18c] ss:$28 sps:$4 sm:$0xff]  }
  0x2f   : > { %v8659_v3 = vld [vmem:[%s12694_s1 + $0x1b4] ss:$8 sps:$4 sm:$0xff]   ;;  %v8662_v6 = vld [vmem:[%s9934_s30 + $0x150] ss:$28 sps:$4 sm:$0xff]   ;;  %v8671_v12 = vld [vmem:[%s9934_s30 + $0x188] ss:$28 sps:$4 sm:$0xff]  }
  0x30   : > { %v8668_v9 = vld [vmem:[%s12694_s1 + $0x1d4] ss:$8 sps:$4 sm:$0xff]   ;;  %v8666_v10 = vld [vmem:[%s12694_s1 + $0x1d0] ss:$8 sps:$4 sm:$0xff]   ;;  %v8674_v11 = vld [vmem:[%s12694_s1 + $0x1e4] ss:$8 sps:$4 sm:$0xff]  }
  0x31   : > { %1697 = vmatpush1.bf16.msra.mxu0 %v8578_v14  ;;  %v8672_v13 = vld [vmem:[%s12694_s1 + $0x1e0] ss:$8 sps:$4 sm:$0xff]  }
  0x32   : > { %1698 = vmatprep.subr.bf16.mxu0 %v8579_v15  ;;  %v8680_v14 = vld [vmem:[%s9934_s30 + $0xc] ss:$28 sps:$4 sm:$0xff]   ;;  %v8677_v15 = vld [vmem:[%s12694_s1 + $0x1f4] ss:$8 sps:$4 sm:$0xff]  }
  0x35   : > { %1699 = vmatpush1.bf16.msra.mxu0 %v8581_v16  ;;  %v8675_v16 = vld [vmem:[%s12694_s1 + $0x1f0] ss:$8 sps:$4 sm:$0xff]  }
  0x36   : > { %1700 = vmatprep.subr.bf16.mxu0 %v8582_v17  ;;  %v8683_v17 = vld [vmem:[%s12694_s1 + $0x204] ss:$8 sps:$4 sm:$0xff]  }
  0x39   : > { %1701 = vmatpush1.bf16.msra.mxu0 %v8584_v18  ;;  %v8678_v18 = vld [vmem:[%s9934_s30 + $0x8] ss:$28 sps:$4 sm:$0xff]  }
  0x3a   : > { %1702 = vmatprep.subr.bf16.mxu0 %v8585_v19  ;;  %v8681_v19 = vld [vmem:[%s12694_s1 + $0x200] ss:$8 sps:$4 sm:$0xff]  }
  0x3d   : > { %1703 = vmatpush1.bf16.msra.mxu0 %v8587_v20  ;;  %v8687_v20 = vld [vmem:[%s9934_s30 + $0x44] ss:$28 sps:$4 sm:$0xff]  }
  0x3e   : > { %1704 = vmatprep.subr.bf16.mxu0 %v8588_v21  ;;  %v8686_v21 = vld [vmem:[%s12694_s1 + $0x214] ss:$8 sps:$4 sm:$0xff]  }
  0x41   : > { %1705 = vmatpush1.bf16.msra.mxu0 %v8590_v22  ;;  %v8684_v22 = vld [vmem:[%s12694_s1 + $0x210] ss:$8 sps:$4 sm:$0xff]  }
  0x42   : > { %1706 = vmatprep.subr.bf16.mxu0 %v8591_v23  ;;  %v8692_v23 = vld [vmem:[%s12694_s1 + $0x224] ss:$8 sps:$4 sm:$0xff]  }
  0x45   : > { %1707 = vmatpush1.bf16.msra.mxu0 %v8593_v24  ;;  %v8689_v24 = vld [vmem:[%s9934_s30 + $0x40] ss:$28 sps:$4 sm:$0xff]  }
  0x46   : > { %1708 = vmatprep.subr.bf16.mxu0 %v8594_v25  ;;  %v8690_v25 = vld [vmem:[%s12694_s1 + $0x220] ss:$8 sps:$4 sm:$0xff]  }
  0x49   : > { %1709 = vmatpush1.bf16.msra.mxu0 %v8596_v26  ;;  %v8696_v26 = vld [vmem:[%s9934_s30 + $0x7c] ss:$28 sps:$4 sm:$0xff]  }
  0x4a   : > { %1710 = vmatprep.subr.bf16.mxu0 %v8597_v27  ;;  %v8695_v27 = vld [vmem:[%s12694_s1 + $0x234] ss:$8 sps:$4 sm:$0xff]  }
  0x4d   : > { %1711 = vmatpush1.bf16.msra.mxu0 %v8599_v28  ;;  %v8693_v28 = vld [vmem:[%s12694_s1 + $0x230] ss:$8 sps:$4 sm:$0xff]  }
  0x4e   : > { %1712 = vmatprep.subr.bf16.mxu0 %v8600_v29  ;;  %v8701_v29 = vld [vmem:[%s12694_s1 + $0x244] ss:$8 sps:$4 sm:$0xff]  }
  0x51   : > { %1713 = vmatpush1.bf16.msra.mxu0 %v8602_v30  ;;  %v8698_v30 = vld [vmem:[%s9934_s30 + $0x78] ss:$28 sps:$4 sm:$0xff]  }
  0x52   : > { %1714 = vmatprep.subr.bf16.mxu0 %v8603_v31  ;;  %v8699_v31 = vld [vmem:[%s12694_s1 + $0x240] ss:$8 sps:$4 sm:$0xff]  }
  0x55   : > { %1715 = vmatpush1.bf16.msra.mxu0 %v8605_v32  ;;  %v8705_v32 = vld [vmem:[%s9934_s30 + $0xb4] ss:$28 sps:$4 sm:$0xff]  }
  0x56   : > { %1797 = vmatprep.subr.bf16.mxu0 %v8611_v33  ;;  %v8704_v33 = vld [vmem:[%s12694_s1 + $0x254] ss:$8 sps:$4 sm:$0xff]  }
  0x58   : > { %1717 = vmatmul.mubr.bf16.vlgmr.msra.gmra.mrb[0].mxu0 %v8606_v34  ;;  %v8702_v34 = vld [vmem:[%s12694_s1 + $0x250] ss:$8 sps:$4 sm:$0xff]  }
  0x59   : > { %1798 = vmatpush1.bf16.msra.mxu0 %v8609_v35  ;;  %1726 = vmatprep.mubr.bf16.mxu0 %v8615_v36  ;;  %v8710_v35 = vld [vmem:[%s12694_s1 + $0x264] ss:$8 sps:$4 sm:$0xff]  }
  0x5a   : > { %1799 = vmatprep.subr.bf16.mxu0 %v8614_v37  ;;  %v8707_v36 = vld [vmem:[%s9934_s30 + $0xb0] ss:$28 sps:$4 sm:$0xff]   ;;  %v8708_v37 = vld [vmem:[%s12694_s1 + $0x260] ss:$8 sps:$4 sm:$0xff]  }
  0x5d   : > { %1800 = vmatpush1.bf16.msra.mxu0 %v8612_v38  ;;  %v8714_v38 = vld [vmem:[%s9934_s30 + $0xec] ss:$28 sps:$4 sm:$0xff]  }
  0x5e   : > { %1801 = vmatprep.subr.bf16.mxu0 %v8620_v39  ;;  %v8713_v39 = vld [vmem:[%s12694_s1 + $0x274] ss:$8 sps:$4 sm:$0xff]  }
  0x60   : > { %1727 = vmatmul.mubr.bf16.gmra.mrb[4].mxu0 %v8617_v40  ;;  %v8711_v40 = vld [vmem:[%s12694_s1 + $0x270] ss:$8 sps:$4 sm:$0xff]  }
  0x61   : > { %1802 = vmatpush1.bf16.msra.mxu0 %v8618_v41  ;;  %1736 = vmatprep.mubr.bf16.mxu0 %v8624_v42  ;;  %v8719_v41 = vld [vmem:[%s12694_s1 + $0x284] ss:$8 sps:$4 sm:$0xff]  }
  0x62   : > { %1803 = vmatprep.subr.bf16.mxu0 %v8623_v43  ;;  %v8716_v42 = vld [vmem:[%s9934_s30 + $0xe8] ss:$28 sps:$4 sm:$0xff]  }
  0x63   : > { %v8717_v43 = vld [vmem:[%s12694_s1 + $0x280] ss:$8 sps:$4 sm:$0xff]  }
  0x65   : > { %1804 = vmatpush1.bf16.msra.mxu0 %v8621_v44  ;;  %v8723_v44 = vld [vmem:[%s9934_s30 + $0x124] ss:$28 sps:$4 sm:$0xff]  }
  0x66   : > { %1805 = vmatprep.subr.bf16.mxu0 %v8629_v45  ;;  %v8722_v45 = vld [vmem:[%s12694_s1 + $0x294] ss:$8 sps:$4 sm:$0xff]  }
  0x68   : > { %1737 = vmatmul.mubr.bf16.gmra.mrb[8].mxu0 %v8626_v46  ;;  %v8720_v46 = vld [vmem:[%s12694_s1 + $0x290] ss:$8 sps:$4 sm:$0xff]  }
  0x69   : > { %1806 = vmatpush1.bf16.msra.mxu0 %v8627_v47  ;;  %1746 = vmatprep.mubr.bf16.mxu0 %v8633_v48  ;;  %v8728_v47 = vld [vmem:[%s12694_s1 + $0x2a4] ss:$8 sps:$4 sm:$0xff]   ;;  %v8725_v48 = vld [vmem:[%s9934_s30 + $0x120] ss:$28 sps:$4 sm:$0xff]  }
  0x6a   : > { %1807 = vmatprep.subr.bf16.mxu0 %v8632_v49  ;;  %v8726_v49 = vld [vmem:[%s12694_s1 + $0x2a0] ss:$8 sps:$4 sm:$0xff]  }
  0x6d   : > { %1808 = vmatpush1.bf16.msra.mxu0 %v8630_v50  ;;  %v8732_v50 = vld [vmem:[%s9934_s30 + $0x15c] ss:$28 sps:$4 sm:$0xff]  }
  0x6e   : > { %1809 = vmatprep.subr.bf16.mxu0 %v8638_v51  ;;  %v8731_v51 = vld [vmem:[%s12694_s1 + $0x2b4] ss:$8 sps:$4 sm:$0xff]  }
  0x70   : > { %1747 = vmatmul.mubr.bf16.gmra.mrb[12].mxu0 %v8635_v52  ;;  %v8729_v52 = vld [vmem:[%s12694_s1 + $0x2b0] ss:$8 sps:$4 sm:$0xff]  }
  0x71   : > { %1810 = vmatpush1.bf16.msra.mxu0 %v8636_v53  ;;  %1756 = vmatprep.mubr.bf16.mxu0 %v8642_v54  ;;  %v8737_v53 = vld [vmem:[%s12694_s1 + $0x2c4] ss:$8 sps:$4 sm:$0xff]   ;;  %v8734_v54 = vld [vmem:[%s9934_s30 + $0x158] ss:$28 sps:$4 sm:$0xff]  }
  0x72   : > { %1811 = vmatprep.subr.bf16.mxu0 %v8641_v55  ;;  %v8735_v55 = vld [vmem:[%s12694_s1 + $0x2c0] ss:$8 sps:$4 sm:$0xff]  }
  0x75   : > { %1812 = vmatpush1.bf16.msra.mxu0 %v8639_v56  ;;  %v8741_v56 = vld [vmem:[%s9934_s30 + $0x194] ss:$28 sps:$4 sm:$0xff]  }
  0x76   : > { %1813 = vmatprep.subr.bf16.mxu0 %v8647_v57  ;;  %v8740_v57 = vld [vmem:[%s12694_s1 + $0x2d4] ss:$8 sps:$4 sm:$0xff]  }
  0x78   : > { %1757 = vmatmul.mubr.bf16.gmra.mrb[16].mxu0 %v8644_v58  ;;  %v8738_v58 = vld [vmem:[%s12694_s1 + $0x2d0] ss:$8 sps:$4 sm:$0xff]  }
  0x79   : > { %1814 = vmatpush1.bf16.msra.mxu0 %v8645_v59  ;;  %1766 = vmatprep.mubr.bf16.mxu0 %v8651_v60  ;;  %v8746_v59 = vld [vmem:[%s12694_s1 + $0x2e4] ss:$8 sps:$4 sm:$0xff]  }
  0x7a   : > { %1815 = vmatprep.subr.bf16.mxu0 %v8650_v61  ;;  %v8743_v60 = vld [vmem:[%s9934_s30 + $0x190] ss:$28 sps:$4 sm:$0xff]   ;;  %v8744_v61 = vld [vmem:[%s12694_s1 + $0x2e0] ss:$8 sps:$4 sm:$0xff]  }
  0x7d   : > { %1816 = vmatpush1.bf16.msra.mxu0 %v8648_v62  ;;  %v8752_v62 = vld [vmem:[%s9934_s30 + $0x14] ss:$28 sps:$4 sm:$0xff]  }
  0x7e   : > { %1817 = vmatprep.subr.bf16.mxu0 %v8656_v63  ;;  %v8749_v63 = vld [vmem:[%s12694_s1 + $0x2f4] ss:$8 sps:$4 sm:$0xff]  }
  0x80   : > { %1767 = vmatmul.mubr.bf16.gmra.mrb[20].mxu0 %v8653_v0  ;;  %v8806_v0 = vld [vmem:[%s12673_s4 + $0x4] ss:$8 sps:$4 sm:$0xff]  }
  0x81   : > { %1818 = vmatpush1.bf16.msra.mxu0 %v8654_v1  ;;  %1776 = vmatprep.mubr.bf16.mxu0 %v8660_v2  ;;  %v8808_v1 = vld [vmem:[%s12673_s4] ss:$8 sps:$4 sm:$0xff]   ;;  %v8809_v2 = vld [vmem:[%s12673_s4 + $0x14] ss:$8 sps:$4 sm:$0xff]  }
  0x82   : > { %1819 = vmatprep.subr.bf16.mxu0 %v8659_v3  ;;  %v8747_v3 = vld [vmem:[%s12694_s1 + $0x2f0] ss:$8 sps:$4 sm:$0xff]   ;;  %2388 = vmatprep.subr.bf16.mxu1 %v8806_v0 }
  0x83   : > { %2389 = vmatpush1.bf16.msra.mxu1 %v8808_v1  ;;  %v8802_v0 = vld [vmem:[%s9934_s30 + $0xf8] ss:$28 sps:$4 sm:$0xff]   ;;  %v8803_v1 = vld [vmem:[%s9934_s30 + $0x130] ss:$28 sps:$4 sm:$0xff]  }
  0x84   : > { %2390 = vmatprep.subr.bf16.mxu1 %v8809_v2  ;;  %v8804_v2 = vld [vmem:[%s9934_s30 + $0x168] ss:$28 sps:$4 sm:$0xff]  }
  0x85   : > { %1820 = vmatpush1.bf16.msra.mxu0 %v8657_v4  ;;  %v8755_v4 = vld [vmem:[%s12694_s1 + $0x304] ss:$8 sps:$4 sm:$0xff]  }
  0x86   : > { %1821 = vmatprep.subr.bf16.mxu0 %v8665_v5  ;;  %v8811_v5 = vld [vmem:[%s12673_s4 + $0x10] ss:$8 sps:$4 sm:$0xff]  }
  0x87   : > { %2391 = vmatpush1.bf16.msra.mxu1 %v8811_v5  ;;  %v8848_v5 = vld [vmem:[%s12673_s4 + $0xe4] ss:$8 sps:$4 sm:$0xff]  }
  0x88   : > { %1777 = vmatmul.mubr.bf16.gmra.mrb[24].mxu0 %v8662_v6  ;;  %v8750_v6 = vld [vmem:[%s9934_s30 + $0x10] ss:$28 sps:$4 sm:$0xff]  }
  0x89   : > { %1822 = vmatpush1.bf16.msra.mxu0 %v8663_v7  ;;  %1786 = vmatprep.mubr.bf16.mxu0 %v8669_v8  ;;  %v8812_v7 = vld [vmem:[%s12673_s4 + $0x24] ss:$8 sps:$4 sm:$0xff]   ;;  %v8753_v8 = vld [vmem:[%s12694_s1 + $0x300] ss:$8 sps:$4 sm:$0xff]  }
  0x8a   : > { %1823 = vmatprep.subr.bf16.mxu0 %v8668_v9  ;;  %v8756_v9 = vld [vmem:[%s9934_s30 + $0x4c] ss:$28 sps:$4 sm:$0xff]   ;;  %2392 = vmatprep.subr.bf16.mxu1 %v8812_v7  ;;  %v8851_v7 = vld [vmem:[%s12673_s4 + $0xf4] ss:$8 sps:$4 sm:$0xff]  }
  0x8d   : > { %1824 = vmatpush1.bf16.msra.mxu0 %v8666_v10  ;;  %v8761_v10 = vld [vmem:[%s12694_s1 + $0x314] ss:$8 sps:$4 sm:$0xff]  }
  0x8e   : > { %1825 = vmatprep.subr.bf16.mxu0 %v8674_v11  ;;  %v8814_v11 = vld [vmem:[%s12673_s4 + $0x20] ss:$8 sps:$4 sm:$0xff]  }
  0x8f   : > { %2393 = vmatpush1.bf16.msra.mxu1 %v8814_v11 }
  0x90   : > { %1787 = vmatmul.mubr.bf16.gmra.mrb[28].mxu0 %v8671_v12  ;;  %v8759_v12 = vld [vmem:[%s12694_s1 + $0x310] ss:$8 sps:$4 sm:$0xff]  }
  0x91   : > { %1826 = vmatpush1.bf16.msra.mxu0 %v8672_v13  ;;  %1829 = vmatprep.mubr.bf16.mxu0 %v8680_v14  ;;  %v8767_v13 = vld [vmem:[%s12694_s1 + $0x324] ss:$8 sps:$4 sm:$0xff]   ;;  %v8815_v14 = vld [vmem:[%s12673_s4 + $0x34] ss:$8 sps:$4 sm:$0xff]  }
  0x92   : > { %1827 = vmatprep.subr.bf16.mxu0 %v8677_v15  ;;  %v8817_v15 = vld [vmem:[%s12673_s4 + $0x30] ss:$8 sps:$4 sm:$0xff]   ;;  %2394 = vmatprep.subr.bf16.mxu1 %v8815_v14 }
  0x93   : > { %2395 = vmatpush1.bf16.msra.mxu1 %v8817_v15 }
  0x95   : > { %1828 = vmatpush1.bf16.msra.mxu0 %v8675_v16  ;;  %v8758_v16 = vld [vmem:[%s9934_s30 + $0x48] ss:$28 sps:$4 sm:$0xff]  }
  0x96   : > { %1910 = vmatprep.subr.bf16.mxu0 %v8683_v17  ;;  %v8818_v17 = vld [vmem:[%s12673_s4 + $0x44] ss:$8 sps:$4 sm:$0xff]  }
  0x97   : > { %2396 = vmatprep.subr.bf16.mxu1 %v8818_v17 }
  0x98   : > { %1830 = vmatmul.mubr.bf16.vlgmr.msra.gmra.mrb[0].mxu0 %v8678_v18  ;;  %v8762_v18 = vld [vmem:[%s9934_s30 + $0x84] ss:$28 sps:$4 sm:$0xff]  }
  0x99   : > { %1911 = vmatpush1.bf16.msra.mxu0 %v8681_v19  ;;  %1839 = vmatprep.mubr.bf16.mxu0 %v8687_v20  ;;  %v8765_v19 = vld [vmem:[%s12694_s1 + $0x320] ss:$8 sps:$4 sm:$0xff]   ;;  %v8773_v20 = vld [vmem:[%s12694_s1 + $0x334] ss:$8 sps:$4 sm:$0xff]  }
  0x9a   : > { %1912 = vmatprep.subr.bf16.mxu0 %v8686_v21  ;;  %v8820_v21 = vld [vmem:[%s12673_s4 + $0x40] ss:$8 sps:$4 sm:$0xff]  }
  0x9b   : > { %2397 = vmatpush1.bf16.msra.mxu1 %v8820_v21 }
  0x9d   : > { %1913 = vmatpush1.bf16.msra.mxu0 %v8684_v22  ;;  %v8821_v22 = vld [vmem:[%s12673_s4 + $0x54] ss:$8 sps:$4 sm:$0xff]  }
  0x9e   : > { %1914 = vmatprep.subr.bf16.mxu0 %v8692_v23  ;;  %v8771_v23 = vld [vmem:[%s12694_s1 + $0x330] ss:$8 sps:$4 sm:$0xff]   ;;  %2398 = vmatprep.subr.bf16.mxu1 %v8821_v22 }
  0xa0   : > { %1840 = vmatmul.mubr.bf16.gmra.mrb[4].mxu0 %v8689_v24  ;;  %v8779_v24 = vld [vmem:[%s12694_s1 + $0x344] ss:$8 sps:$4 sm:$0xff]  }
  0xa1   : > { %1915 = vmatpush1.bf16.msra.mxu0 %v8690_v25  ;;  %1849 = vmatprep.mubr.bf16.mxu0 %v8696_v26  ;;  %v8823_v25 = vld [vmem:[%s12673_s4 + $0x50] ss:$8 sps:$4 sm:$0xff]   ;;  %v8764_v26 = vld [vmem:[%s9934_s30 + $0x80] ss:$28 sps:$4 sm:$0xff]  }
  0xa2   : > { %1916 = vmatprep.subr.bf16.mxu0 %v8695_v27  ;;  %v8824_v27 = vld [vmem:[%s12673_s4 + $0x64] ss:$8 sps:$4 sm:$0xff]   ;;  %2399 = vmatpush1.bf16.msra.mxu1 %v8823_v25 }
  0xa3   : > { %2400 = vmatprep.subr.bf16.mxu1 %v8824_v27 }
  0xa5   : > { %1917 = vmatpush1.bf16.msra.mxu0 %v8693_v28  ;;  %v8768_v28 = vld [vmem:[%s9934_s30 + $0xbc] ss:$28 sps:$4 sm:$0xff]  }
  0xa6   : > { %1918 = vmatprep.subr.bf16.mxu0 %v8701_v29  ;;  %v8777_v29 = vld [vmem:[%s12694_s1 + $0x340] ss:$8 sps:$4 sm:$0xff]  }
  0xa8   : > { %1850 = vmatmul.mubr.bf16.gmra.mrb[8].mxu0 %v8698_v30  ;;  %v8785_v30 = vld [vmem:[%s12694_s1 + $0x354] ss:$8 sps:$4 sm:$0xff]  }
  0xa9   : > { %1919 = vmatpush1.bf16.msra.mxu0 %v8699_v31  ;;  %1859 = vmatprep.mubr.bf16.mxu0 %v8705_v32  ;;  %v8826_v31 = vld [vmem:[%s12673_s4 + $0x60] ss:$8 sps:$4 sm:$0xff]   ;;  %v8827_v32 = vld [vmem:[%s12673_s4 + $0x74] ss:$8 sps:$4 sm:$0xff]  }
  0xaa   : > { %1920 = vmatprep.subr.bf16.mxu0 %v8704_v33  ;;  %v8783_v33 = vld [vmem:[%s12694_s1 + $0x350] ss:$8 sps:$4 sm:$0xff]   ;;  %2401 = vmatpush1.bf16.msra.mxu1 %v8826_v31 }
  0xab   : > { %2402 = vmatprep.subr.bf16.mxu1 %v8827_v32  ;;  %v8854_v32 = vld [vmem:[%s12675_s6] ss:$16 sps:$4 sm:$0xff]  }
  0xad   : > { %1921 = vmatpush1.bf16.msra.mxu0 %v8702_v34  ;;  %v8791_v34 = vld [vmem:[%s12694_s1 + $0x364] ss:$8 sps:$4 sm:$0xff]  }
  0xae   : > { %1922 = vmatprep.subr.bf16.mxu0 %v8710_v35  ;;  %v8829_v35 = vld [vmem:[%s12673_s4 + $0x70] ss:$8 sps:$4 sm:$0xff]  }
  0xaf   : > { %2403 = vmatpush1.bf16.msra.mxu1 %v8829_v35  ;;  %v8859_v35 = vld [vmem:[%s12675_s6 + $0x24] ss:$16 sps:$4 sm:$0xff]  }
  0xb0   : > { %1860 = vmatmul.mubr.bf16.gmra.mrb[12].mxu0 %v8707_v36  ;;  %v8770_v36 = vld [vmem:[%s9934_s30 + $0xb8] ss:$28 sps:$4 sm:$0xff]  }
  0xb1   : > { %1923 = vmatpush1.bf16.msra.mxu0 %v8708_v37  ;;  %1869 = vmatprep.mubr.bf16.mxu0 %v8714_v38  ;;  %v8830_v37 = vld [vmem:[%s12673_s4 + $0x84] ss:$8 sps:$4 sm:$0xff]   ;;  %v8774_v38 = vld [vmem:[%s9934_s30 + $0xf4] ss:$28 sps:$4 sm:$0xff]  }
  0xb2   : > { %1924 = vmatprep.subr.bf16.mxu0 %v8713_v39  ;;  %v8789_v39 = vld [vmem:[%s12694_s1 + $0x360] ss:$8 sps:$4 sm:$0xff]   ;;  %2404 = vmatprep.subr.bf16.mxu1 %v8830_v37 }
  0xb5   : > { %1925 = vmatpush1.bf16.msra.mxu0 %v8711_v40  ;;  %v8797_v40 = vld [vmem:[%s12694_s1 + $0x374] ss:$8 sps:$4 sm:$0xff]  }
  0xb6   : > { %1926 = vmatprep.subr.bf16.mxu0 %v8719_v41  ;;  %v8832_v41 = vld [vmem:[%s12673_s4 + $0x80] ss:$8 sps:$4 sm:$0xff]  }
  0xb7   : > { %2405 = vmatpush1.bf16.msra.mxu1 %v8832_v41  ;;  %v8857_v41 = vld [vmem:[%s12675_s6 + $0x20] ss:$16 sps:$4 sm:$0xff]  }
  0xb8   : > { %1870 = vmatmul.mubr.bf16.gmra.mrb[16].mxu0 %v8716_v42  ;;  %v8833_v42 = vld [vmem:[%s12673_s4 + $0x94] ss:$8 sps:$4 sm:$0xff]  }
  0xb9   : > { %1927 = vmatpush1.bf16.msra.mxu0 %v8717_v43  ;;  %1879 = vmatprep.mubr.bf16.mxu0 %v8723_v44  ;;  %v8795_v43 = vld [vmem:[%s12694_s1 + $0x370] ss:$8 sps:$4 sm:$0xff]  }
  0xba   : > { %1928 = vmatprep.subr.bf16.mxu0 %v8722_v45  ;;  %v8835_v44 = vld [vmem:[%s12673_s4 + $0x90] ss:$8 sps:$4 sm:$0xff]   ;;  %2406 = vmatprep.subr.bf16.mxu1 %v8833_v42 }
  0xbb   : > { %v8776_v45 = vld [vmem:[%s9934_s30 + $0xf0] ss:$28 sps:$4 sm:$0xff]   ;;  %2407 = vmatpush1.bf16.msra.mxu1 %v8835_v44  ;;  %v8862_v44 = vld [vmem:[%s12675_s6 + $0x44] ss:$16 sps:$4 sm:$0xff]  }
  0xbd   : > { %1929 = vmatpush1.bf16.msra.mxu0 %v8720_v46  ;;  %v8836_v46 = vld [vmem:[%s12673_s4 + $0xa4] ss:$8 sps:$4 sm:$0xff]  }
  0xbe   : > { %1930 = vmatprep.subr.bf16.mxu0 %v8728_v47  ;;  %v8780_v47 = vld [vmem:[%s9934_s30 + $0x12c] ss:$28 sps:$4 sm:$0xff]   ;;  %2408 = vmatprep.subr.bf16.mxu1 %v8836_v46 }
  0xc0   : > { %1880 = vmatmul.mubr.bf16.gmra.mrb[20].mxu0 %v8725_v48  ;;  %v8838_v48 = vld [vmem:[%s12673_s4 + $0xa0] ss:$8 sps:$4 sm:$0xff]  }
  0xc1   : > { %1931 = vmatpush1.bf16.msra.mxu0 %v8726_v49  ;;  %1889 = vmatprep.mubr.bf16.mxu0 %v8732_v50  ;;  %v8839_v49 = vld [vmem:[%s12673_s4 + $0xb4] ss:$8 sps:$4 sm:$0xff]   ;;  %v8841_v50 = vld [vmem:[%s12673_s4 + $0xb0] ss:$8 sps:$4 sm:$0xff]  }
  0xc2   : > { %1932 = vmatprep.subr.bf16.mxu0 %v8731_v51  ;;  %v8782_v51 = vld [vmem:[%s9934_s30 + $0x128] ss:$28 sps:$4 sm:$0xff]   ;;  %2409 = vmatpush1.bf16.msra.mxu1 %v8838_v48 }
  0xc3   : > { %2410 = vmatprep.subr.bf16.mxu1 %v8839_v49 }
  0xc5   : > { %1933 = vmatpush1.bf16.msra.mxu0 %v8729_v52  ;;  %v8842_v52 = vld [vmem:[%s12673_s4 + $0xc4] ss:$8 sps:$4 sm:$0xff]  }
  0xc6   : > { %1934 = vmatprep.subr.bf16.mxu0 %v8737_v53  ;;  %v8786_v53 = vld [vmem:[%s9934_s30 + $0x164] ss:$28 sps:$4 sm:$0xff]   ;;  %2411 = vmatpush1.bf16.msra.mxu1 %v8841_v50 }
  0xc7   : > { %2412 = vmatprep.subr.bf16.mxu1 %v8842_v52  ;;  %v8860_v50 = vld [vmem:[%s12675_s6 + $0x40] ss:$16 sps:$4 sm:$0xff]  }
  0xc8   : > { %1890 = vmatmul.mubr.bf16.gmra.mrb[24].mxu0 %v8734_v54  ;;  %v8844_v54 = vld [vmem:[%s12673_s4 + $0xc0] ss:$8 sps:$4 sm:$0xff]  }
  0xc9   : > { %1935 = vmatpush1.bf16.msra.mxu0 %v8735_v55  ;;  %1899 = vmatprep.mubr.bf16.mxu0 %v8741_v56  ;;  %v8845_v55 = vld [vmem:[%s12673_s4 + $0xd4] ss:$8 sps:$4 sm:$0xff]  }
  0xca   : > { %1936 = vmatprep.subr.bf16.mxu0 %v8740_v57  ;;  %v8788_v56 = vld [vmem:[%s9934_s30 + $0x160] ss:$28 sps:$4 sm:$0xff]   ;;  %2413 = vmatpush1.bf16.msra.mxu1 %v8844_v54 }
  0xcb   : > { %v8792_v57 = vld [vmem:[%s9934_s30 + $0x19c] ss:$28 sps:$4 sm:$0xff]   ;;  %2414 = vmatprep.subr.bf16.mxu1 %v8845_v55 }
  0xcd   : > { %1937 = vmatpush1.bf16.msra.mxu0 %v8738_v58  ;;  %v8794_v58 = vld [vmem:[%s9934_s30 + $0x198] ss:$28 sps:$4 sm:$0xff]  }
  0xce   : > { %1938 = vmatprep.subr.bf16.mxu0 %v8746_v59  ;;  %v9781_v59 = vmov 0  }
  0xd0   : > { %1900 = vmatmul.mubr.bf16.gmra.mrb[28].mxu0 %v8743_v60  ;;  %v8798_v60 = vld [vmem:[%s9934_s30 + $0x18] ss:$28 sps:$4 sm:$0xff]  }
  0xd1   : > { %1939 = vmatpush1.bf16.msra.mxu0 %v8744_v61  ;;  %1942 = vmatprep.mubr.bf16.mxu0 %v8752_v62  ;;  %v8799_v61 = vld [vmem:[%s9934_s30 + $0x50] ss:$28 sps:$4 sm:$0xff]   ;;  %v8800_v62 = vld [vmem:[%s9934_s30 + $0x88] ss:$28 sps:$4 sm:$0xff]  }
  0xd2   : > { %1940 = vmatprep.subr.bf16.mxu0 %v8749_v63  ;;  %v8801_v63 = vld [vmem:[%s9934_s30 + $0xc0] ss:$28 sps:$4 sm:$0xff]  }
  0xd5   : > { %1941 = vmatpush1.bf16.msra.mxu0 %v8747_v3  ;;  %v8805_v3 = vld [vmem:[%s9934_s30 + $0x1a0] ss:$28 sps:$4 sm:$0xff]   ;;  %s11073_s30 = scalar_lea.vmem %s12697_s22, %s7517_s20 }
  0xd6   : > { %2023 = vmatprep.subr.bf16.mxu0 %v8755_v4  ;;  %v8847_v4 = vld [vmem:[%s12673_s4 + $0xd0] ss:$8 sps:$4 sm:$0xff]  }
  0xd7   : > { %2415 = vmatpush1.bf16.msra.mxu1 %v8847_v4 }
  0xd8   : > { %1943 = vmatmul.mubr.bf16.vlgmr.msra.gmra.mrb[0].mxu0 %v8750_v6  ;;  %v8850_v6 = vld [vmem:[%s12673_s4 + $0xe0] ss:$8 sps:$4 sm:$0xff]   ;;  %2416 = vmatprep.subr.bf16.mxu1 %v8848_v5 }
  0xd9   : > { %2024 = vmatpush1.bf16.msra.mxu0 %v8753_v8  ;;  %1952 = vmatprep.mubr.bf16.mxu0 %v8756_v9  ;;  %v8853_v8 = vld [vmem:[%s12673_s4 + $0xf0] ss:$8 sps:$4 sm:$0xff]   ;;  %v8856_v9 = vld [vmem:[%s12675_s6 + $0x4] ss:$16 sps:$4 sm:$0xff]  }
  0xda   : > { %2025 = vmatprep.subr.bf16.mxu0 %v8761_v10  ;;  %v826_v10 = vlaneseq  ;;  %v8866_v5 = vld [vmem:[%s12675_s6 + $0x80] ss:$16 sps:$4 sm:$0xff]  }
  0xdb   : > { %2417 = vmatpush1.bf16.msra.mxu1 %v8850_v6 }
  0xdc   : > { %2418 = vmatprep.subr.bf16.mxu1 %v8851_v7  ;;  %v10399_v11 = vshrl.u32 %v826_v10, 7 }
  0xdd   : > { %2026 = vmatpush1.bf16.msra.mxu0 %v8759_v12 }
  0xde   : > { %2027 = vmatprep.subr.bf16.mxu0 %v8767_v13  ;;  %v10402_v12 = vsub.s32 0, %v10399_v11  ;;  %v824_v13 = vld [vmem:[%s12696_s27] sm:$0x3]  ;;  %v10408_v14 = vsub.s32 1, %v10399_v11 }
  0xdf   : > { %2419 = vmatpush1.bf16.msra.mxu1 %v8853_v8  ;;  %v8871_v8 = vld [vmem:[%s12675_s6 + $0xa4] ss:$16 sps:$4 sm:$0xff]  }
  0xe0   : > { %1953 = vmatmul.mubr.bf16.gmra.mrb[4].mxu0 %v8758_v16  ;;  %2955 = vmatprep.subr.bf16.mxu1 %v8856_v9  ;;  %v10411_v15 = vrot.slane %v824_v13, %v10402_v12  ;;  %v10414_v16 = vrot.slane %v824_v13, %v10408_v14 }
  0xe1   : > { %1962 = vmatprep.mubr.bf16.mxu0 %v8762_v18  ;;  %2028 = vmatpush1.bf16.msra.mxu0 %v8765_v19 }
  0xe2   : > { %2029 = vmatprep.subr.bf16.mxu0 %v8773_v20 }
  0xe5   : > { %2030 = vmatpush1.bf16.msra.mxu0 %v8771_v23 }
  0xe6   : > { %2031 = vmatprep.subr.bf16.mxu0 %v8779_v24 }
  0xe8   : > { %1963 = vmatmul.mubr.bf16.gmra.mrb[8].mxu0 %v8764_v26 }
  0xe9   : > { %1972 = vmatprep.mubr.bf16.mxu0 %v8768_v28  ;;  %2032 = vmatpush1.bf16.msra.mxu0 %v8777_v29 }
  0xea   : > { %2033 = vmatprep.subr.bf16.mxu0 %v8785_v30 }
  0xed   : > { %2034 = vmatpush1.bf16.msra.mxu0 %v8783_v33 }
  0xee   : > { %2035 = vmatprep.subr.bf16.mxu0 %v8791_v34 }
  0xf0   : > { %1973 = vmatmul.mubr.bf16.gmra.mrb[12].mxu0 %v8770_v36 }
  0xf1   : > { %1982 = vmatprep.mubr.bf16.mxu0 %v8774_v38  ;;  %2036 = vmatpush1.bf16.msra.mxu0 %v8789_v39 }
  0xf2   : > { %2037 = vmatprep.subr.bf16.mxu0 %v8797_v40 }
  0xf5   : > { %2038 = vmatpush1.bf16.msra.mxu0 %v8795_v43 }
  0xf8   : > { %1983 = vmatmul.mubr.bf16.gmra.mrb[16].mxu0 %v8776_v45 }
  0xf9   : > { %1992 = vmatprep.mubr.bf16.mxu0 %v8780_v47 }
 0x100   : > { %1993 = vmatmul.mubr.bf16.gmra.mrb[20].mxu0 %v8782_v51 }
 0x101   : > { %2002 = vmatprep.mubr.bf16.mxu0 %v8786_v53  ;;  %v8865_v53 = vld [vmem:[%s12675_s6 + $0x64] ss:$16 sps:$4 sm:$0xff]  }
 0x108   : > { %2003 = vmatmul.mubr.bf16.gmra.mrb[24].mxu0 %v8788_v56 }
 0x109   : > { %2012 = vmatprep.mubr.bf16.mxu0 %v8792_v57 }
 0x110   : > { %2013 = vmatmul.mubr.bf16.gmra.mrb[28].mxu0 %v8794_v58 }
 0x111   : > { %2055 = vmatprep.mubr.bf16.mxu0 %v9781_v59 }
 0x118   : > { %2056 = vmatmul.mubr.bf16.vlgmr.msra.gmra.mrb[0].mxu0 %v8798_v60  ;;  %v8863_v60 = vld [vmem:[%s12675_s6 + $0x60] ss:$16 sps:$4 sm:$0xff]  }
 0x119   : > { %2065 = vmatprep.mubr.bf16.mxu0 %v9781_v59 }
 0x120   : > { %2066 = vmatmul.mubr.bf16.gmra.mrb[4].mxu0 %v8799_v61 }
 0x121   : > { %2075 = vmatprep.mubr.bf16.mxu0 %v9781_v59 }
 0x128   : > { %2076 = vmatmul.mubr.bf16.gmra.mrb[8].mxu0 %v8800_v62 }
 0x129   : > { %2085 = vmatprep.mubr.bf16.mxu0 %v9781_v59 }
 0x130   : > { %2086 = vmatmul.mubr.bf16.gmra.mrb[12].mxu0 %v8801_v63  ;;  %v8868_v63 = vld [vmem:[%s12675_s6 + $0x84] ss:$16 sps:$4 sm:$0xff]  }
 0x131   : > { %2095 = vmatprep.mubr.bf16.mxu0 %v9781_v59 }
 0x138   : > { %2096 = vmatmul.mubr.bf16.gmra.mrb[16].mxu0 %v8802_v0 }
 0x139   : > { %2105 = vmatprep.mubr.bf16.mxu0 %v9781_v59 }
 0x140   : > { %2106 = vmatmul.mubr.bf16.gmra.mrb[20].mxu0 %v8803_v1 }
 0x141   : > { %2115 = vmatprep.mubr.bf16.mxu0 %v9781_v59 }
 0x148   : > { %2116 = vmatmul.mubr.bf16.gmra.mrb[24].mxu0 %v8804_v2 }
 0x149   : > { %2125 = vmatprep.mubr.bf16.mxu0 %v9781_v59 }
 0x150   : > { %2126 = vmatmul.mubr.bf16.gmra.mrb[28].mxu0 %v8805_v3 }
 0x1eb   : > { %v2057_v17 = vpop.f32.mrb[0].mxu0 }
 0x1ec   : > { %v8353_v18 = vadd.f32 %v2057_v17, %v10411_v15  ;;  %v2059_v19 = vpop.f32.mrb[1].mxu0 }
 0x1ed   : > { %v8354_v20 = vadd.f32 %v2059_v19, %v10414_v16  ;;  %v2061_v21 = vpop.f32.mrb[2].mxu0  ;;  %v8869_v19 = vld [vmem:[%s12675_s6 + $0xa0] ss:$16 sps:$4 sm:$0xff]  }
 0x1ee   : > { %v8355_v22 = vadd.f32 %v2061_v21, %v10411_v15  ;;  %v2063_v23 = vpop.f32.mrb[3].mxu0  ;;  %v2136_v25 = vmax.f32 %v8353_v18, 0.0 }
 0x1ef   : > { %v8356_v24 = vadd.f32 %v2063_v23, %v10414_v16  ;;  %v2137_v27 = vmax.f32 %v8354_v20, 0.0 }
 0x1f0   : > { %v2138_v26 = vmax.f32 %v8355_v22, 0.0  ;;  %v8874_v22 = vld [vmem:[%s12675_s6 + $0xc4] ss:$16 sps:$4 sm:$0xff]  }
 0x1f1   : > { %v2139_v28 = vmax.f32 %v8356_v24, 0.0 }
 0x1f2   : > { %v2168_v29 = vpack.c.bf16 %v2138_v26, %v2136_v25 }
 0x1f3   : > { %v2067_v30 = vpop.f32.mrb[4].mxu0  ;;  %v2169_v31 = vpack.c.bf16 %v2139_v28, %v2137_v27  ;;  %v8872_v28 = vld [vmem:[%s12675_s6 + $0xc0] ss:$16 sps:$4 sm:$0xff]  }
 0x1f4   : > { %v8357_v33 = vadd.f32 %v2067_v30, %v10411_v15  ;;  %v2069_v34 = vpop.f32.mrb[5].mxu0 }
 0x1f5   : > { %v8358_v36 = vadd.f32 %v2069_v34, %v10414_v16  ;;  %v2071_v37 = vpop.f32.mrb[6].mxu0  ;;  %2420 = vmatprep.mubr.bf16.mxu1 %v2169_v31  ;;  %v8877_v31 = vld [vmem:[%s12675_s6 + $0xe4] ss:$16 sps:$4 sm:$0xff]  }
 0x1f6   : > { %v8359_v38 = vadd.f32 %v2071_v37, %v10411_v15  ;;  %v2073_v39 = vpop.f32.mrb[7].mxu0  ;;  %2421 = vmatmul.mubr.bf16.vlgmr.msra.gmra.mrb[0].mxu1 %v2168_v29  ;;  %v2140_v42 = vmax.f32 %v8357_v33, 0.0  ;;  %v8875_v37 = vld [vmem:[%s12675_s6 + $0xe0] ss:$16 sps:$4 sm:$0xff]  }
 0x1f7   : > { %v8360_v40 = vadd.f32 %v2073_v39, %v10414_v16  ;;  %2956 = vmatpush1.bf16.msra.mxu1 %v8854_v32  ;;  %v2141_v45 = vmax.f32 %v8358_v36, 0.0 }
 0x1f8   : > { %v2142_v43 = vmax.f32 %v8359_v38, 0.0  ;;  %2957 = vmatprep.subr.bf16.mxu1 %v8859_v35 }
 0x1f9   : > { %v2143_v46 = vmax.f32 %v8360_v40, 0.0  ;;  %v8880_v40 = vld [vmem:[%s12675_s6 + $0x104] ss:$16 sps:$4 sm:$0xff]  }
 0x1fa   : > { %v2170_v47 = vpack.c.bf16 %v2142_v43, %v2140_v42 }
 0x1fb   : > { %v2171_v48 = vpack.c.bf16 %v2143_v46, %v2141_v45  ;;  %v2077_v49 = vpop.f32.mrb[8].mxu0  ;;  %2958 = vmatpush1.bf16.msra.mxu1 %v8857_v41  ;;  %v8878_v46 = vld [vmem:[%s12675_s6 + $0x100] ss:$16 sps:$4 sm:$0xff]  }
 0x1fc   : > { %v8361_v51 = vadd.f32 %v2077_v49, %v10411_v15  ;;  %v2079_v52 = vpop.f32.mrb[9].mxu0  ;;  %2959 = vmatprep.subr.bf16.mxu1 %v8862_v44  ;;  %v8883_v49 = vld [vmem:[%s12675_s6 + $0x124] ss:$16 sps:$4 sm:$0xff]  }
 0x1fd   : > { %v8362_v54 = vadd.f32 %v2079_v52, %v10414_v16  ;;  %v2081_v55 = vpop.f32.mrb[10].mxu0  ;;  %2430 = vmatprep.mubr.bf16.mxu1 %v2171_v48 }
 0x1fe   : > { %v8363_v56 = vadd.f32 %v2081_v55, %v10411_v15  ;;  %v2083_v57 = vpop.f32.mrb[11].mxu0  ;;  %2431 = vmatmul.mubr.bf16.gmra.mrb[4].mxu1 %v2170_v47  ;;  %v2144_v61 = vmax.f32 %v8361_v51, 0.0  ;;  %v8881_v55 = vld [vmem:[%s12675_s6 + $0x120] ss:$16 sps:$4 sm:$0xff]  }
 0x1ff   : > { %v8364_v58 = vadd.f32 %v2083_v57, %v10414_v16  ;;  %2960 = vmatpush1.bf16.msra.mxu1 %v8860_v50  ;;  %v2145_v0 = vmax.f32 %v8362_v54, 0.0 }
 0x200   : > { %v2146_v62 = vmax.f32 %v8363_v56, 0.0  ;;  %2961 = vmatprep.subr.bf16.mxu1 %v8865_v53 }
 0x201   : > { %v2147_v1 = vmax.f32 %v8364_v58, 0.0  ;;  %v8886_v58 = vld [vmem:[%s12675_s6 + $0x144] ss:$16 sps:$4 sm:$0xff]  }
 0x202   : > { %v2172_v2 = vpack.c.bf16 %v2146_v62, %v2144_v61 }
 0x203   : > { %v2173_v3 = vpack.c.bf16 %v2147_v1, %v2145_v0  ;;  %v2087_v4 = vpop.f32.mrb[12].mxu0  ;;  %2962 = vmatpush1.bf16.msra.mxu1 %v8863_v60  ;;  %v8884_v1 = vld [vmem:[%s12675_s6 + $0x140] ss:$16 sps:$4 sm:$0xff]  }
 0x204   : > { %v8365_v6 = vadd.f32 %v2087_v4, %v10411_v15  ;;  %v2089_v7 = vpop.f32.mrb[13].mxu0  ;;  %2963 = vmatprep.subr.bf16.mxu1 %v8868_v63  ;;  %v8889_v4 = vld [vmem:[%s12675_s6 + $0x164] ss:$16 sps:$4 sm:$0xff]  }
 0x205   : > { %v8366_v9 = vadd.f32 %v2089_v7, %v10414_v16  ;;  %v2091_v10 = vpop.f32.mrb[14].mxu0  ;;  %2440 = vmatprep.mubr.bf16.mxu1 %v2173_v3 }
 0x206   : > { %v8367_v13 = vadd.f32 %v2091_v10, %v10411_v15  ;;  %v2093_v17 = vpop.f32.mrb[15].mxu0  ;;  %2441 = vmatmul.mubr.bf16.gmra.mrb[8].mxu1 %v2172_v2  ;;  %v2148_v20 = vmax.f32 %v8365_v6, 0.0  ;;  %v8887_v10 = vld [vmem:[%s12675_s6 + $0x160] ss:$16 sps:$4 sm:$0xff]  }
 0x207   : > { %v8368_v18 = vadd.f32 %v2093_v17, %v10414_v16  ;;  %2964 = vmatpush1.bf16.msra.mxu1 %v8866_v5  ;;  %v2149_v23 = vmax.f32 %v8366_v9, 0.0 }
 0x208   : > { %v2150_v21 = vmax.f32 %v8367_v13, 0.0  ;;  %2965 = vmatprep.subr.bf16.mxu1 %v8871_v8 }
 0x209   : > { %v2151_v24 = vmax.f32 %v8368_v18, 0.0  ;;  %v8892_v18 = vld [vmem:[%s12675_s6 + $0x184] ss:$16 sps:$4 sm:$0xff]  }
 0x20a   : > { %v2174_v25 = vpack.c.bf16 %v2150_v21, %v2148_v20 }
 0x20b   : > { %v2175_v26 = vpack.c.bf16 %v2151_v24, %v2149_v23  ;;  %v2097_v27 = vpop.f32.mrb[16].mxu0  ;;  %2966 = vmatpush1.bf16.msra.mxu1 %v8869_v19  ;;  %v8890_v24 = vld [vmem:[%s12675_s6 + $0x180] ss:$16 sps:$4 sm:$0xff]  }
 0x20c   : > { %v8369_v29 = vadd.f32 %v2097_v27, %v10411_v15  ;;  %v2099_v30 = vpop.f32.mrb[17].mxu0  ;;  %2967 = vmatprep.subr.bf16.mxu1 %v8874_v22  ;;  %v8895_v27 = vld [vmem:[%s12675_s6 + $0x1a4] ss:$16 sps:$4 sm:$0xff]  }
 0x20d   : > { %v8370_v32 = vadd.f32 %v2099_v30, %v10414_v16  ;;  %v2101_v33 = vpop.f32.mrb[18].mxu0  ;;  %2450 = vmatprep.mubr.bf16.mxu1 %v2175_v26 }
 0x20e   : > { %v8371_v34 = vadd.f32 %v2101_v33, %v10411_v15  ;;  %v2103_v35 = vpop.f32.mrb[19].mxu0  ;;  %2451 = vmatmul.mubr.bf16.gmra.mrb[12].mxu1 %v2174_v25  ;;  %v2152_v38 = vmax.f32 %v8369_v29, 0.0  ;;  %v8893_v33 = vld [vmem:[%s12675_s6 + $0x1a0] ss:$16 sps:$4 sm:$0xff]  }
 0x20f   : > { %v8372_v36 = vadd.f32 %v2103_v35, %v10414_v16  ;;  %2968 = vmatpush1.bf16.msra.mxu1 %v8872_v28  ;;  %v2153_v41 = vmax.f32 %v8370_v32, 0.0 }
 0x210   : > { %v2154_v39 = vmax.f32 %v8371_v34, 0.0  ;;  %2969 = vmatprep.subr.bf16.mxu1 %v8877_v31 }
 0x211   : > { %v2155_v42 = vmax.f32 %v8372_v36, 0.0 }
 0x212   : > { %v2176_v43 = vpack.c.bf16 %v2154_v39, %v2152_v38 }
 0x213   : > { %v2177_v44 = vpack.c.bf16 %v2155_v42, %v2153_v41  ;;  %v2107_v45 = vpop.f32.mrb[20].mxu0  ;;  %2970 = vmatpush1.bf16.msra.mxu1 %v8875_v37  ;;  %v8899_v41 = vld [vmem:[%s12675_s6 + $0x1e0] ss:$16 sps:$4 sm:$0xff]   ;;  %v8904_v42 = vld [vmem:[%s12675_s6 + $0xc] ss:$16 sps:$4 sm:$0xff]  }
 0x214   : > { %v8373_v47 = vadd.f32 %v2107_v45, %v10411_v15  ;;  %v2109_v48 = vpop.f32.mrb[21].mxu0  ;;  %2971 = vmatprep.subr.bf16.mxu1 %v8880_v40  ;;  %v8901_v40 = vld [vmem:[%s12675_s6 + $0x1e4] ss:$16 sps:$4 sm:$0xff]  }
 0x215   : > { %v8374_v50 = vadd.f32 %v2109_v48, %v10414_v16  ;;  %v2111_v51 = vpop.f32.mrb[22].mxu0  ;;  %2460 = vmatprep.mubr.bf16.mxu1 %v2177_v44 }
 0x216   : > { %v8375_v52 = vadd.f32 %v2111_v51, %v10411_v15  ;;  %v2113_v53 = vpop.f32.mrb[23].mxu0  ;;  %2461 = vmatmul.mubr.bf16.gmra.mrb[16].mxu1 %v2176_v43  ;;  %v2156_v56 = vmax.f32 %v8373_v47, 0.0  ;;  %v2216_v43 = vld [vmem:[%s12674_s5] sm:$0x3] }
 0x217   : > { %v8376_v54 = vadd.f32 %v2113_v53, %v10414_v16  ;;  %2972 = vmatpush1.bf16.msra.mxu1 %v8878_v46  ;;  %v2157_v60 = vmax.f32 %v8374_v50, 0.0  ;;  %v10548_v44 = vrot.slane %v2216_v43, %v10402_v12  ;;  %v10551_v45 = vrot.slane %v2216_v43, %v10408_v14 }
 0x218   : > { %v2158_v57 = vmax.f32 %v8375_v52, 0.0  ;;  %2973 = vmatprep.subr.bf16.mxu1 %v8883_v49 }
 0x219   : > { %v2159_v61 = vmax.f32 %v8376_v54, 0.0 }
 0x21a   : > { %v2178_v62 = vpack.c.bf16 %v2158_v57, %v2156_v56 }
 0x21b   : > { %v2179_v63 = vpack.c.bf16 %v2159_v61, %v2157_v60  ;;  %v2117_v0 = vpop.f32.mrb[24].mxu0  ;;  %2974 = vmatpush1.bf16.msra.mxu1 %v8881_v55 }
 0x21c   : > { %v8377_v2 = vadd.f32 %v2117_v0, %v10411_v15  ;;  %v2119_v3 = vpop.f32.mrb[25].mxu0  ;;  %2975 = vmatprep.subr.bf16.mxu1 %v8886_v58 }
 0x21d   : > { %v8378_v5 = vadd.f32 %v2119_v3, %v10414_v16  ;;  %v2121_v6 = vpop.f32.mrb[26].mxu0  ;;  %2470 = vmatprep.mubr.bf16.mxu1 %v2179_v63 }
 0x21e   : > { %v8379_v7 = vadd.f32 %v2121_v6, %v10411_v15  ;;  %v2123_v8 = vpop.f32.mrb[27].mxu0  ;;  %2471 = vmatmul.mubr.bf16.gmra.mrb[20].mxu1 %v2178_v62  ;;  %v2160_v13 = vmax.f32 %v8377_v2, 0.0  ;;  %v8902_v62 = vld [vmem:[%s12675_s6 + $0x8] ss:$16 sps:$4 sm:$0xff]  }
 0x21f   : > { %v8380_v9 = vadd.f32 %v2123_v8, %v10414_v16  ;;  %2976 = vmatpush1.bf16.msra.mxu1 %v8884_v1  ;;  %v2161_v19 = vmax.f32 %v8378_v5, 0.0  ;;  %v8907_v1 = vld [vmem:[%s12675_s6 + $0x2c] ss:$16 sps:$4 sm:$0xff]  }
 0x220   : > { %v2162_v17 = vmax.f32 %v8379_v7, 0.0  ;;  %2977 = vmatprep.subr.bf16.mxu1 %v8889_v4  ;;  %v8905_v7 = vld [vmem:[%s12675_s6 + $0x28] ss:$16 sps:$4 sm:$0xff]  }
 0x221   : > { %v2163_v20 = vmax.f32 %v8380_v9, 0.0 }
 0x222   : > { %v2180_v21 = vpack.c.bf16 %v2162_v17, %v2160_v13 }
 0x223   : > { %v2181_v22 = vpack.c.bf16 %v2163_v20, %v2161_v19  ;;  %v2127_v23 = vpop.f32.mrb[28].mxu0  ;;  %2978 = vmatpush1.bf16.msra.mxu1 %v8887_v10  ;;  %v8910_v10 = vld [vmem:[%s12675_s6 + $0x4c] ss:$16 sps:$4 sm:$0xff]  }
 0x224   : > { %v8381_v25 = vadd.f32 %v2127_v23, %v10411_v15  ;;  %v2129_v26 = vpop.f32.mrb[29].mxu0  ;;  %2979 = vmatprep.subr.bf16.mxu1 %v8892_v18 }
 0x225   : > { %v8382_v28 = vadd.f32 %v2129_v26, %v10414_v16  ;;  %v2131_v29 = vpop.f32.mrb[30].mxu0  ;;  %2480 = vmatprep.mubr.bf16.mxu1 %v2181_v22 }
 0x226   : > { %v8383_v30 = vadd.f32 %v2131_v29, %v10411_v15  ;;  %v2133_v31 = vpop.f32.mrb[31].mxu0  ;;  %2481 = vmatmul.mubr.bf16.gmra.mrb[24].mxu1 %v2180_v21  ;;  %v2164_v34 = vmax.f32 %v8381_v25, 0.0  ;;  %v8898_v15 = vld [vmem:[%s12675_s6 + $0x1c4] ss:$16 sps:$4 sm:$0xff]   ;;  %v8908_v21 = vld [vmem:[%s12675_s6 + $0x48] ss:$16 sps:$4 sm:$0xff]  }
 0x227   : > { %v8384_v32 = vadd.f32 %v2133_v31, %v10414_v16  ;;  %2980 = vmatpush1.bf16.msra.mxu1 %v8890_v24  ;;  %v2165_v36 = vmax.f32 %v8382_v28, 0.0  ;;  %v8896_v16 = vld [vmem:[%s12675_s6 + $0x1c0] ss:$16 sps:$4 sm:$0xff]   ;;  %v8913_v24 = vld [vmem:[%s12675_s6 + $0x6c] ss:$16 sps:$4 sm:$0xff]  }
 0x228   : > { %v2166_v35 = vmax.f32 %v8383_v30, 0.0  ;;  %2981 = vmatprep.subr.bf16.mxu1 %v8895_v27  ;;  %v8911_v30 = vld [vmem:[%s12675_s6 + $0x68] ss:$16 sps:$4 sm:$0xff]  }
 0x229   : > { %v2167_v37 = vmax.f32 %v8384_v32, 0.0 }
 0x22a   : > { %v2182_v38 = vpack.c.bf16 %v2166_v35, %v2164_v34 }
 0x22b   : > { %v2183_v39 = vpack.c.bf16 %v2167_v37, %v2165_v36  ;;  %2982 = vmatpush1.bf16.msra.mxu1 %v8893_v33  ;;  %v8916_v33 = vld [vmem:[%s12675_s6 + $0x8c] ss:$16 sps:$4 sm:$0xff]  }
 0x22c   : > { %2983 = vmatprep.subr.bf16.mxu1 %v8898_v15 }
 0x22d   : > { %2490 = vmatprep.mubr.bf16.mxu1 %v2183_v39  ;;  %v8914_v39 = vld [vmem:[%s12675_s6 + $0x88] ss:$16 sps:$4 sm:$0xff]  }
 0x22e   : > { %2491 = vmatmul.mubr.bf16.gmra.mrb[28].mxu1 %v2182_v38 }
 0x22f   : > { %2984 = vmatpush1.bf16.msra.mxu1 %v8896_v16 }
 0x230   : > { %2985 = vmatprep.subr.bf16.mxu1 %v8901_v40  ;;  %v8919_v40 = vld [vmem:[%s12675_s6 + $0xac] ss:$16 sps:$4 sm:$0xff]  }
 0x233   : > { %2986 = vmatpush1.bf16.msra.mxu1 %v8899_v41 }
 0x234   : > { %3068 = vmatprep.subr.bf16.mxu1 %v8904_v42 }
 0x2c9   : > { %v2422_v46 = vpop.f32.mrb[0].mxu1 }
 0x2ca   : > { %v2423_v47 = vadd.f32 %v2422_v46, %v10548_v44  ;;  %v2424_v48 = vpop.f32.mrb[1].mxu1 }
 0x2cb   : > { %v2425_v49 = vadd.f32 %v2424_v48, %v10551_v45  ;;  %v2426_v50 = vpop.f32.mrb[2].mxu1  ;;  %v8917_v48 = vld [vmem:[%s12675_s6 + $0xa8] ss:$16 sps:$4 sm:$0xff]  }
 0x2cc   : > { %v2427_v51 = vadd.f32 %v2426_v50, %v10548_v44  ;;  %v2428_v52 = vpop.f32.mrb[3].mxu1  ;;  %v2501_v54 = vmax.f32 %v2423_v47, 0.0 }
 0x2cd   : > { %v2429_v53 = vadd.f32 %v2428_v52, %v10551_v45  ;;  %v2502_v56 = vmax.f32 %v2425_v49, 0.0 }
 0x2ce   : > { %v2503_v55 = vmax.f32 %v2427_v51, 0.0  ;;  %v8922_v51 = vld [vmem:[%s12675_s6 + $0xcc] ss:$16 sps:$4 sm:$0xff]  }
 0x2cf   : > { %v2504_v57 = vmax.f32 %v2429_v53, 0.0 }
 0x2d0   : > { %v10557_v58 = vpack.c.bf16 %v2503_v55, %v2501_v54 }
 0x2d1   : > { %v10559_v60 = vpack.c.bf16 %v2504_v57, %v2502_v56  ;;  %v2432_v61 = vpop.f32.mrb[4].mxu1  ;;  %v8920_v57 = vld [vmem:[%s12675_s6 + $0xc8] ss:$16 sps:$4 sm:$0xff]  }
 0x2d2   : > { %v2433_v63 = vadd.f32 %v2432_v61, %v10548_v44  ;;  %v2434_v0 = vpop.f32.mrb[5].mxu1 }
 0x2d3   : > { %v2435_v2 = vadd.f32 %v2434_v0, %v10551_v45  ;;  %v2436_v3 = vpop.f32.mrb[6].mxu1  ;;  %2987 = vmatprep.mubr.bf16.mxu1 %v10559_v60 }
 0x2d4   : > { %v2437_v4 = vadd.f32 %v2436_v3, %v10548_v44  ;;  %v2438_v5 = vpop.f32.mrb[7].mxu1  ;;  %2988 = vmatmul.mubr.bf16.vlgmr.msra.gmra.mrb[32].mxu1 %v10557_v58  ;;  %v2505_v8 = vmax.f32 %v2433_v63, 0.0  ;;  %v8925_v63 = vld [vmem:[%s12675_s6 + $0xec] ss:$16 sps:$4 sm:$0xff]  }
 0x2d5   : > { %v2439_v6 = vadd.f32 %v2438_v5, %v10551_v45  ;;  %3069 = vmatpush1.bf16.msra.mxu1 %v8902_v62  ;;  %v2506_v13 = vmax.f32 %v2435_v2, 0.0  ;;  %v8923_v5 = vld [vmem:[%s12675_s6 + $0xe8] ss:$16 sps:$4 sm:$0xff]  }
 0x2d6   : > { %v2507_v9 = vmax.f32 %v2437_v4, 0.0  ;;  %3070 = vmatprep.subr.bf16.mxu1 %v8907_v1 }
 0x2d7   : > { %v2508_v17 = vmax.f32 %v2439_v6, 0.0 }
 0x2d8   : > { %v10579_v18 = vpack.c.bf16 %v2507_v9, %v2505_v8  ;;  %v8928_v8 = vld [vmem:[%s12675_s6 + $0x10c] ss:$16 sps:$4 sm:$0xff]  }
 0x2d9   : > { %v10581_v19 = vpack.c.bf16 %v2508_v17, %v2506_v13  ;;  %v2442_v20 = vpop.f32.mrb[8].mxu1  ;;  %3071 = vmatpush1.bf16.msra.mxu1 %v8905_v7 }
 0x2da   : > { %v2443_v22 = vadd.f32 %v2442_v20, %v10548_v44  ;;  %v2444_v23 = vpop.f32.mrb[9].mxu1  ;;  %3072 = vmatprep.subr.bf16.mxu1 %v8910_v10 }
 0x2db   : > { %v2445_v25 = vadd.f32 %v2444_v23, %v10551_v45  ;;  %v2446_v26 = vpop.f32.mrb[10].mxu1  ;;  %2997 = vmatprep.mubr.bf16.mxu1 %v10581_v19 }
 0x2dc   : > { %v2447_v27 = vadd.f32 %v2446_v26, %v10548_v44  ;;  %v2448_v28 = vpop.f32.mrb[11].mxu1  ;;  %2998 = vmatmul.mubr.bf16.gmra.mrb[36].mxu1 %v10579_v18  ;;  %v2509_v31 = vmax.f32 %v2443_v22, 0.0 }
 0x2dd   : > { %v2449_v29 = vadd.f32 %v2448_v28, %v10551_v45  ;;  %3073 = vmatpush1.bf16.msra.mxu1 %v8908_v21  ;;  %v2510_v34 = vmax.f32 %v2445_v25, 0.0  ;;  %v8926_v21 = vld [vmem:[%s12675_s6 + $0x108] ss:$16 sps:$4 sm:$0xff]  }
 0x2de   : > { %v2511_v32 = vmax.f32 %v2447_v27, 0.0  ;;  %3074 = vmatprep.subr.bf16.mxu1 %v8913_v24  ;;  %v8931_v24 = vld [vmem:[%s12675_s6 + $0x12c] ss:$16 sps:$4 sm:$0xff]  }
 0x2df   : > { %v2512_v35 = vmax.f32 %v2449_v29, 0.0 }
 0x2e0   : > { %v10601_v36 = vpack.c.bf16 %v2511_v32, %v2509_v31 }
 0x2e1   : > { %v10603_v37 = vpack.c.bf16 %v2512_v35, %v2510_v34  ;;  %v2452_v38 = vpop.f32.mrb[12].mxu1  ;;  %3075 = vmatpush1.bf16.msra.mxu1 %v8911_v30  ;;  %v8929_v30 = vld [vmem:[%s12675_s6 + $0x128] ss:$16 sps:$4 sm:$0xff]  }
 0x2e2   : > { %v2453_v15 = vadd.f32 %v2452_v38, %v10548_v44  ;;  %v2454_v16 = vpop.f32.mrb[13].mxu1  ;;  %3076 = vmatprep.subr.bf16.mxu1 %v8916_v33  ;;  %v8934_v33 = vld [vmem:[%s12675_s6 + $0x14c] ss:$16 sps:$4 sm:$0xff]  }
 0x2e3   : > { %v2455_v41 = vadd.f32 %v2454_v16, %v10551_v45  ;;  %v2456_v42 = vpop.f32.mrb[14].mxu1  ;;  %3007 = vmatprep.mubr.bf16.mxu1 %v10603_v37  ;;  %v8932_v16 = vld [vmem:[%s12675_s6 + $0x148] ss:$16 sps:$4 sm:$0xff]  }
 0x2e4   : > { %v2457_v43 = vadd.f32 %v2456_v42, %v10548_v44  ;;  %v2458_v46 = vpop.f32.mrb[15].mxu1  ;;  %3008 = vmatmul.mubr.bf16.gmra.mrb[40].mxu1 %v10601_v36  ;;  %v2513_v49 = vmax.f32 %v2453_v15, 0.0  ;;  %v8937_v42 = vld [vmem:[%s12675_s6 + $0x16c] ss:$16 sps:$4 sm:$0xff]  }
 0x2e5   : > { %v2459_v47 = vadd.f32 %v2458_v46, %v10551_v45  ;;  %3077 = vmatpush1.bf16.msra.mxu1 %v8914_v39  ;;  %v2514_v52 = vmax.f32 %v2455_v41, 0.0 }
 0x2e6   : > { %v2515_v50 = vmax.f32 %v2457_v43, 0.0  ;;  %3078 = vmatprep.subr.bf16.mxu1 %v8919_v40 }
 0x2e7   : > { %v2516_v53 = vmax.f32 %v2459_v47, 0.0 }
 0x2e8   : > { %v10623_v54 = vpack.c.bf16 %v2515_v50, %v2513_v49  ;;  %v8935_v50 = vld [vmem:[%s12675_s6 + $0x168] ss:$16 sps:$4 sm:$0xff]  }
 0x2e9   : > { %v10625_v55 = vpack.c.bf16 %v2516_v53, %v2514_v52  ;;  %v2462_v56 = vpop.f32.mrb[16].mxu1  ;;  %3079 = vmatpush1.bf16.msra.mxu1 %v8917_v48  ;;  %v8940_v53 = vld [vmem:[%s12675_s6 + $0x18c] ss:$16 sps:$4 sm:$0xff]  }
 0x2ea   : > { %v2463_v61 = vadd.f32 %v2462_v56, %v10548_v44  ;;  %v2464_v62 = vpop.f32.mrb[17].mxu1  ;;  %3080 = vmatprep.subr.bf16.mxu1 %v8922_v51 }
 0x2eb   : > { %v2465_v0 = vadd.f32 %v2464_v62, %v10551_v45  ;;  %v2466_v1 = vpop.f32.mrb[18].mxu1  ;;  %3017 = vmatprep.mubr.bf16.mxu1 %v10625_v55 }
 0x2ec   : > { %v2467_v2 = vadd.f32 %v2466_v1, %v10548_v44  ;;  %v2468_v3 = vpop.f32.mrb[19].mxu1  ;;  %3018 = vmatmul.mubr.bf16.gmra.mrb[44].mxu1 %v10623_v54  ;;  %v2517_v6 = vmax.f32 %v2463_v61, 0.0 }
 0x2ed   : > { %v2469_v4 = vadd.f32 %v2468_v3, %v10551_v45  ;;  %3081 = vmatpush1.bf16.msra.mxu1 %v8920_v57  ;;  %v2518_v9 = vmax.f32 %v2465_v0, 0.0  ;;  %v8938_v0 = vld [vmem:[%s12675_s6 + $0x188] ss:$16 sps:$4 sm:$0xff]   ;;  %v8943_v3 = vld [vmem:[%s12675_s6 + $0x1ac] ss:$16 sps:$4 sm:$0xff]  }
 0x2ee   : > { %v2519_v7 = vmax.f32 %v2467_v2, 0.0  ;;  %3082 = vmatprep.subr.bf16.mxu1 %v8925_v63 }
 0x2ef   : > { %v2520_v10 = vmax.f32 %v2469_v4, 0.0 }
 0x2f0   : > { %v10645_v13 = vpack.c.bf16 %v2519_v7, %v2517_v6 }
 0x2f1   : > { %v10647_v17 = vpack.c.bf16 %v2520_v10, %v2518_v9  ;;  %v2472_v20 = vpop.f32.mrb[20].mxu1  ;;  %3083 = vmatpush1.bf16.msra.mxu1 %v8923_v5  ;;  %v8941_v9 = vld [vmem:[%s12675_s6 + $0x1a8] ss:$16 sps:$4 sm:$0xff]  }
 0x2f2   : > { %v2473_v22 = vadd.f32 %v2472_v20, %v10548_v44  ;;  %v2474_v23 = vpop.f32.mrb[21].mxu1  ;;  %3084 = vmatprep.subr.bf16.mxu1 %v8928_v8 }
 0x2f3   : > { %v2475_v25 = vadd.f32 %v2474_v23, %v10551_v45  ;;  %v2476_v26 = vpop.f32.mrb[22].mxu1  ;;  %3027 = vmatprep.mubr.bf16.mxu1 %v10647_v17 }
 0x2f4   : > { %v2477_v27 = vadd.f32 %v2476_v26, %v10548_v44  ;;  %v2478_v28 = vpop.f32.mrb[23].mxu1  ;;  %3028 = vmatmul.mubr.bf16.gmra.mrb[48].mxu1 %v10645_v13  ;;  %v2521_v31 = vmax.f32 %v2473_v22, 0.0  ;;  %v8947_v26 = vld [vmem:[%s12675_s6 + $0x1e8] ss:$16 sps:$4 sm:$0xff]  }
 0x2f5   : > { %v2479_v29 = vadd.f32 %v2478_v28, %v10551_v45  ;;  %3085 = vmatpush1.bf16.msra.mxu1 %v8926_v21  ;;  %v2522_v34 = vmax.f32 %v2475_v25, 0.0  ;;  %v8946_v21 = vld [vmem:[%s12675_s6 + $0x1cc] ss:$16 sps:$4 sm:$0xff]   ;;  %v8951_v28 = vld [vmem:[%s12677_s8] sm:$0xff]  }
 0x2f6   : > { %v2523_v32 = vmax.f32 %v2477_v27, 0.0  ;;  %3086 = vmatprep.subr.bf16.mxu1 %v8931_v24  ;;  %v8949_v25 = vld [vmem:[%s12675_s6 + $0x1ec] ss:$16 sps:$4 sm:$0xff]   ;;  %v8950_v27 = vld [vmem:[%s12677_s8 + $0x40] sm:$0xff]  }
 0x2f7   : > { %v2524_v35 = vmax.f32 %v2479_v29, 0.0  ;;  %v8952_v29 = vld [vmem:[%s12677_s8 + $0x48] sm:$0xff]  }
 0x2f8   : > { %v10667_v38 = vpack.c.bf16 %v2523_v32, %v2521_v31  ;;  %v8955_v31 = vld [vmem:[%s12677_s8 + $0x10] sm:$0xff]   ;;  %v8958_v32 = vld [vmem:[%s12677_s8 + $0x60] sm:$0xff]  }
 0x2f9   : > { %v10669_v39 = vpack.c.bf16 %v2524_v35, %v2522_v34  ;;  %v2482_v15 = vpop.f32.mrb[24].mxu1  ;;  %3087 = vmatpush1.bf16.msra.mxu1 %v8929_v30  ;;  %v8954_v30 = vld [vmem:[%s12677_s8 + $0x50] sm:$0xff]  }
 0x2fa   : > { %v2483_v40 = vadd.f32 %v2482_v15, %v10548_v44  ;;  %v2484_v41 = vpop.f32.mrb[25].mxu1  ;;  %3088 = vmatprep.subr.bf16.mxu1 %v8934_v33  ;;  %v8959_v33 = vld [vmem:[%s12677_s8 + $0x20] sm:$0xff]   ;;  %v8962_v34 = vld [vmem:[%s12677_s8 + $0x70] sm:$0xff]  }
 0x2fb   : > { %v2485_v43 = vadd.f32 %v2484_v41, %v10551_v45  ;;  %v2486_v46 = vpop.f32.mrb[26].mxu1  ;;  %3037 = vmatprep.mubr.bf16.mxu1 %v10669_v39  ;;  %v8963_v35 = vld [vmem:[%s12677_s8 + $0x30] sm:$0xff]   ;;  %v8967_v15 = vld [vmem:[%s12677_s8 + $0x80] sm:$0xff]  }
 0x2fc   : > { %v2487_v47 = vadd.f32 %v2486_v46, %v10548_v44  ;;  %v2488_v48 = vpop.f32.mrb[27].mxu1  ;;  %3038 = vmatmul.mubr.bf16.gmra.mrb[52].mxu1 %v10667_v38  ;;  %v2525_v51 = vmax.f32 %v2483_v40, 0.0  ;;  %v8973_v40 = vld [vmem:[%s12677_s8 + $0x98] sm:$0xff]   ;;  %v8974_v41 = vld [vmem:[%s12677_s8 + $0xe0] sm:$0xff]   ;;  %v8977_v46 = vld [vmem:[%s12677_s8 + $0xa8] sm:$0xff]  }
 0x2fd   : > { %v2489_v49 = vadd.f32 %v2488_v48, %v10551_v45  ;;  %3089 = vmatpush1.bf16.msra.mxu1 %v8932_v16  ;;  %v2526_v56 = vmax.f32 %v2485_v43, 0.0  ;;  %v8972_v16 = vld [vmem:[%s12677_s8 + $0xd8] sm:$0xff]   ;;  %v8976_v43 = vld [vmem:[%s12677_s8 + $0xe8] sm:$0xff]   ;;  %v8979_v48 = vld [vmem:[%s12677_s8 + $0xb0] sm:$0xff]  }
 0x2fe   : > { %v2527_v52 = vmax.f32 %v2487_v47, 0.0  ;;  %3090 = vmatprep.subr.bf16.mxu1 %v8937_v42  ;;  %v8975_v42 = vld [vmem:[%s12677_s8 + $0xa0] sm:$0xff]   ;;  %v8978_v47 = vld [vmem:[%s12677_s8 + $0xf0] sm:$0xff]  }
 0x2ff   : > { %v2528_v57 = vmax.f32 %v2489_v49, 0.0  ;;  %v8980_v49 = vld [vmem:[%s12677_s8 + $0xf8] sm:$0xff]  }
 0x300   : > { %v10689_v61 = vpack.c.bf16 %v2527_v52, %v2525_v51  ;;  %v10841_v51 = vld [vmem:[%s12676_s7] sm:$0xf] }
 0x301   : > { %v10691_v62 = vpack.c.bf16 %v2528_v57, %v2526_v56  ;;  %v2492_v63 = vpop.f32.mrb[28].mxu1  ;;  %3091 = vmatpush1.bf16.msra.mxu1 %v8935_v50  ;;  %v8981_v50 = vld [vmem:[%s12677_s8 + $0xb8] sm:$0xff]   ;;  %v10845_v52 = vrot.slane %v10841_v51, %v10402_v12 }
 0x302   : > { %v2493_v1 = vadd.f32 %v2492_v63, %v10548_v44  ;;  %v2494_v2 = vpop.f32.mrb[29].mxu1  ;;  %3092 = vmatprep.subr.bf16.mxu1 %v8940_v53  ;;  %v10849_v53 = vrot.slane %v10841_v51, %v10408_v14 }
 0x303   : > { %v2495_v4 = vadd.f32 %v2494_v2, %v10551_v45  ;;  %v2496_v5 = vpop.f32.mrb[30].mxu1  ;;  %3047 = vmatprep.mubr.bf16.mxu1 %v10691_v62 }
 0x304   : > { %v2497_v6 = vadd.f32 %v2496_v5, %v10548_v44  ;;  %v2498_v7 = vpop.f32.mrb[31].mxu1  ;;  %3048 = vmatmul.mubr.bf16.gmra.mrb[56].mxu1 %v10689_v61  ;;  %v2529_v10 = vmax.f32 %v2493_v1, 0.0 }
 0x305   : > { %v2499_v8 = vadd.f32 %v2498_v7, %v10551_v45  ;;  %3093 = vmatpush1.bf16.msra.mxu1 %v8938_v0  ;;  %v2530_v22 = vmax.f32 %v2495_v4, 0.0  ;;  %v8944_v45 = vld [vmem:[%s12675_s6 + $0x1c8] ss:$16 sps:$4 sm:$0xff]  }
 0x306   : > { %v2531_v20 = vmax.f32 %v2497_v6, 0.0  ;;  %3094 = vmatprep.subr.bf16.mxu1 %v8943_v3 }
 0x307   : > { %v2532_v23 = vmax.f32 %v2499_v8, 0.0 }
 0x308   : > { %v10711_v44 = vpack.c.bf16 %v2531_v20, %v2529_v10 }
 0x309   : > { %v10713_v24 = vpack.c.bf16 %v2532_v23, %v2530_v22  ;;  %3095 = vmatpush1.bf16.msra.mxu1 %v8941_v9 }
 0x30a   : > { %3096 = vmatprep.subr.bf16.mxu1 %v8946_v21 }
 0x30b   : > { %3057 = vmatprep.mubr.bf16.mxu1 %v10713_v24 }
 0x30c   : > { %3058 = vmatmul.mubr.bf16.gmra.mrb[60].mxu1 %v10711_v44 }
 0x30d   : > { %3097 = vmatpush1.bf16.msra.mxu1 %v8944_v45  ;;  %3100 = vmatprep.mubr.bf16.mxu1 %v10559_v60  ;;  %v8953_v60 = vld [vmem:[%s12677_s8 + $0x8] sm:$0xff]  }
 0x30e   : > { %3098 = vmatprep.subr.bf16.mxu1 %v8949_v25 }
 0x311   : > { %3099 = vmatpush1.bf16.msra.mxu1 %v8947_v26 }
 0x312   : > { %8161 = vmatprep.subr.bf16.mxu1 %v8950_v27 }
 0x314   : > { %3101 = vmatmul.mubr.bf16.vlgmr.msra.gmra.mrb[64].mxu1 %v10557_v58  ;;  %v8956_v58 = vld [vmem:[%s12677_s8 + $0x58] sm:$0xff]  }
 0x315   : > { %3110 = vmatprep.mubr.bf16.mxu1 %v10581_v19  ;;  %8162 = vmatpush3.bf16.msra.mxu1 %v8951_v28  ;;  %v8957_v19 = vld [vmem:[%s12677_s8 + $0x18] sm:$0xff]  }
 0x316   : > { %8163 = vmatprep.subr.bf16.mxu1 %v8952_v29 }
 0x319   : > { %8164 = vmatpush3.bf16.msra.mxu1 %v8953_v60 }
 0x31a   : > { %8165 = vmatprep.subr.bf16.mxu1 %v8954_v30 }
 0x31c   : > { %3111 = vmatmul.mubr.bf16.gmra.mrb[68].mxu1 %v10579_v18  ;;  %v8960_v18 = vld [vmem:[%s12677_s8 + $0x68] sm:$0xff]  }
 0x31d   : > { %3120 = vmatprep.mubr.bf16.mxu1 %v10603_v37  ;;  %8166 = vmatpush3.bf16.msra.mxu1 %v8955_v31  ;;  %v8961_v37 = vld [vmem:[%s12677_s8 + $0x28] sm:$0xff]  }
 0x31e   : > { %8167 = vmatprep.subr.bf16.mxu1 %v8956_v58 }
 0x321   : > { %8168 = vmatpush3.bf16.msra.mxu1 %v8957_v19 }
 0x322   : > { %8169 = vmatprep.subr.bf16.mxu1 %v8958_v32 }
 0x324   : > { %3121 = vmatmul.mubr.bf16.gmra.mrb[72].mxu1 %v10601_v36  ;;  %v8964_v36 = vld [vmem:[%s12677_s8 + $0x78] sm:$0xff]  }
 0x325   : > { %3130 = vmatprep.mubr.bf16.mxu1 %v10625_v55  ;;  %8170 = vmatpush3.bf16.msra.mxu1 %v8959_v33  ;;  %v8965_v55 = vld [vmem:[%s12677_s8 + $0x38] sm:$0xff]  }
 0x326   : > { %8171 = vmatprep.subr.bf16.mxu1 %v8960_v18 }
 0x329   : > { %8172 = vmatpush3.bf16.msra.mxu1 %v8961_v37 }
 0x32a   : > { %8173 = vmatprep.subr.bf16.mxu1 %v8962_v34 }
 0x32c   : > { %3131 = vmatmul.mubr.bf16.gmra.mrb[76].mxu1 %v10623_v54  ;;  %v8966_v54 = vld [vmem:[%s12677_s8 + $0xc0] sm:$0xff]  }
 0x32d   : > { %3140 = vmatprep.mubr.bf16.mxu1 %v10647_v17  ;;  %8174 = vmatpush3.bf16.msra.mxu1 %v8963_v35  ;;  %v8969_v17 = vld [vmem:[%s12677_s8 + $0x88] sm:$0xff]  }
 0x32e   : > { %8175 = vmatprep.subr.bf16.mxu1 %v8964_v36  ;;  %8225 = vmatprep.subr.bf16.mxu0 %v8966_v54 }
 0x32f   : > { %8226 = vmatpush3.bf16.msra.mxu0 %v8967_v15 }
 0x331   : > { %8176 = vmatpush3.bf16.msra.mxu1 %v8965_v55 }
 0x334   : > { %3141 = vmatmul.mubr.bf16.gmra.mrb[80].mxu1 %v10645_v13  ;;  %v8968_v13 = vld [vmem:[%s12677_s8 + $0xc8] sm:$0xff]  }
 0x335   : > { %3150 = vmatprep.mubr.bf16.mxu1 %v10669_v39  ;;  %8227 = vmatprep.subr.bf16.mxu0 %v8968_v13  ;;  %v8971_v39 = vld [vmem:[%s12677_s8 + $0x90] sm:$0xff]  }
 0x336   : > { %8228 = vmatpush3.bf16.msra.mxu0 %v8969_v17 }
 0x33c   : > { %3151 = vmatmul.mubr.bf16.gmra.mrb[84].mxu1 %v10667_v38  ;;  %v8970_v38 = vld [vmem:[%s12677_s8 + $0xd0] sm:$0xff]  }
 0x33d   : > { %3160 = vmatprep.mubr.bf16.mxu1 %v10691_v62  ;;  %8229 = vmatprep.subr.bf16.mxu0 %v8970_v38 }
 0x33e   : > { %8230 = vmatpush3.bf16.msra.mxu0 %v8971_v39 }
 0x33f   : > { %8231 = vmatprep.subr.bf16.mxu0 %v8972_v16 }
 0x342   : > { %8232 = vmatpush3.bf16.msra.mxu0 %v8973_v40 }
 0x343   : > { %8233 = vmatprep.subr.bf16.mxu0 %v8974_v41 }
 0x344   : > { %3161 = vmatmul.mubr.bf16.gmra.mrb[88].mxu1 %v10689_v61 }
 0x345   : > { %3170 = vmatprep.mubr.bf16.mxu1 %v10713_v24 }
 0x346   : > { %8234 = vmatpush3.bf16.msra.mxu0 %v8975_v42 }
 0x347   : > { %8235 = vmatprep.subr.bf16.mxu0 %v8976_v43 }
 0x34a   : > { %8236 = vmatpush3.bf16.msra.mxu0 %v8977_v46 }
 0x34b   : > { %8237 = vmatprep.subr.bf16.mxu0 %v8978_v47 }
 0x34c   : > { %3171 = vmatmul.mubr.bf16.gmra.mrb[92].mxu1 %v10711_v44 }
 0x34e   : > { %8238 = vmatpush3.bf16.msra.mxu0 %v8979_v48 }
 0x34f   : > { %8239 = vmatprep.subr.bf16.mxu0 %v8980_v49 }
 0x352   : > { %8240 = vmatpush3.bf16.msra.mxu0 %v8981_v50 }
 0x3a7   : > { %v2989_v56 = vpop.f32.mrb[32].mxu1 }
 0x3a8   : > { %v2990_v57 = vadd.f32 %v2989_v56, %v10845_v52  ;;  %v2991_v61 = vpop.f32.mrb[33].mxu1 }
 0x3a9   : > { %v2992_v62 = vadd.f32 %v2991_v61, %v10849_v53  ;;  %v2993_v63 = vpop.f32.mrb[34].mxu1 }
 0x3aa   : > { %v2994_v0 = vadd.f32 %v2993_v63, %v10845_v52  ;;  %v2995_v1 = vpop.f32.mrb[35].mxu1  ;;  %v3181_v3 = vmax.f32 %v2990_v57, 0.0 }
 0x3ab   : > { %v2996_v2 = vadd.f32 %v2995_v1, %v10849_v53  ;;  %v3182_v5 = vmax.f32 %v2992_v62, 0.0 }
 0x3ac   : > { %v3185_v4 = vmax.f32 %v2994_v0, 0.0 }
 0x3ad   : > { %v3186_v6 = vmax.f32 %v2996_v2, 0.0 }
 0x3ae   : > { %v3245_v7 = vpack.c.bf16 %v3185_v4, %v3181_v3 }
 0x3af   : > { %v3246_v8 = vpack.c.bf16 %v3186_v6, %v3182_v5  ;;  %v2999_v9 = vpop.f32.mrb[36].mxu1 }
 0x3b0   : > { %v3000_v10 = vadd.f32 %v2999_v9, %v10845_v52  ;;  %v3001_v20 = vpop.f32.mrb[37].mxu1 }
 0x3b1   : > { %v3002_v21 = vadd.f32 %v3001_v20, %v10849_v53  ;;  %v3003_v22 = vpop.f32.mrb[38].mxu1  ;;  %3572 = vmatprep.mubr.bf16.mxu1 %v3246_v8 }
 0x3b2   : > { %v3004_v23 = vadd.f32 %v3003_v22, %v10845_v52  ;;  %v3005_v44 = vpop.f32.mrb[39].mxu1  ;;  %3573 = vmatmul.mubr.bf16.vlgmr.msra.gmra.mrb[96].mxu1 %v3245_v7  ;;  %v3189_v45 = vmax.f32 %v3000_v10, 0.0 }
 0x3b3   : > { %v3006_v24 = vadd.f32 %v3005_v44, %v10849_v53  ;;  %v3190_v26 = vmax.f32 %v3002_v21, 0.0 }
 0x3b4   : > { %v3193_v25 = vmax.f32 %v3004_v23, 0.0 }
 0x3b5   : > { %v3194_v27 = vmax.f32 %v3006_v24, 0.0 }
 0x3b6   : > { %v3249_v28 = vpack.c.bf16 %v3193_v25, %v3189_v45 }
 0x3b7   : > { %v3250_v29 = vpack.c.bf16 %v3194_v27, %v3190_v26  ;;  %v3009_v60 = vpop.f32.mrb[40].mxu1 }
 0x3b8   : > { %v3010_v30 = vadd.f32 %v3009_v60, %v10845_v52  ;;  %v3011_v31 = vpop.f32.mrb[41].mxu1 }
 0x3b9   : > { %v3012_v58 = vadd.f32 %v3011_v31, %v10849_v53  ;;  %v3013_v19 = vpop.f32.mrb[42].mxu1  ;;  %3580 = vmatprep.mubr.bf16.mxu1 %v3250_v29 }
 0x3ba   : > { %v3014_v32 = vadd.f32 %v3013_v19, %v10845_v52  ;;  %v3015_v33 = vpop.f32.mrb[43].mxu1  ;;  %3581 = vmatmul.mubr.bf16.gmra.mrb[100].mxu1 %v3249_v28  ;;  %v3197_v37 = vmax.f32 %v3010_v30, 0.0 }
 0x3bb   : > { %v3016_v18 = vadd.f32 %v3015_v33, %v10849_v53  ;;  %v3198_v35 = vmax.f32 %v3012_v58, 0.0 }
 0x3bc   : > { %v3201_v34 = vmax.f32 %v3014_v32, 0.0 }
 0x3bd   : > { %v3202_v36 = vmax.f32 %v3016_v18, 0.0 }
 0x3be   : > { %v3253_v55 = vpack.c.bf16 %v3201_v34, %v3197_v37 }
 0x3bf   : > { %v3254_v54 = vpack.c.bf16 %v3202_v36, %v3198_v35  ;;  %v3019_v15 = vpop.f32.mrb[44].mxu1 }
 0x3c0   : > { %v3020_v13 = vadd.f32 %v3019_v15, %v10845_v52  ;;  %v3021_v17 = vpop.f32.mrb[45].mxu1 }
 0x3c1   : > { %v3022_v38 = vadd.f32 %v3021_v17, %v10849_v53  ;;  %v3023_v39 = vpop.f32.mrb[46].mxu1  ;;  %3588 = vmatprep.mubr.bf16.mxu1 %v3254_v54  ;;  %v10881_v17 = vsub.s32 2, %v10399_v11 }
 0x3c2   : > { %v3024_v16 = vadd.f32 %v3023_v39, %v10845_v52  ;;  %v3025_v40 = vpop.f32.mrb[47].mxu1  ;;  %3589 = vmatmul.mubr.bf16.gmra.mrb[104].mxu1 %v3253_v55  ;;  %v3205_v42 = vmax.f32 %v3020_v13, 0.0 }
 0x3c3   : > { %v3026_v41 = vadd.f32 %v3025_v40, %v10849_v53  ;;  %v3206_v46 = vmax.f32 %v3022_v38, 0.0 }
 0x3c4   : > { %v3209_v43 = vmax.f32 %v3024_v16, 0.0  ;;  %v10885_v16 = vsub.s32 3, %v10399_v11 }
 0x3c5   : > { %v3210_v47 = vmax.f32 %v3026_v41, 0.0 }
 0x3c6   : > { %v3257_v48 = vpack.c.bf16 %v3209_v43, %v3205_v42 }
 0x3c7   : > { %v3258_v49 = vpack.c.bf16 %v3210_v47, %v3206_v46  ;;  %v3029_v50 = vpop.f32.mrb[48].mxu1  ;;  %v10891_v47 = vrot.slane %v10841_v51, %v10881_v17 }
 0x3c8   : > { %v3030_v56 = vadd.f32 %v3029_v50, %v10845_v52  ;;  %v3031_v57 = vpop.f32.mrb[49].mxu1  ;;  %v10895_v50 = vrot.slane %v10841_v51, %v10885_v16 }
 0x3c9   : > { %v3032_v61 = vadd.f32 %v3031_v57, %v10849_v53  ;;  %v3033_v62 = vpop.f32.mrb[50].mxu1  ;;  %3596 = vmatprep.mubr.bf16.mxu1 %v3258_v49 }
 0x3ca   : > { %v3034_v63 = vadd.f32 %v3033_v62, %v10845_v52  ;;  %v3035_v0 = vpop.f32.mrb[51].mxu1  ;;  %3597 = vmatmul.mubr.bf16.gmra.mrb[108].mxu1 %v3257_v48  ;;  %v3213_v2 = vmax.f32 %v3030_v56, 0.0 }
 0x3cb   : > { %v3036_v1 = vadd.f32 %v3035_v0, %v10849_v53  ;;  %v3214_v4 = vmax.f32 %v3032_v61, 0.0 }
 0x3cc   : > { %v3217_v3 = vmax.f32 %v3034_v63, 0.0 }
 0x3cd   : > { %v3218_v5 = vmax.f32 %v3036_v1, 0.0 }
 0x3ce   : > { %v3261_v6 = vpack.c.bf16 %v3217_v3, %v3213_v2 }
 0x3cf   : > { %v3262_v7 = vpack.c.bf16 %v3218_v5, %v3214_v4  ;;  %v3039_v8 = vpop.f32.mrb[52].mxu1 }
 0x3d0   : > { %v3040_v9 = vadd.f32 %v3039_v8, %v10845_v52  ;;  %v3041_v10 = vpop.f32.mrb[53].mxu1 }
 0x3d1   : > { %v3042_v20 = vadd.f32 %v3041_v10, %v10849_v53  ;;  %v3043_v21 = vpop.f32.mrb[54].mxu1  ;;  %3604 = vmatprep.mubr.bf16.mxu1 %v3262_v7 }
 0x3d2   : > { %v3044_v22 = vadd.f32 %v3043_v21, %v10845_v52  ;;  %v3045_v23 = vpop.f32.mrb[55].mxu1  ;;  %3605 = vmatmul.mubr.bf16.gmra.mrb[112].mxu1 %v3261_v6  ;;  %v3221_v24 = vmax.f32 %v3040_v9, 0.0 }
 0x3d3   : > { %v3046_v44 = vadd.f32 %v3045_v23, %v10849_v53  ;;  %v3222_v25 = vmax.f32 %v3042_v20, 0.0 }
 0x3d4   : > { %v3225_v45 = vmax.f32 %v3044_v22, 0.0 }
 0x3d5   : > { %v3226_v26 = vmax.f32 %v3046_v44, 0.0 }
 0x3d6   : > { %v3265_v27 = vpack.c.bf16 %v3225_v45, %v3221_v24 }
 0x3d7   : > { %v3266_v28 = vpack.c.bf16 %v3226_v26, %v3222_v25  ;;  %v3049_v29 = vpop.f32.mrb[56].mxu1 }
 0x3d8   : > { %v3050_v60 = vadd.f32 %v3049_v29, %v10845_v52  ;;  %v3051_v30 = vpop.f32.mrb[57].mxu1 }
 0x3d9   : > { %v3052_v31 = vadd.f32 %v3051_v30, %v10849_v53  ;;  %v3053_v58 = vpop.f32.mrb[58].mxu1  ;;  %3612 = vmatprep.mubr.bf16.mxu1 %v3266_v28 }
 0x3da   : > { %v3054_v19 = vadd.f32 %v3053_v58, %v10845_v52  ;;  %v3055_v32 = vpop.f32.mrb[59].mxu1  ;;  %3613 = vmatmul.mubr.bf16.gmra.mrb[116].mxu1 %v3265_v27  ;;  %v3229_v18 = vmax.f32 %v3050_v60, 0.0 }
 0x3db   : > { %v3056_v33 = vadd.f32 %v3055_v32, %v10849_v53  ;;  %v3230_v34 = vmax.f32 %v3052_v31, 0.0 }
 0x3dc   : > { %v3233_v37 = vmax.f32 %v3054_v19, 0.0 }
 0x3dd   : > { %v3234_v35 = vmax.f32 %v3056_v33, 0.0 }
 0x3de   : > { %v3269_v36 = vpack.c.bf16 %v3233_v37, %v3229_v18 }
 0x3df   : > { %v3270_v55 = vpack.c.bf16 %v3234_v35, %v3230_v34  ;;  %v3059_v54 = vpop.f32.mrb[60].mxu1 }
 0x3e0   : > { %v3060_v15 = vadd.f32 %v3059_v54, %v10845_v52  ;;  %v3061_v13 = vpop.f32.mrb[61].mxu1 }
 0x3e1   : > { %v3062_v38 = vadd.f32 %v3061_v13, %v10849_v53  ;;  %v3063_v39 = vpop.f32.mrb[62].mxu1  ;;  %3620 = vmatprep.mubr.bf16.mxu1 %v3270_v55 }
 0x3e2   : > { %v3064_v40 = vadd.f32 %v3063_v39, %v10845_v52  ;;  %v3065_v41 = vpop.f32.mrb[63].mxu1  ;;  %3621 = vmatmul.mubr.bf16.gmra.mrb[120].mxu1 %v3269_v36  ;;  %v3237_v43 = vmax.f32 %v3060_v15, 0.0 }
 0x3e3   : > { %v3066_v42 = vadd.f32 %v3065_v41, %v10849_v53  ;;  %v3238_v48 = vmax.f32 %v3062_v38, 0.0 }
 0x3e4   : > { %v3241_v46 = vmax.f32 %v3064_v40, 0.0 }
 0x3e5   : > { %v3242_v49 = vmax.f32 %v3066_v42, 0.0 }
 0x3e6   : > { %v3273_v56 = vpack.c.bf16 %v3241_v46, %v3237_v43 }
 0x3e7   : > { %v3274_v57 = vpack.c.bf16 %v3242_v49, %v3238_v48  ;;  %v3102_v61 = vpop.f32.mrb[64].mxu1 }
 0x3e8   : > { %v3103_v52 = vadd.f32 %v3102_v61, %v10891_v47  ;;  %v3104_v62 = vpop.f32.mrb[65].mxu1 }
 0x3e9   : > { %v3105_v53 = vadd.f32 %v3104_v62, %v10895_v50  ;;  %v3106_v63 = vpop.f32.mrb[66].mxu1  ;;  %3628 = vmatprep.mubr.bf16.mxu1 %v3274_v57 }
 0x3ea   : > { %v3107_v0 = vadd.f32 %v3106_v63, %v10891_v47  ;;  %v3108_v1 = vpop.f32.mrb[67].mxu1  ;;  %3629 = vmatmul.mubr.bf16.gmra.mrb[124].mxu1 %v3273_v56  ;;  %v3183_v51 = vmax.f32 %v3103_v52, 0.0 }
 0x3eb   : > { %v3109_v2 = vadd.f32 %v3108_v1, %v10895_v50  ;;  %4005 = vmatprep.mubr.bf16.mxu1 %v9781_v59  ;;  %v3184_v4 = vmax.f32 %v3105_v53, 0.0 }
 0x3ec   : > { %v3187_v3 = vmax.f32 %v3107_v0, 0.0 }
 0x3ed   : > { %v3188_v5 = vmax.f32 %v3109_v2, 0.0 }
 0x3ee   : > { %v3247_v6 = vpack.c.bf16 %v3187_v3, %v3183_v51 }
 0x3ef   : > { %v3248_v7 = vpack.c.bf16 %v3188_v5, %v3184_v4  ;;  %v3112_v8 = vpop.f32.mrb[68].mxu1 }
 0x3f0   : > { %v3113_v9 = vadd.f32 %v3112_v8, %v10891_v47  ;;  %v3114_v10 = vpop.f32.mrb[69].mxu1 }
 0x3f1   : > { %v3115_v20 = vadd.f32 %v3114_v10, %v10895_v50  ;;  %v3116_v21 = vpop.f32.mrb[70].mxu1  ;;  %3669 = vmatprep.mubr.bf16.mxu0 %v3248_v7 }
 0x3f2   : > { %v3117_v22 = vadd.f32 %v3116_v21, %v10891_v47  ;;  %v3118_v23 = vpop.f32.mrb[71].mxu1  ;;  %3670 = vmatmul.mubr.bf16.vlgmr.msra.gmra.mrb[32].mxu0 %v3247_v6  ;;  %v3191_v24 = vmax.f32 %v3113_v9, 0.0 }
 0x3f3   : > { %v3119_v44 = vadd.f32 %v3118_v23, %v10895_v50  ;;  %v3192_v25 = vmax.f32 %v3115_v20, 0.0 }
 0x3f4   : > { %v3195_v45 = vmax.f32 %v3117_v22, 0.0 }
 0x3f5   : > { %v3196_v26 = vmax.f32 %v3119_v44, 0.0 }
 0x3f6   : > { %v3251_v27 = vpack.c.bf16 %v3195_v45, %v3191_v24 }
 0x3f7   : > { %v3252_v28 = vpack.c.bf16 %v3196_v26, %v3192_v25  ;;  %v3122_v29 = vpop.f32.mrb[72].mxu1 }
 0x3f8   : > { %v3123_v60 = vadd.f32 %v3122_v29, %v10891_v47  ;;  %v3124_v30 = vpop.f32.mrb[73].mxu1 }
 0x3f9   : > { %v3125_v31 = vadd.f32 %v3124_v30, %v10895_v50  ;;  %v3126_v58 = vpop.f32.mrb[74].mxu1  ;;  %3677 = vmatprep.mubr.bf16.mxu0 %v3252_v28 }
 0x3fa   : > { %v3127_v19 = vadd.f32 %v3126_v58, %v10891_v47  ;;  %v3128_v32 = vpop.f32.mrb[75].mxu1  ;;  %3678 = vmatmul.mubr.bf16.gmra.mrb[36].mxu0 %v3251_v27  ;;  %v3199_v18 = vmax.f32 %v3123_v60, 0.0 }
 0x3fb   : > { %v3129_v33 = vadd.f32 %v3128_v32, %v10895_v50  ;;  %v3200_v34 = vmax.f32 %v3125_v31, 0.0 }
 0x3fc   : > { %v3203_v37 = vmax.f32 %v3127_v19, 0.0 }
 0x3fd   : > { %v3204_v35 = vmax.f32 %v3129_v33, 0.0 }
 0x3fe   : > { %v3255_v36 = vpack.c.bf16 %v3203_v37, %v3199_v18 }
 0x3ff   : > { %v3256_v55 = vpack.c.bf16 %v3204_v35, %v3200_v34  ;;  %v3132_v54 = vpop.f32.mrb[76].mxu1 }
 0x400   : > { %v3133_v15 = vadd.f32 %v3132_v54, %v10891_v47  ;;  %v3134_v13 = vpop.f32.mrb[77].mxu1 }
 0x401   : > { %v3135_v38 = vadd.f32 %v3134_v13, %v10895_v50  ;;  %v3136_v39 = vpop.f32.mrb[78].mxu1  ;;  %3685 = vmatprep.mubr.bf16.mxu0 %v3256_v55 }
 0x402   : > { %v3137_v40 = vadd.f32 %v3136_v39, %v10891_v47  ;;  %v3138_v41 = vpop.f32.mrb[79].mxu1  ;;  %3686 = vmatmul.mubr.bf16.gmra.mrb[40].mxu0 %v3255_v36  ;;  %v3207_v43 = vmax.f32 %v3133_v15, 0.0 }
 0x403   : > { %v3139_v42 = vadd.f32 %v3138_v41, %v10895_v50  ;;  %v3208_v48 = vmax.f32 %v3135_v38, 0.0 }
 0x404   : > { %v3211_v46 = vmax.f32 %v3137_v40, 0.0 }
 0x405   : > { %v3212_v49 = vmax.f32 %v3139_v42, 0.0 }
 0x406   : > { %v3259_v56 = vpack.c.bf16 %v3211_v46, %v3207_v43 }
 0x407   : > { %v3260_v57 = vpack.c.bf16 %v3212_v49, %v3208_v48  ;;  %v3142_v61 = vpop.f32.mrb[80].mxu1 }
 0x408   : > { %v3143_v52 = vadd.f32 %v3142_v61, %v10891_v47  ;;  %v3144_v62 = vpop.f32.mrb[81].mxu1 }
 0x409   : > { %v3145_v53 = vadd.f32 %v3144_v62, %v10895_v50  ;;  %v3146_v63 = vpop.f32.mrb[82].mxu1  ;;  %3693 = vmatprep.mubr.bf16.mxu0 %v3260_v57 }
 0x40a   : > { %v3147_v0 = vadd.f32 %v3146_v63, %v10891_v47  ;;  %v3148_v1 = vpop.f32.mrb[83].mxu1  ;;  %3694 = vmatmul.mubr.bf16.gmra.mrb[44].mxu0 %v3259_v56  ;;  %v3215_v51 = vmax.f32 %v3143_v52, 0.0 }
 0x40b   : > { %v3149_v2 = vadd.f32 %v3148_v1, %v10895_v50  ;;  %v3216_v4 = vmax.f32 %v3145_v53, 0.0 }
 0x40c   : > { %v3219_v3 = vmax.f32 %v3147_v0, 0.0 }
 0x40d   : > { %v3220_v5 = vmax.f32 %v3149_v2, 0.0 }
 0x40e   : > { %v3263_v6 = vpack.c.bf16 %v3219_v3, %v3215_v51 }
 0x40f   : > { %v3264_v7 = vpack.c.bf16 %v3220_v5, %v3216_v4  ;;  %v3152_v8 = vpop.f32.mrb[84].mxu1  ;;  %v8982_v4 = vld [vmem:[%s12679_s10] ss:$16 sps:$4 sm:$0xff]   ;;  %v8984_v5 = vld [vmem:[%s12679_s10 + $0x4] ss:$16 sps:$4 sm:$0xff]  }
 0x410   : > { %v3153_v9 = vadd.f32 %v3152_v8, %v10891_v47  ;;  %v3154_v10 = vpop.f32.mrb[85].mxu1  ;;  %3973 = vmatprep.subr.bf16.mxu1 %v8984_v5 }
 0x411   : > { %v3155_v20 = vadd.f32 %v3154_v10, %v10895_v50  ;;  %v3156_v21 = vpop.f32.mrb[86].mxu1  ;;  %3701 = vmatprep.mubr.bf16.mxu0 %v3264_v7  ;;  %3974 = vmatpush1.bf16.msra.mxu1 %v8982_v4 }
 0x412   : > { %v3157_v22 = vadd.f32 %v3156_v21, %v10891_v47  ;;  %v3158_v23 = vpop.f32.mrb[87].mxu1  ;;  %3702 = vmatmul.mubr.bf16.gmra.mrb[48].mxu0 %v3263_v6  ;;  %v3223_v24 = vmax.f32 %v3153_v9, 0.0 }
 0x413   : > { %v3159_v44 = vadd.f32 %v3158_v23, %v10895_v50  ;;  %v3224_v25 = vmax.f32 %v3155_v20, 0.0 }
 0x414   : > { %v3227_v45 = vmax.f32 %v3157_v22, 0.0 }
 0x415   : > { %v3228_v26 = vmax.f32 %v3159_v44, 0.0 }
 0x416   : > { %v3267_v27 = vpack.c.bf16 %v3227_v45, %v3223_v24 }
 0x417   : > { %v3268_v28 = vpack.c.bf16 %v3228_v26, %v3224_v25  ;;  %v3162_v29 = vpop.f32.mrb[88].mxu1 }
 0x418   : > { %v3163_v60 = vadd.f32 %v3162_v29, %v10891_v47  ;;  %v3164_v30 = vpop.f32.mrb[89].mxu1 }
 0x419   : > { %v3165_v31 = vadd.f32 %v3164_v30, %v10895_v50  ;;  %v3166_v58 = vpop.f32.mrb[90].mxu1  ;;  %3709 = vmatprep.mubr.bf16.mxu0 %v3268_v28 }
 0x41a   : > { %v3167_v19 = vadd.f32 %v3166_v58, %v10891_v47  ;;  %v3168_v32 = vpop.f32.mrb[91].mxu1  ;;  %3710 = vmatmul.mubr.bf16.gmra.mrb[52].mxu0 %v3267_v27  ;;  %v3231_v18 = vmax.f32 %v3163_v60, 0.0 }
 0x41b   : > { %v3169_v33 = vadd.f32 %v3168_v32, %v10895_v50  ;;  %v3232_v34 = vmax.f32 %v3165_v31, 0.0 }
 0x41c   : > { %v3235_v37 = vmax.f32 %v3167_v19, 0.0 }
 0x41d   : > { %v3236_v35 = vmax.f32 %v3169_v33, 0.0 }
 0x41e   : > { %v3271_v36 = vpack.c.bf16 %v3235_v37, %v3231_v18 }
 0x41f   : > { %v3272_v55 = vpack.c.bf16 %v3236_v35, %v3232_v34  ;;  %v3172_v54 = vpop.f32.mrb[92].mxu1 }
 0x420   : > { %v3173_v15 = vadd.f32 %v3172_v54, %v10891_v47  ;;  %v3174_v13 = vpop.f32.mrb[93].mxu1 }
 0x421   : > { %v3175_v38 = vadd.f32 %v3174_v13, %v10895_v50  ;;  %v3176_v39 = vpop.f32.mrb[94].mxu1  ;;  %3717 = vmatprep.mubr.bf16.mxu0 %v3272_v55 }
 0x422   : > { %v3177_v40 = vadd.f32 %v3176_v39, %v10891_v47  ;;  %v3178_v41 = vpop.f32.mrb[95].mxu1  ;;  %3718 = vmatmul.mubr.bf16.gmra.mrb[56].mxu0 %v3271_v36  ;;  %v3239_v43 = vmax.f32 %v3173_v15, 0.0 }
 0x423   : > { %v3179_v42 = vadd.f32 %v3178_v41, %v10895_v50  ;;  %v3240_v48 = vmax.f32 %v3175_v38, 0.0  ;;  %v10966_v41 = vld [vmem:[%s12678_s9] ss:$0 sm:$0xff] }
 0x424   : > { %v3243_v46 = vmax.f32 %v3177_v40, 0.0 }
 0x425   : > { %v3244_v49 = vmax.f32 %v3179_v42, 0.0 }
 0x426   : > { %v3275_v56 = vpack.c.bf16 %v3243_v46, %v3239_v43 }
 0x427   : > { %v3276_v57 = vpack.c.bf16 %v3244_v49, %v3240_v48 }
 0x429   : > { %3725 = vmatprep.mubr.bf16.mxu0 %v3276_v57 }
 0x42a   : > { %3726 = vmatmul.mubr.bf16.gmra.mrb[60].mxu0 %v3275_v56 }
 0x42b   : > { %4118 = vmatprep.mubr.bf16.mxu0 %v9781_v59 }
 0x485   : > { %v8177_v61 = vpop.f32.mrb[96].mxu1 }
 0x486   : > { %v8178_v52 = vpop.f32.mrb[97].mxu1 }
 0x487   : > { %v8179_v62 = vadd.f32 %v8178_v52, %v8177_v61  ;;  %v8180_v53 = vpop.f32.mrb[98].mxu1 }
 0x488   : > { %v8181_v63 = vpop.f32.mrb[99].mxu1 }
 0x489   : > { %v8182_v47 = vadd.f32 %v8181_v63, %v8180_v53  ;;  %v3575_v46 = vadd.f32 %v8179_v62, %v10966_v41 }
 0x48b   : > { %v3578_v57 = vadd.f32 %v8182_v47, %v10966_v41 }
 0x48d   : > { %v8183_v0 = vpop.f32.mrb[100].mxu1 }
 0x48e   : > { %v8184_v1 = vpop.f32.mrb[101].mxu1 }
 0x48f   : > { %v8185_v2 = vadd.f32 %v8184_v1, %v8183_v0  ;;  %v8186_v50 = vpop.f32.mrb[102].mxu1 }
 0x490   : > { %v8187_v51 = vpop.f32.mrb[103].mxu1 }
 0x491   : > { %v10931_v3 = vadd.f32 %v8187_v51, %v8186_v50  ;;  %v3583_v4 = vadd.f32 %v8185_v2, %v10966_v41 }
 0x493   : > { %v3586_v47 = vadd.f32 %v10931_v3, %v10966_v41 }
 0x495   : > { %v8189_v6 = vpop.f32.mrb[104].mxu1 }
 0x496   : > { %v8190_v7 = vpop.f32.mrb[105].mxu1 }
 0x497   : > { %v10939_v8 = vadd.f32 %v8190_v7, %v8189_v6  ;;  %v8192_v9 = vpop.f32.mrb[106].mxu1 }
 0x498   : > { %v8193_v10 = vpop.f32.mrb[107].mxu1 }
 0x499   : > { %v10941_v20 = vadd.f32 %v8193_v10, %v8192_v9 }
 0x49d   : > { %v8195_v21 = vpop.f32.mrb[108].mxu1 }
 0x49e   : > { %v8196_v22 = vpop.f32.mrb[109].mxu1 }
 0x49f   : > { %v10943_v23 = vadd.f32 %v8196_v22, %v8195_v21  ;;  %v8198_v44 = vpop.f32.mrb[110].mxu1  ;;  %v8987_v21 = vld [vmem:[%s12679_s10 + $0xc] ss:$16 sps:$4 sm:$0xff]   ;;  %v8985_v22 = vld [vmem:[%s12679_s10 + $0x8] ss:$16 sps:$4 sm:$0xff]  }
 0x4a0   : > { %v8199_v24 = vpop.f32.mrb[111].mxu1  ;;  %4086 = vmatprep.subr.bf16.mxu0 %v8987_v21 }
 0x4a1   : > { %v10945_v45 = vadd.f32 %v8199_v24, %v8198_v44  ;;  %4087 = vmatpush1.bf16.msra.mxu0 %v8985_v22 }
 0x4a5   : > { %v8201_v25 = vpop.f32.mrb[112].mxu1 }
 0x4a6   : > { %v8202_v26 = vpop.f32.mrb[113].mxu1 }
 0x4a7   : > { %v10947_v27 = vadd.f32 %v8202_v26, %v8201_v25  ;;  %v8204_v28 = vpop.f32.mrb[114].mxu1 }
 0x4a8   : > { %v8205_v29 = vpop.f32.mrb[115].mxu1 }
 0x4a9   : > { %v10949_v60 = vadd.f32 %v8205_v29, %v8204_v28  ;;  %v3591_v28 = vadd.f32 %v10939_v8, %v10966_v41 }
 0x4ab   : > { %v3610_v21 = vadd.f32 %v10949_v60, %v10966_v41 }
 0x4ad   : > { %v8207_v30 = vpop.f32.mrb[116].mxu1 }
 0x4ae   : > { %v8208_v31 = vpop.f32.mrb[117].mxu1 }
 0x4af   : > { %v10951_v58 = vadd.f32 %v8208_v31, %v8207_v30  ;;  %v8210_v19 = vpop.f32.mrb[118].mxu1 }
 0x4b0   : > { %v8211_v32 = vpop.f32.mrb[119].mxu1 }
 0x4b1   : > { %v10953_v33 = vadd.f32 %v8211_v32, %v8210_v19  ;;  %v3615_v60 = vadd.f32 %v10951_v58, %v10966_v41 }
 0x4b5   : > { %v8213_v18 = vpop.f32.mrb[120].mxu1 }
 0x4b6   : > { %v8214_v37 = vpop.f32.mrb[121].mxu1 }
 0x4b7   : > { %v10955_v34 = vadd.f32 %v8214_v37, %v8213_v18  ;;  %v8216_v35 = vpop.f32.mrb[122].mxu1  ;;  %v3594_v18 = vadd.f32 %v10941_v20, %v10966_v41  ;;  %v3599_v20 = vadd.f32 %v10943_v23, %v10966_v41 }
 0x4b8   : > { %v8217_v36 = vpop.f32.mrb[123].mxu1 }
 0x4b9   : > { %v10957_v55 = vadd.f32 %v8217_v36, %v8216_v35 }
 0x4bd   : > { %v8219_v54 = vpop.f32.mrb[124].mxu1 }
 0x4be   : > { %v8220_v15 = vpop.f32.mrb[125].mxu1 }
 0x4bf   : > { %v10959_v13 = vadd.f32 %v8220_v15, %v8219_v54  ;;  %v8222_v38 = vpop.f32.mrb[126].mxu1 }
 0x4c0   : > { %v8223_v39 = vpop.f32.mrb[127].mxu1 }
 0x4c1   : > { %v10961_v40 = vadd.f32 %v8223_v39, %v8222_v38 }
 0x4c5   : > { %v8241_v42 = vpop.f32.mrb[32].mxu0 }
 0x4c6   : > { %v8242_v43 = vpop.f32.mrb[33].mxu0 }
 0x4c7   : > { %v8243_v48 = vadd.f32 %v8242_v43, %v8241_v42  ;;  %v8244_v49 = vpop.f32.mrb[34].mxu0 }
 0x4c8   : > { %v8245_v56 = vpop.f32.mrb[35].mxu0 }
 0x4c9   : > { %v10970_v61 = vadd.f32 %v8243_v48, %v3575_v46  ;;  %v8246_v52 = vadd.f32 %v8245_v56, %v8244_v49 }
 0x4cb   : > { %v3750_v53 = vmul.f32 0.5, %v10970_v61  ;;  %v10973_v63 = vadd.f32 %v8246_v52, %v3578_v57  ;;  %v3602_v57 = vadd.f32 %v10945_v45, %v10966_v41  ;;  %v3607_v45 = vadd.f32 %v10947_v27, %v10966_v41 }
 0x4cd   : > { %v3766_v0 = vmul.f32 1.442695, %v3750_v53  ;;  %v3751_v1 = vmul.f32 0.5, %v10973_v63  ;;  %v8247_v50 = vpop.f32.mrb[36].mxu0 }
 0x4ce   : > { %v8248_v51 = vpop.f32.mrb[37].mxu0 }
 0x4cf   : > { %9292 = vpow2.f32 %v3766_v0  ;;  %v3768_v62 = vmul.f32 1.442695, %v3751_v1  ;;  %v8249_v5 = vadd.f32 %v8248_v51, %v8247_v50  ;;  %v8250_v6 = vpop.f32.mrb[38].mxu0 }
 0x4d0   : > { %v8251_v7 = vpop.f32.mrb[39].mxu0 }
 0x4d1   : > { %v10979_v9 = vadd.f32 %v8249_v5, %v3583_v4  ;;  %v8252_v10 = vadd.f32 %v8251_v7, %v8250_v6  ;;  %9294 = vpow2.f32 %v3768_v62 }
 0x4d3   : > { %v3752_v2 = vmul.f32 0.5, %v10979_v9  ;;  %v10988_v44 = vadd.f32 %v8252_v10, %v3586_v47 }
 0x4d5   : > { %v3770_v24 = vmul.f32 1.442695, %v3752_v2  ;;  %v3753_v3 = vmul.f32 0.5, %v10988_v44  ;;  %v8253_v25 = vpop.f32.mrb[40].mxu0 }
 0x4d6   : > { %v8254_v26 = vpop.f32.mrb[41].mxu0 }
 0x4d7   : > { %9296 = vpow2.f32 %v3770_v24  ;;  %v3772_v29 = vmul.f32 1.442695, %v3753_v3  ;;  %v8255_v30 = vadd.f32 %v8254_v26, %v8253_v25  ;;  %v8256_v31 = vpop.f32.mrb[42].mxu0 }
 0x4d8   : > { %v8257_v19 = vpop.f32.mrb[43].mxu0 }
 0x4d9   : > { %v9293_v32 = vpop.eup %9292  ;;  %v10995_v37 = vadd.f32 %v8255_v30, %v3591_v28  ;;  %v8258_v35 = vadd.f32 %v8257_v19, %v8256_v31  ;;  %9298 = vpow2.f32 %v3772_v29 }
 0x4da   : > { %3814 = vrot.lane.b32.xlu0 %v9293_v32, %s9782_s29 }
 0x4db   : > { %v3754_v36 = vmul.f32 0.5, %v10995_v37  ;;  %v10999_v54 = vadd.f32 %v8258_v35, %v3594_v18  ;;  %v9295_v8 = vpop.eup %9294  ;;  %v3618_v35 = vadd.f32 %v10953_v33, %v10966_v41  ;;  %v3623_v33 = vadd.f32 %v10955_v34, %v10966_v41 }
 0x4dd   : > { %v3774_v15 = vmul.f32 1.442695, %v3754_v36  ;;  %v3755_v38 = vmul.f32 0.5, %v10999_v54  ;;  %v8259_v39 = vpop.f32.mrb[44].mxu0 }
 0x4de   : > { %v8260_v42 = vpop.f32.mrb[45].mxu0  ;;  %3816 = vrot.lane.b32.xlu0 %v9295_v8, %s9782_s29 }
 0x4df   : > { %9300 = vpow2.f32 %v3774_v15  ;;  %v3776_v43 = vmul.f32 1.442695, %v3755_v38  ;;  %v8261_v46 = vadd.f32 %v8260_v42, %v8259_v39  ;;  %v8262_v48 = vpop.f32.mrb[46].mxu0 }
 0x4e0   : > { %v8263_v49 = vpop.f32.mrb[47].mxu0 }
 0x4e1   : > { %v9297_v56 = vpop.eup %9296  ;;  %9302 = vpow2.f32 %v3776_v43  ;;  %v11007_v52 = vadd.f32 %v8261_v46, %v3599_v20  ;;  %v8264_v53 = vadd.f32 %v8263_v49, %v8262_v48 }
 0x4e2   : > { %3818 = vrot.lane.b32.xlu1 %v9297_v56, %s9782_s29 }
 0x4e3   : > { %v3756_v0 = vmul.f32 0.5, %v11007_v52  ;;  %v11011_v1 = vadd.f32 %v8264_v53, %v3602_v57  ;;  %v9299_v23 = vpop.eup %9298  ;;  %v3626_v53 = vadd.f32 %v10957_v55, %v10966_v41  ;;  %v3631_v55 = vadd.f32 %v10959_v13, %v10966_v41 }
 0x4e5   : > { %v3778_v50 = vmul.f32 1.442695, %v3756_v0  ;;  %v3757_v51 = vmul.f32 0.5, %v11011_v1  ;;  %v8265_v4 = vpop.f32.mrb[48].mxu0 }
 0x4e6   : > { %v8266_v62 = vpop.f32.mrb[49].mxu0  ;;  %3820 = vrot.lane.b32.xlu1 %v9299_v23, %s9782_s29 }
 0x4e7   : > { %9304 = vpow2.f32 %v3778_v50  ;;  %v3780_v5 = vmul.f32 1.442695, %v3757_v51  ;;  %v8267_v6 = vadd.f32 %v8266_v62, %v8265_v4  ;;  %v8268_v7 = vpop.f32.mrb[50].mxu0 }
 0x4e8   : > { %v8269_v47 = vpop.f32.mrb[51].mxu0 }
 0x4e9   : > { %v9301_v10 = vpop.eup %9300  ;;  %9306 = vpow2.f32 %v3780_v5  ;;  %v11019_v22 = vadd.f32 %v8267_v6, %v3607_v45  ;;  %v8270_v2 = vadd.f32 %v8269_v47, %v8268_v7 }
 0x4ea   : > { %3822 = vrot.lane.b32.xlu0 %v9301_v10, %s9782_s29 }
 0x4eb   : > { %v9303_v24 = vpop.eup %9302  ;;  %v3758_v3 = vmul.f32 0.5, %v11019_v22  ;;  %v11023_v25 = vadd.f32 %v8270_v2, %v3610_v21  ;;  %v3634_v2 = vadd.f32 %v10961_v40, %v10966_v41 }
 0x4ec   : > { %3824 = vrot.lane.b32.xlu1 %v9303_v24, %s9782_s29 }
 0x4ed   : > { %v3782_v27 = vmul.f32 1.442695, %v3758_v3  ;;  %v3759_v26 = vmul.f32 0.5, %v11023_v25  ;;  %v8271_v28 = vpop.f32.mrb[52].mxu0 }
 0x4ee   : > { %v8272_v29 = vpop.f32.mrb[53].mxu0 }
 0x4ef   : > { %9308 = vpow2.f32 %v3782_v27  ;;  %v3784_v30 = vmul.f32 1.442695, %v3759_v26  ;;  %v8273_v31 = vadd.f32 %v8272_v29, %v8271_v28  ;;  %v8274_v19 = vpop.f32.mrb[54].mxu0 }
 0x4f0   : > { %v8275_v32 = vpop.f32.mrb[55].mxu0 }
 0x4f1   : > { %v9305_v18 = vpop.eup %9304  ;;  %9310 = vpow2.f32 %v3784_v30  ;;  %v11031_v36 = vadd.f32 %v8273_v31, %v3615_v60  ;;  %v8276_v8 = vadd.f32 %v8275_v32, %v8274_v19  ;;  %v3734_v19 = vld [vmem:[%s11073_s30] sm:$0xff] }
 0x4f2   : > { %3826 = vrot.lane.b32.xlu0 %v9305_v18, %s9782_s29 }
 0x4f3   : > { %v9307_v15 = vpop.eup %9306  ;;  %v3760_v38 = vmul.f32 0.5, %v11031_v36  ;;  %v11035_v39 = vadd.f32 %v8276_v8, %v3618_v35  ;;  %v3735_v35 = vld [vmem:[%s11073_s30 + $0x8] sm:$0xff] }
 0x4f4   : > { %3828 = vrot.lane.b32.xlu1 %v9307_v15, %s9782_s29 }
 0x4f5   : > { %v3786_v58 = vmul.f32 1.442695, %v3760_v38  ;;  %v3761_v42 = vmul.f32 0.5, %v11035_v39  ;;  %v8277_v20 = vpop.f32.mrb[56].mxu0 }
 0x4f6   : > { %v8278_v43 = vpop.f32.mrb[57].mxu0 }
 0x4f7   : > { %9312 = vpow2.f32 %v3786_v58  ;;  %v3788_v46 = vmul.f32 1.442695, %v3761_v42  ;;  %v8279_v48 = vadd.f32 %v8278_v43, %v8277_v20  ;;  %v8280_v49 = vpop.f32.mrb[58].mxu0  ;;  %v3736_v58 = vld [vmem:[%s11073_s30 + $0x10] sm:$0xff] }
 0x4f8   : > { %v8281_v56 = vpop.f32.mrb[59].mxu0 }
 0x4f9   : > { %v9309_v57 = vpop.eup %9308  ;;  %9314 = vpow2.f32 %v3788_v46  ;;  %v11043_v0 = vadd.f32 %v8279_v48, %v3623_v33  ;;  %v8282_v23 = vadd.f32 %v8281_v56, %v8280_v49  ;;  %v3737_v46 = vld [vmem:[%s11073_s30 + $0x18] sm:$0xff] }
 0x4fa   : > { %3830 = vrot.lane.b32.xlu0 %v9309_v57, %s9782_s29  ;;  %v3738_v57 = vld [vmem:[%s11073_s30 + $0x20] sm:$0xff] }
 0x4fb   : > { %v9311_v50 = vpop.eup %9310  ;;  %v3762_v51 = vmul.f32 0.5, %v11043_v0  ;;  %v11047_v4 = vadd.f32 %v8282_v23, %v3626_v53 }
 0x4fc   : > { %3832 = vrot.lane.b32.xlu1 %v9311_v50, %s9782_s29  ;;  %v3739_v50 = vld [vmem:[%s11073_s30 + $0x28] sm:$0xff] }
 0x4fd   : > { %v3790_v34 = vmul.f32 1.442695, %v3762_v51  ;;  %v3763_v62 = vmul.f32 0.5, %v11047_v4  ;;  %v8283_v45 = vpop.f32.mrb[60].mxu0 }
 0x4fe   : > { %v8284_v5 = vpop.f32.mrb[61].mxu0 }
 0x4ff   : > { %9316 = vpow2.f32 %v3790_v34  ;;  %v3792_v6 = vmul.f32 1.442695, %v3763_v62  ;;  %v8285_v7 = vadd.f32 %v8284_v5, %v8283_v45  ;;  %v8286_v47 = vpop.f32.mrb[62].mxu0 }
 0x500   : > { %v8287_v10 = vpop.f32.mrb[63].mxu0 }
 0x501   : > { %v9313_v21 = vpop.eup %9312  ;;  %9318 = vpow2.f32 %v3792_v6  ;;  %v11055_v24 = vadd.f32 %v8285_v7, %v3631_v55  ;;  %v8288_v3 = vadd.f32 %v8287_v10, %v8286_v47  ;;  %v3740_v6 = vld [vmem:[%s11073_s30 + $0x30] sm:$0xff]  ;;  %v3741_v47 = vld [vmem:[%s11073_s30 + $0x38] sm:$0xff] }
 0x502   : > { %3834 = vrot.lane.b32.xlu0 %v9313_v21, %s9782_s29 }
 0x503   : > { %v9315_v27 = vpop.eup %9314  ;;  %v3764_v26 = vmul.f32 0.5, %v11055_v24  ;;  %v11059_v13 = vadd.f32 %v8288_v3, %v3634_v2 }
 0x504   : > { %3836 = vrot.lane.b32.xlu1 %v9315_v27, %s9782_s29 }
 0x505   : > { %v3794_v28 = vmul.f32 1.442695, %v3764_v26  ;;  %v3765_v29 = vmul.f32 0.5, %v11059_v13 }
 0x507   : > { %9320 = vpow2.f32 %v3794_v28  ;;  %v3796_v40 = vmul.f32 1.442695, %v3765_v29  ;;  %v3742_v28 = vld [vmem:[%s11073_s30 + $0x40] sm:$0xff] }
 0x509   : > { %v9317_v41 = vpop.eup %9316  ;;  %9322 = vpow2.f32 %v3796_v40  ;;  %v3743_v40 = vld [vmem:[%s11073_s30 + $0x48] sm:$0xff] }
 0x50a   : > { %3838 = vrot.lane.b32.xlu0 %v9317_v41, %s9782_s29 }
 0x50b   : > { %v9319_v60 = vpop.eup %9318 }
 0x50c   : > { %3840 = vrot.lane.b32.xlu1 %v9319_v60, %s9782_s29 }
 0x511   : > { %v9321_v30 = vpop.eup %9320 }
 0x512   : > { %3842 = vrot.lane.b32.xlu0 %v9321_v30, %s9782_s29 }
 0x513   : > { %v9323_v31 = vpop.eup %9322 }
 0x514   : > { %3844 = vrot.lane.b32.xlu1 %v9323_v31, %s9782_s29 }
 0x54c   : > { %v3815_v32 = vpop.permute.xlu0 %3814 }
 0x54d   : > { %v3862_v18 = vmul.f32 %v3815_v32, %v3734_v19 }
 0x54f   : > { %v3878_v8 = vadd.f32 %v3862_v18, %v10970_v61  ;;  %v3744_v18 = vld [vmem:[%s11073_s30 + $0x50] sm:$0xff] }
 0x550   : > { %v3817_v15 = vpop.permute.xlu0 %3816 }
 0x551   : > { %v3863_v38 = vmul.f32 %v3817_v15, %v3735_v35  ;;  %7307 = vrot.lane.b32.xlu0 %v3878_v8, %s9783_s2  ;;  %v8990_v35 = vld [vmem:[%s12681_s12 + $0x4] ss:$8 sps:$4 sm:$0xff]   ;;  %v3745_v15 = vld [vmem:[%s11073_s30 + $0x58] sm:$0xff] }
 0x552   : > { %4691 = vmatprep.subr.bf16.mxu1 %v8990_v35  ;;  %v9014_v35 = vld [vmem:[%s12681_s12 + $0x84] ss:$8 sps:$4 sm:$0xff]  }
 0x553   : > { %v3879_v42 = vadd.f32 %v3863_v38, %v10973_v63  ;;  %v8988_v38 = vld [vmem:[%s12681_s12] ss:$8 sps:$4 sm:$0xff]  }
 0x554   : > { %v3819_v20 = vpop.permute.xlu1 %3818 }
 0x555   : > { %v3894_v43 = vpack.c.bf16 %v3879_v42, %v3878_v8  ;;  %v3864_v33 = vmul.f32 %v3819_v20, %v3736_v58  ;;  %7309 = vrot.lane.b32.xlu1 %v3879_v42, %s9783_s2 }
 0x557   : > { %v3880_v48 = vadd.f32 %v3864_v33, %v10979_v9  ;;  %7823 = vmatmul.mubr.msk.bf16.vlgmr.msra.gmra.mrb[128].mxu1 %vm3948_vm0, %v3894_v43  ;;  %7831 = vmatmul.mubr.msk.bf16.vlgmr.msra.gmra.mrb[64].mxu0 %vm3948_vm0, %v3894_v43 }
 0x558   : > { %v3821_v49 = vpop.permute.xlu1 %3820  ;;  %4015 = vmatprep.mubr.bf16.mxu1 %v9781_v59  ;;  %4128 = vmatprep.mubr.bf16.mxu0 %v9781_v59 }
 0x559   : > { %v3865_v56 = vmul.f32 %v3821_v49, %v3737_v46  ;;  %7311 = vrot.lane.b32.xlu0 %v3880_v48, %s9783_s2  ;;  %4692 = vmatpush1.bf16.msra.mxu1 %v8988_v38  ;;  %v8993_v46 = vld [vmem:[%s12681_s12 + $0x14] ss:$8 sps:$4 sm:$0xff]   ;;  %v9015_v38 = vld [vmem:[%s12681_s12 + $0x90] ss:$8 sps:$4 sm:$0xff]  }
 0x55a   : > { %4693 = vmatprep.subr.bf16.mxu1 %v8993_v46  ;;  %v9024_v46 = vld [vmem:[%s12681_s12 + $0xc0] ss:$8 sps:$4 sm:$0xff]  }
 0x55b   : > { %v3881_v53 = vadd.f32 %v3865_v56, %v10988_v44  ;;  %v3746_v56 = vld [vmem:[%s11073_s30 + $0x60] sm:$0xff] }
 0x55c   : > { %v3823_v23 = vpop.permute.xlu0 %3822 }
 0x55d   : > { %v3895_v51 = vpack.c.bf16 %v3881_v53, %v3880_v48  ;;  %v3866_v34 = vmul.f32 %v3823_v23, %v3738_v57  ;;  %7313 = vrot.lane.b32.xlu1 %v3881_v53, %s9783_s2  ;;  %v8991_v48 = vld [vmem:[%s12681_s12 + $0x10] ss:$8 sps:$4 sm:$0xff]   ;;  %v8996_v57 = vld [vmem:[%s12681_s12 + $0x24] ss:$8 sps:$4 sm:$0xff]  }
 0x55e   : > { %v3825_v62 = vpop.permute.xlu1 %3824  ;;  %4694 = vmatpush1.bf16.msra.mxu1 %v8991_v48  ;;  %v3747_v23 = vld [vmem:[%s11073_s30 + $0x68] sm:$0xff]  ;;  %v9029_v48 = vld [vmem:[%s12681_s12 + $0xd4] ss:$8 sps:$4 sm:$0xff]  }
 0x55f   : > { %v3882_v45 = vadd.f32 %v3866_v34, %v10995_v37  ;;  %v3867_v5 = vmul.f32 %v3825_v62, %v3739_v50  ;;  %7824 = vmatmul.mubr.msk.bf16.gmra.mrb[132].mxu1 %vm3948_vm0, %v3895_v51  ;;  %7832 = vmatmul.mubr.msk.bf16.gmra.mrb[68].mxu0 %vm3948_vm0, %v3895_v51  ;;  %v8994_v50 = vld [vmem:[%s12681_s12 + $0x20] ss:$8 sps:$4 sm:$0xff]  }
 0x560   : > { %4025 = vmatprep.mubr.bf16.mxu1 %v9781_v59  ;;  %4138 = vmatprep.mubr.bf16.mxu0 %v9781_v59 }
 0x561   : > { %v3883_v55 = vadd.f32 %v3867_v5, %v10999_v54  ;;  %7315 = vrot.lane.b32.xlu0 %v3882_v45, %s9783_s2  ;;  %4695 = vmatprep.subr.bf16.mxu1 %v8996_v57  ;;  %v9030_v57 = vld [vmem:[%s12681_s12 + $0xe0] ss:$8 sps:$4 sm:$0xff]  }
 0x562   : > { %4696 = vmatpush1.bf16.msra.mxu1 %v8994_v50  ;;  %v9038_v50 = vld [vmem:[%s12681_s12 + $0x104] ss:$8 sps:$4 sm:$0xff]  }
 0x563   : > { %7317 = vrot.lane.b32.xlu1 %v3883_v55, %s9783_s2  ;;  %v3896_v10 = vpack.c.bf16 %v3883_v55, %v3882_v45  ;;  %v8999_v55 = vld [vmem:[%s12681_s12 + $0x34] ss:$8 sps:$4 sm:$0xff]  }
 0x564   : > { %v3827_v7 = vpop.permute.xlu0 %3826  ;;  %4697 = vmatprep.subr.bf16.mxu1 %v8999_v55 }
 0x565   : > { %v3868_v21 = vmul.f32 %v3827_v7, %v3740_v6  ;;  %v8997_v6 = vld [vmem:[%s12681_s12 + $0x30] ss:$8 sps:$4 sm:$0xff]   ;;  %v9002_v7 = vld [vmem:[%s12681_s12 + $0x44] ss:$8 sps:$4 sm:$0xff]  }
 0x566   : > { %v3829_v2 = vpop.permute.xlu1 %3828  ;;  %4698 = vmatpush1.bf16.msra.mxu1 %v8997_v6 }
 0x567   : > { %v3884_v3 = vadd.f32 %v3868_v21, %v11007_v52  ;;  %v3869_v27 = vmul.f32 %v3829_v2, %v3741_v47  ;;  %7825 = vmatmul.mubr.msk.bf16.gmra.mrb[136].mxu1 %vm3948_vm0, %v3896_v10  ;;  %7833 = vmatmul.mubr.msk.bf16.gmra.mrb[72].mxu0 %vm3948_vm0, %v3896_v10  ;;  %v3748_v10 = vld [vmem:[%s11073_s30 + $0x70] sm:$0xff]  ;;  %v9000_v21 = vld [vmem:[%s12681_s12 + $0x40] ss:$8 sps:$4 sm:$0xff]  }
 0x568   : > { %4035 = vmatprep.mubr.bf16.mxu1 %v9781_v59  ;;  %4148 = vmatprep.mubr.bf16.mxu0 %v9781_v59 }
 0x569   : > { %v3885_v26 = vadd.f32 %v3869_v27, %v11011_v1  ;;  %7319 = vrot.lane.b32.xlu0 %v3884_v3, %s9783_s2  ;;  %4699 = vmatprep.subr.bf16.mxu1 %v9002_v7 }
 0x56a   : > { %4700 = vmatpush1.bf16.msra.mxu1 %v9000_v21 }
 0x56b   : > { %7321 = vrot.lane.b32.xlu1 %v3885_v26, %s9783_s2  ;;  %v3897_v41 = vpack.c.bf16 %v3885_v26, %v3884_v3  ;;  %v3749_v3 = vld [vmem:[%s11073_s30 + $0x78] sm:$0xff]  ;;  %s11257_s30 = scalar_lea.vmem %s12688_s19, %s7517_s20 }
 0x56c   : > { %v3831_v29 = vpop.permute.xlu0 %3830 }
 0x56d   : > { %v3870_v60 = vmul.f32 %v3831_v29, %v3742_v28  ;;  %v9005_v28 = vld [vmem:[%s12681_s12 + $0x54] ss:$8 sps:$4 sm:$0xff]  }
 0x56e   : > { %v3833_v30 = vpop.permute.xlu1 %3832  ;;  %4701 = vmatprep.subr.bf16.mxu1 %v9005_v28 }
 0x56f   : > { %v3886_v31 = vadd.f32 %v3870_v60, %v11019_v22  ;;  %v3871_v19 = vmul.f32 %v3833_v30, %v3743_v40  ;;  %7826 = vmatmul.mubr.msk.bf16.gmra.mrb[140].mxu1 %vm3948_vm0, %v3897_v41  ;;  %7834 = vmatmul.mubr.msk.bf16.gmra.mrb[76].mxu0 %vm3948_vm0, %v3897_v41  ;;  %v9003_v40 = vld [vmem:[%s12681_s12 + $0x50] ss:$8 sps:$4 sm:$0xff]   ;;  %v9008_v30 = vld [vmem:[%s12681_s12 + $0x64] ss:$8 sps:$4 sm:$0xff]  }
 0x570   : > { %4045 = vmatprep.mubr.bf16.mxu1 %v9781_v59  ;;  %4158 = vmatprep.mubr.bf16.mxu0 %v9781_v59 }
 0x571   : > { %v3887_v32 = vadd.f32 %v3871_v19, %v11023_v25  ;;  %7323 = vrot.lane.b32.xlu0 %v3886_v31, %s9783_s2  ;;  %4702 = vmatpush1.bf16.msra.mxu1 %v9003_v40  ;;  %v9006_v19 = vld [vmem:[%s12681_s12 + $0x60] ss:$8 sps:$4 sm:$0xff]  }
 0x572   : > { %4703 = vmatprep.subr.bf16.mxu1 %v9008_v30 }
 0x573   : > { %7325 = vrot.lane.b32.xlu1 %v3887_v32, %s9783_s2  ;;  %v3898_v58 = vpack.c.bf16 %v3887_v32, %v3886_v31  ;;  %v9011_v32 = vld [vmem:[%s12681_s12 + $0x74] ss:$8 sps:$4 sm:$0xff]  }
 0x574   : > { %v3835_v8 = vpop.permute.xlu0 %3834 }
 0x575   : > { %v3872_v42 = vmul.f32 %v3835_v8, %v3744_v18  ;;  %4704 = vmatpush1.bf16.msra.mxu1 %v9006_v19  ;;  %v9012_v8 = vld [vmem:[%s12681_s12 + $0x80] ss:$8 sps:$4 sm:$0xff]  }
 0x576   : > { %v3837_v20 = vpop.permute.xlu1 %3836  ;;  %4705 = vmatprep.subr.bf16.mxu1 %v9011_v32 }
 0x577   : > { %v3888_v43 = vadd.f32 %v3872_v42, %v11031_v36  ;;  %v3873_v33 = vmul.f32 %v3837_v20, %v3745_v15  ;;  %7827 = vmatmul.mubr.msk.bf16.gmra.mrb[144].mxu1 %vm3948_vm0, %v3898_v58  ;;  %7835 = vmatmul.mubr.msk.bf16.gmra.mrb[80].mxu0 %vm3948_vm0, %v3898_v58  ;;  %v9017_v15 = vld [vmem:[%s12681_s12 + $0x94] ss:$8 sps:$4 sm:$0xff]   ;;  %v9020_v58 = vld [vmem:[%s12681_s12 + $0xa4] ss:$8 sps:$4 sm:$0xff]   ;;  %v9018_v42 = vld [vmem:[%s12681_s12 + $0xa0] ss:$8 sps:$4 sm:$0xff]  }
 0x578   : > { %4055 = vmatprep.mubr.bf16.mxu1 %v9781_v59  ;;  %4168 = vmatprep.mubr.bf16.mxu0 %v9781_v59  ;;  %v9023_v20 = vld [vmem:[%s12681_s12 + $0xb4] ss:$8 sps:$4 sm:$0xff]  }
 0x579   : > { %v3889_v49 = vadd.f32 %v3873_v33, %v11035_v39  ;;  %7327 = vrot.lane.b32.xlu0 %v3888_v43, %s9783_s2  ;;  %v9026_v33 = vld [vmem:[%s12681_s12 + $0xc4] ss:$8 sps:$4 sm:$0xff]  }
 0x57b   : > { %7329 = vrot.lane.b32.xlu1 %v3889_v49, %s9783_s2  ;;  %v3899_v51 = vpack.c.bf16 %v3889_v49, %v3888_v43  ;;  %v9021_v43 = vld [vmem:[%s12681_s12 + $0xb0] ss:$8 sps:$4 sm:$0xff]  }
 0x57c   : > { %v3839_v53 = vpop.permute.xlu0 %3838  ;;  %v9027_v49 = vld [vmem:[%s12681_s12 + $0xd0] ss:$8 sps:$4 sm:$0xff]  }
 0x57d   : > { %v3874_v34 = vmul.f32 %v3839_v53, %v3746_v56  ;;  %v9032_v56 = vld [vmem:[%s12681_s12 + $0xe4] ss:$8 sps:$4 sm:$0xff]   ;;  %v9035_v53 = vld [vmem:[%s12681_s12 + $0xf4] ss:$8 sps:$4 sm:$0xff]  }
 0x57e   : > { %v3841_v62 = vpop.permute.xlu1 %3840 }
 0x57f   : > { %v3890_v45 = vadd.f32 %v3874_v34, %v11043_v0  ;;  %v3875_v5 = vmul.f32 %v3841_v62, %v3747_v23  ;;  %7828 = vmatmul.mubr.msk.bf16.gmra.mrb[148].mxu1 %vm3948_vm0, %v3899_v51  ;;  %7836 = vmatmul.mubr.msk.bf16.gmra.mrb[84].mxu0 %vm3948_vm0, %v3899_v51  ;;  %v9033_v23 = vld [vmem:[%s12681_s12 + $0xf0] ss:$8 sps:$4 sm:$0xff]  }
 0x580   : > { %4065 = vmatprep.mubr.bf16.mxu1 %v9781_v59  ;;  %4178 = vmatprep.mubr.bf16.mxu0 %v9781_v59 }
 0x581   : > { %v3891_v47 = vadd.f32 %v3875_v5, %v11047_v4  ;;  %7331 = vrot.lane.b32.xlu0 %v3890_v45, %s9783_s2 }
 0x583   : > { %7333 = vrot.lane.b32.xlu1 %v3891_v47, %s9783_s2  ;;  %v3900_v27 = vpack.c.bf16 %v3891_v47, %v3890_v45 }
 0x584   : > { %v3843_v2 = vpop.permute.xlu0 %3842 }
 0x585   : > { %v3876_v26 = vmul.f32 %v3843_v2, %v3748_v10 }
 0x586   : > { %v3845_v29 = vpop.permute.xlu1 %3844 }
 0x587   : > { %v3892_v41 = vadd.f32 %v3876_v26, %v11055_v24  ;;  %v3877_v60 = vmul.f32 %v3845_v29, %v3749_v3  ;;  %7829 = vmatmul.mubr.msk.bf16.gmra.mrb[152].mxu1 %vm3948_vm0, %v3900_v27  ;;  %7837 = vmatmul.mubr.msk.bf16.gmra.mrb[88].mxu0 %vm3948_vm0, %v3900_v27 }
 0x588   : > { %4075 = vmatprep.mubr.bf16.mxu1 %v9781_v59  ;;  %4188 = vmatprep.mubr.bf16.mxu0 %v9781_v59  ;;  %v9009_v59 = vld [vmem:[%s12681_s12 + $0x70] ss:$8 sps:$4 sm:$0xff]  }
 0x589   : > { %v3893_v31 = vadd.f32 %v3877_v60, %v11059_v13  ;;  %7335 = vrot.lane.b32.xlu0 %v3892_v41, %s9783_s2  ;;  %4706 = vmatpush1.bf16.msra.mxu1 %v9009_v59 }
 0x58a   : > { %4707 = vmatprep.subr.bf16.mxu1 %v9014_v35 }
 0x58b   : > { %7337 = vrot.lane.b32.xlu1 %v3893_v31, %s9783_s2  ;;  %v3901_v18 = vpack.c.bf16 %v3893_v31, %v3892_v41  ;;  %s8546_s2 = smul.u32 56, %s12701_s28 }
 0x58d   : > { %4708 = vmatpush1.bf16.msra.mxu1 %v9012_v8  ;;  %s12181_s20 = scalar_lea.vmem %s12687_s18, %s8546_s2 }
 0x58e   : > { %4709 = vmatprep.subr.bf16.mxu1 %v9017_v15 }
 0x58f   : > { %7830 = vmatmul.mubr.msk.bf16.gmra.mrb[156].mxu1 %vm3948_vm0, %v3901_v18  ;;  %7838 = vmatmul.mubr.msk.bf16.gmra.mrb[92].mxu0 %vm3948_vm0, %v3901_v18 }
 0x591   : > { %4710 = vmatpush1.bf16.msra.mxu1 %v9015_v38 }
 0x592   : > { %4711 = vmatprep.subr.bf16.mxu1 %v9020_v58 }
 0x595   : > { %4712 = vmatpush1.bf16.msra.mxu1 %v9018_v42 }
 0x596   : > { %4713 = vmatprep.subr.bf16.mxu1 %v9023_v20 }
 0x599   : > { %4714 = vmatpush1.bf16.msra.mxu1 %v9021_v43 }
 0x59a   : > { %4715 = vmatprep.subr.bf16.mxu1 %v9026_v33 }
 0x59d   : > { %4716 = vmatpush1.bf16.msra.mxu1 %v9024_v46 }
 0x59e   : > { %4717 = vmatprep.subr.bf16.mxu1 %v9029_v48 }
 0x5a1   : > { %4718 = vmatpush1.bf16.msra.mxu1 %v9027_v49 }
 0x5a2   : > { %4719 = vmatprep.subr.bf16.mxu1 %v9032_v56 }
 0x5a5   : > { %4720 = vmatpush1.bf16.msra.mxu1 %v9030_v57 }
 0x5a6   : > { %4721 = vmatprep.subr.bf16.mxu1 %v9035_v53 }
 0x5a9   : > { %4722 = vmatpush1.bf16.msra.mxu1 %v9033_v23 }
 0x5aa   : > { %4804 = vmatprep.subr.bf16.mxu1 %v9038_v50 }
 0x5c3   : > { %v7308_v51 = vpop.permute.xlu0 %7307 }
 0x5c4   : > { %v7356_v34 = vsel %vm7355_vm1, %v10970_v61, %v7308_v51 }
 0x5c5   : > { %v7373_v62 = vsel %vm7372_vm2, %v7356_v34, 0.0 }
 0x5c6   : > { %7389 = vst [vmem:[%s11257_s30] sm:$0xff] %v7373_v62 }
 0x5c7   : > { %v7310_v45 = vpop.permute.xlu1 %7309 }
 0x5c8   : > { %v7357_v5 = vsel %vm7355_vm1, %v10973_v63, %v7310_v45 }
 0x5c9   : > { %v7374_v55 = vsel %vm7372_vm2, %v7357_v5, 0.0 }
 0x5ca   : > { %7390 = vst [vmem:[%s11257_s30 + $0x8] sm:$0xff] %v7374_v55 }
 0x5cb   : > { %v7312_v6 = vpop.permute.xlu0 %7311 }
 0x5cc   : > { %v7358_v7 = vsel %vm7355_vm1, %v10979_v9, %v7312_v6 }
 0x5cd   : > { %v7375_v47 = vsel %vm7372_vm2, %v7358_v7, 0.0 }
 0x5ce   : > { %7391 = vst [vmem:[%s11257_s30 + $0x10] sm:$0xff] %v7375_v47  ;;  %v9084_v47 = vld [vmem:[%s12683_s14] ss:$8 sps:$4 sm:$0xff]  }
 0x5cf   : > { %v7314_v61 = vpop.permute.xlu1 %7313 }
 0x5d0   : > { %v7359_v10 = vsel %vm7355_vm1, %v10988_v44, %v7314_v61 }
 0x5d1   : > { %v7376_v21 = vsel %vm7372_vm2, %v7359_v10, 0.0 }
 0x5d2   : > { %7392 = vst [vmem:[%s11257_s30 + $0x18] sm:$0xff] %v7376_v21  ;;  %v9086_v21 = vld [vmem:[%s12683_s14 + $0x4] ss:$8 sps:$4 sm:$0xff]  }
 0x5d3   : > { %v7316_v63 = vpop.permute.xlu0 %7315  ;;  %5169 = vmatprep.subr.bf16.mxu0 %v9086_v21 }
 0x5d4   : > { %v7360_v2 = vsel %vm7355_vm1, %v10995_v37, %v7316_v63  ;;  %5170 = vmatpush1.bf16.msra.mxu0 %v9084_v47 }
 0x5d5   : > { %v7377_v3 = vsel %vm7372_vm2, %v7360_v2, 0.0  ;;  %v7318_v27 = vpop.permute.xlu1 %7317 }
 0x5d6   : > { %7393 = vst [vmem:[%s11257_s30 + $0x20] sm:$0xff] %v7377_v3  ;;  %v7361_v9 = vsel %vm7355_vm1, %v10999_v54, %v7318_v27 }
 0x5d7   : > { %v7378_v26 = vsel %vm7372_vm2, %v7361_v9, 0.0  ;;  %v9089_v9 = vld [vmem:[%s12683_s14 + $0x14] ss:$8 sps:$4 sm:$0xff]  }
 0x5d8   : > { %7394 = vst [vmem:[%s11257_s30 + $0x28] sm:$0xff] %v7378_v26  ;;  %5171 = vmatprep.subr.bf16.mxu0 %v9089_v9 }
 0x5db   : > { %v7320_v44 = vpop.permute.xlu0 %7319 }
 0x5dc   : > { %v7362_v28 = vsel %vm7355_vm1, %v11007_v52, %v7320_v44 }
 0x5dd   : > { %v7379_v29 = vsel %vm7372_vm2, %v7362_v28, 0.0  ;;  %v7322_v40 = vpop.permute.xlu1 %7321 }
 0x5de   : > { %7395 = vst [vmem:[%s11257_s30 + $0x30] sm:$0xff] %v7379_v29  ;;  %v7363_v37 = vsel %vm7355_vm1, %v11011_v1, %v7322_v40 }
 0x5df   : > { %v7380_v41 = vsel %vm7372_vm2, %v7363_v37, 0.0 }
 0x5e0   : > { %7396 = vst [vmem:[%s11257_s30 + $0x38] sm:$0xff] %v7380_v41  ;;  %v9087_v41 = vld [vmem:[%s12683_s14 + $0x10] ss:$8 sps:$4 sm:$0xff]  }
 0x5e1   : > { %5172 = vmatpush1.bf16.msra.mxu0 %v9087_v41 }
 0x5e3   : > { %v7324_v54 = vpop.permute.xlu0 %7323 }
 0x5e4   : > { %v7364_v60 = vsel %vm7355_vm1, %v11019_v22, %v7324_v54 }
 0x5e5   : > { %v7381_v30 = vsel %vm7372_vm2, %v7364_v60, 0.0  ;;  %v7326_v31 = vpop.permute.xlu1 %7325 }
 0x5e6   : > { %7397 = vst [vmem:[%s11257_s30 + $0x40] sm:$0xff] %v7381_v30  ;;  %v7365_v52 = vsel %vm7355_vm1, %v11023_v25, %v7326_v31 }
 0x5e7   : > { %v7382_v19 = vsel %vm7372_vm2, %v7365_v52, 0.0  ;;  %v9036_v52 = vld [vmem:[%s12681_s12 + $0x100] ss:$8 sps:$4 sm:$0xff]  }
 0x5e8   : > { %7398 = vst [vmem:[%s11257_s30 + $0x48] sm:$0xff] %v7382_v19  ;;  %v9092_v19 = vld [vmem:[%s12683_s14 + $0x24] ss:$8 sps:$4 sm:$0xff]  }
 0x5e9   : > { %5173 = vmatprep.subr.bf16.mxu0 %v9092_v19  ;;  %v9045_v19 = vld [vmem:[%s12681_s12 + $0x130] ss:$8 sps:$4 sm:$0xff]  }
 0x5eb   : > { %v7328_v1 = vpop.permute.xlu0 %7327 }
 0x5ec   : > { %v7366_v32 = vsel %vm7355_vm1, %v11031_v36, %v7328_v1 }
 0x5ed   : > { %v7383_v18 = vsel %vm7372_vm2, %v7366_v32, 0.0  ;;  %v7330_v59 = vpop.permute.xlu1 %7329 }
 0x5ee   : > { %7399 = vst [vmem:[%s11257_s30 + $0x50] sm:$0xff] %v7383_v18  ;;  %v7367_v22 = vsel %vm7355_vm1, %v11035_v39, %v7330_v59 }
 0x5ef   : > { %v7384_v35 = vsel %vm7372_vm2, %v7367_v22, 0.0  ;;  %v9041_v22 = vld [vmem:[%s12681_s12 + $0x114] ss:$8 sps:$4 sm:$0xff]  }
 0x5f0   : > { %7400 = vst [vmem:[%s11257_s30 + $0x58] sm:$0xff] %v7384_v35 }
 0x5f3   : > { %v7332_v25 = vpop.permute.xlu0 %7331 }
 0x5f4   : > { %v7368_v8 = vsel %vm7355_vm1, %v11043_v0, %v7332_v25 }
 0x5f5   : > { %v7385_v15 = vsel %vm7372_vm2, %v7368_v8, 0.0  ;;  %v7334_v38 = vpop.permute.xlu1 %7333 }
 0x5f6   : > { %7401 = vst [vmem:[%s11257_s30 + $0x60] sm:$0xff] %v7385_v15  ;;  %v7369_v36 = vsel %vm7355_vm1, %v11047_v4, %v7334_v38  ;;  %v3906_v4 = vld [vmem:[%s12680_s11] sm:$0xf] }
 0x5f7   : > { %v7386_v58 = vsel %vm7372_vm2, %v7369_v36, 0.0  ;;  %v11327_v46 = vrot.slane %v3906_v4, %v10402_v12  ;;  %v11330_v48 = vrot.slane %v3906_v4, %v10881_v17  ;;  %v11336_v49 = vrot.slane %v3906_v4, %v10885_v16 }
 0x5f8   : > { %7402 = vst [vmem:[%s11257_s30 + $0x68] sm:$0xff] %v7386_v58 }
 0x5fb   : > { %v7336_v42 = vpop.permute.xlu0 %7335 }
 0x5fc   : > { %v7370_v39 = vsel %vm7355_vm1, %v11055_v24, %v7336_v42  ;;  %v11333_v24 = vrot.slane %v3906_v4, %v10408_v14 }
 0x5fd   : > { %v7387_v20 = vsel %vm7372_vm2, %v7370_v39, 0.0  ;;  %v7338_v43 = vpop.permute.xlu1 %7337  ;;  %v9090_v39 = vld [vmem:[%s12683_s14 + $0x20] ss:$8 sps:$4 sm:$0xff]  }
 0x5fe   : > { %7403 = vst [vmem:[%s11257_s30 + $0x70] sm:$0xff] %v7387_v20  ;;  %v7371_v0 = vsel %vm7355_vm1, %v11059_v13, %v7338_v43  ;;  %5174 = vmatpush1.bf16.msra.mxu0 %v9090_v39 }
 0x5ff   : > { %v7388_v33 = vsel %vm7372_vm2, %v7371_v0, 0.0  ;;  %v9039_v0 = vld [vmem:[%s12681_s12 + $0x110] ss:$8 sps:$4 sm:$0xff]  }
 0x600   : > { %7404 = vst [vmem:[%s11257_s30 + $0x78] sm:$0xff] %v7388_v33  ;;  %v9095_v33 = vld [vmem:[%s12683_s14 + $0x34] ss:$8 sps:$4 sm:$0xff]  }
 0x601   : > { %5175 = vmatprep.subr.bf16.mxu0 %v9095_v33  ;;  %v9048_v33 = vld [vmem:[%s12681_s12 + $0x140] ss:$8 sps:$4 sm:$0xff]  }
 0x62a   : > { %v4007_v13 = vpop.f32.mrb[128].mxu1  ;;  %v4120_v56 = vpop.f32.mrb[64].mxu0 }
 0x62b   : > { %v4008_v57 = vadd.f32 %v4007_v13, %v11327_v46  ;;  %v4121_v53 = vadd.f32 %v4120_v56, %v11330_v48  ;;  %v4009_v23 = vpop.f32.mrb[129].mxu1  ;;  %v4122_v50 = vpop.f32.mrb[65].mxu0 }
 0x62c   : > { %v4010_v51 = vadd.f32 %v4009_v23, %v11333_v24  ;;  %v4123_v34 = vadd.f32 %v4122_v50, %v11336_v49  ;;  %v4011_v62 = vpop.f32.mrb[130].mxu1  ;;  %v4124_v45 = vpop.f32.mrb[66].mxu0 }
 0x62d   : > { %v4012_v5 = vadd.f32 %v4011_v62, %v11327_v46  ;;  %v4125_v55 = vadd.f32 %v4124_v45, %v11330_v48  ;;  %v4013_v6 = vpop.f32.mrb[131].mxu1  ;;  %v4126_v7 = vpop.f32.mrb[67].mxu0  ;;  %v4199_v63 = vmax.f32 %v4008_v57, 0.0  ;;  %v4201_v2 = vmax.f32 %v4121_v53, 0.0  ;;  %v9044_v53 = vld [vmem:[%s12681_s12 + $0x124] ss:$8 sps:$4 sm:$0xff]  }
 0x62e   : > { %v4014_v61 = vadd.f32 %v4013_v6, %v11333_v24  ;;  %v4127_v10 = vadd.f32 %v4126_v7, %v11336_v49  ;;  %v4200_v26 = vmax.f32 %v4010_v51, 0.0  ;;  %v4202_v44 = vmax.f32 %v4123_v34, 0.0 }
 0x62f   : > { %v4203_v3 = vmax.f32 %v4012_v5, 0.0  ;;  %v4205_v27 = vmax.f32 %v4125_v55, 0.0  ;;  %v9093_v5 = vld [vmem:[%s12683_s14 + $0x30] ss:$8 sps:$4 sm:$0xff]  }
 0x630   : > { %v4204_v28 = vmax.f32 %v4014_v61, 0.0  ;;  %v4206_v29 = vmax.f32 %v4127_v10, 0.0  ;;  %v9042_v61 = vld [vmem:[%s12681_s12 + $0x120] ss:$8 sps:$4 sm:$0xff]   ;;  %v9098_v10 = vld [vmem:[%s12683_s14 + $0x44] ss:$8 sps:$4 sm:$0xff]   ;;  %5176 = vmatpush1.bf16.msra.mxu0 %v9093_v5 }
 0x631   : > { %v4263_v40 = vpack.c.bf16 %v4203_v3, %v4199_v63  ;;  %v11355_v37 = vpack.c.bf16 %v4205_v27, %v4201_v2  ;;  %v9047_v27 = vld [vmem:[%s12681_s12 + $0x134] ss:$8 sps:$4 sm:$0xff]   ;;  %5177 = vmatprep.subr.bf16.mxu0 %v9098_v10 }
 0x632   : > { %v4264_v54 = vpack.c.bf16 %v4204_v28, %v4200_v26  ;;  %v11360_v60 = vpack.c.bf16 %v4206_v29, %v4202_v44  ;;  %v4017_v30 = vpop.f32.mrb[132].mxu1  ;;  %v4130_v31 = vpop.f32.mrb[68].mxu0 }
 0x633   : > { %v4018_v1 = vadd.f32 %v4017_v30, %v11327_v46  ;;  %v4131_v32 = vadd.f32 %v4130_v31, %v11330_v48  ;;  %v4019_v18 = vpop.f32.mrb[133].mxu1  ;;  %v4132_v59 = vpop.f32.mrb[69].mxu0  ;;  %v9096_v30 = vld [vmem:[%s12683_s14 + $0x40] ss:$8 sps:$4 sm:$0xff]  }
 0x634   : > { %v4020_v35 = vadd.f32 %v4019_v18, %v11333_v24  ;;  %v4133_v25 = vadd.f32 %v4132_v59, %v11336_v49  ;;  %v4021_v8 = vpop.f32.mrb[134].mxu1  ;;  %v4134_v15 = vpop.f32.mrb[70].mxu0  ;;  %4723 = vmatprep.mubr.bf16.mxu1 %v4264_v54  ;;  %5178 = vmatpush1.bf16.msra.mxu0 %v9096_v30 }
 0x635   : > { %v4022_v38 = vadd.f32 %v4021_v8, %v11327_v46  ;;  %v4135_v36 = vadd.f32 %v4134_v15, %v11330_v48  ;;  %v4023_v58 = vpop.f32.mrb[135].mxu1  ;;  %v4136_v42 = vpop.f32.mrb[71].mxu0  ;;  %4724 = vmatmul.mubr.bf16.vlgmr.msra.gmra.mrb[160].mxu1 %v4263_v40  ;;  %v4207_v4 = vmax.f32 %v4018_v1, 0.0  ;;  %v4209_v13 = vmax.f32 %v4131_v32, 0.0  ;;  %v9101_v1 = vld [vmem:[%s12683_s14 + $0x54] ss:$8 sps:$4 sm:$0xff]  }
 0x636   : > { %v4024_v20 = vadd.f32 %v4023_v58, %v11333_v24  ;;  %v4137_v43 = vadd.f32 %v4136_v42, %v11336_v49  ;;  %4805 = vmatpush1.bf16.msra.mxu1 %v9036_v52  ;;  %v4208_v23 = vmax.f32 %v4020_v35, 0.0  ;;  %v4210_v50 = vmax.f32 %v4133_v25, 0.0  ;;  %v9050_v35 = vld [vmem:[%s12681_s12 + $0x144] ss:$8 sps:$4 sm:$0xff]   ;;  %v9099_v42 = vld [vmem:[%s12683_s14 + $0x50] ss:$8 sps:$4 sm:$0xff]   ;;  %5179 = vmatprep.subr.bf16.mxu0 %v9101_v1 }
 0x637   : > { %v4211_v56 = vmax.f32 %v4022_v38, 0.0  ;;  %v4213_v57 = vmax.f32 %v4135_v36, 0.0  ;;  %4806 = vmatprep.subr.bf16.mxu1 %v9041_v22 }
 0x638   : > { %v4212_v51 = vmax.f32 %v4024_v20, 0.0  ;;  %v4214_v34 = vmax.f32 %v4137_v43, 0.0  ;;  %5180 = vmatpush1.bf16.msra.mxu0 %v9099_v42 }
 0x639   : > { %v4267_v62 = vpack.c.bf16 %v4211_v56, %v4207_v4  ;;  %v11391_v45 = vpack.c.bf16 %v4213_v57, %v4209_v13  ;;  %v9104_v4 = vld [vmem:[%s12683_s14 + $0x64] ss:$8 sps:$4 sm:$0xff]  }
 0x63a   : > { %v4268_v55 = vpack.c.bf16 %v4212_v51, %v4208_v23  ;;  %v11396_v6 = vpack.c.bf16 %v4214_v34, %v4210_v50  ;;  %v4027_v7 = vpop.f32.mrb[136].mxu1  ;;  %v4140_v47 = vpop.f32.mrb[72].mxu0  ;;  %4807 = vmatpush1.bf16.msra.mxu1 %v9039_v0  ;;  %v9053_v23 = vld [vmem:[%s12681_s12 + $0x154] ss:$8 sps:$4 sm:$0xff]   ;;  %5181 = vmatprep.subr.bf16.mxu0 %v9104_v4 }
 0x63b   : > { %v4028_v21 = vadd.f32 %v4027_v7, %v11327_v46  ;;  %v4141_v63 = vadd.f32 %v4140_v47, %v11330_v48  ;;  %v4029_v2 = vpop.f32.mrb[137].mxu1  ;;  %v4142_v3 = vpop.f32.mrb[73].mxu0  ;;  %4808 = vmatprep.subr.bf16.mxu1 %v9044_v53 }
 0x63c   : > { %v4030_v9 = vadd.f32 %v4029_v2, %v11333_v24  ;;  %v4143_v26 = vadd.f32 %v4142_v3, %v11336_v49  ;;  %v4031_v44 = vpop.f32.mrb[138].mxu1  ;;  %v4144_v28 = vpop.f32.mrb[74].mxu0  ;;  %4733 = vmatprep.mubr.bf16.mxu1 %v4268_v55  ;;  %v9107_v2 = vld [vmem:[%s12683_s14 + $0x74] ss:$8 sps:$4 sm:$0xff]  }
 0x63d   : > { %v4032_v29 = vadd.f32 %v4031_v44, %v11327_v46  ;;  %v4145_v40 = vadd.f32 %v4144_v28, %v11330_v48  ;;  %v4033_v41 = vpop.f32.mrb[139].mxu1  ;;  %v4146_v54 = vpop.f32.mrb[75].mxu0  ;;  %4734 = vmatmul.mubr.bf16.gmra.mrb[164].mxu1 %v4267_v62  ;;  %v4215_v32 = vmax.f32 %v4028_v21, 0.0  ;;  %v4217_v18 = vmax.f32 %v4141_v63, 0.0  ;;  %v9051_v63 = vld [vmem:[%s12681_s12 + $0x150] ss:$8 sps:$4 sm:$0xff]  }
 0x63e   : > { %v4034_v31 = vadd.f32 %v4033_v41, %v11333_v24  ;;  %v4147_v52 = vadd.f32 %v4146_v54, %v11336_v49  ;;  %4809 = vmatpush1.bf16.msra.mxu1 %v9042_v61  ;;  %v4216_v25 = vmax.f32 %v4030_v9, 0.0  ;;  %v4218_v8 = vmax.f32 %v4143_v26, 0.0  ;;  %v9102_v61 = vld [vmem:[%s12683_s14 + $0x60] ss:$8 sps:$4 sm:$0xff]   ;;  %v9056_v44 = vld [vmem:[%s12681_s12 + $0x164] ss:$8 sps:$4 sm:$0xff]  }
 0x63f   : > { %v4219_v59 = vmax.f32 %v4032_v29, 0.0  ;;  %v4221_v22 = vmax.f32 %v4145_v40, 0.0  ;;  %4810 = vmatprep.subr.bf16.mxu1 %v9047_v27  ;;  %5182 = vmatpush1.bf16.msra.mxu0 %v9102_v61 }
 0x640   : > { %v4220_v15 = vmax.f32 %v4034_v31, 0.0  ;;  %v4222_v38 = vmax.f32 %v4147_v52, 0.0  ;;  %v9105_v31 = vld [vmem:[%s12683_s14 + $0x70] ss:$8 sps:$4 sm:$0xff]   ;;  %5183 = vmatprep.subr.bf16.mxu0 %v9107_v2 }
 0x641   : > { %v4271_v36 = vpack.c.bf16 %v4219_v59, %v4215_v32  ;;  %v11427_v58 = vpack.c.bf16 %v4221_v22, %v4217_v18  ;;  %v9054_v18 = vld [vmem:[%s12681_s12 + $0x160] ss:$8 sps:$4 sm:$0xff]   ;;  %v9110_v59 = vld [vmem:[%s12683_s14 + $0x84] ss:$8 sps:$4 sm:$0xff]  }
 0x642   : > { %v4272_v39 = vpack.c.bf16 %v4220_v15, %v4216_v25  ;;  %v11432_v20 = vpack.c.bf16 %v4222_v38, %v4218_v8  ;;  %v4037_v43 = vpop.f32.mrb[140].mxu1  ;;  %v4150_v0 = vpop.f32.mrb[76].mxu0  ;;  %4811 = vmatpush1.bf16.msra.mxu1 %v9045_v19  ;;  %v9059_v15 = vld [vmem:[%s12681_s12 + $0x174] ss:$8 sps:$4 sm:$0xff]  }
 0x643   : > { %v4038_v13 = vadd.f32 %v4037_v43, %v11327_v46  ;;  %v4151_v56 = vadd.f32 %v4150_v0, %v11330_v48  ;;  %v4039_v57 = vpop.f32.mrb[141].mxu1  ;;  %v4152_v53 = vpop.f32.mrb[77].mxu0  ;;  %4812 = vmatprep.subr.bf16.mxu1 %v9050_v35  ;;  %5184 = vmatpush1.bf16.msra.mxu0 %v9105_v31 }
 0x644   : > { %v4040_v50 = vadd.f32 %v4039_v57, %v11333_v24  ;;  %v4153_v51 = vadd.f32 %v4152_v53, %v11336_v49  ;;  %v4041_v34 = vpop.f32.mrb[142].mxu1  ;;  %v4154_v62 = vpop.f32.mrb[78].mxu0  ;;  %4743 = vmatprep.mubr.bf16.mxu1 %v4272_v39  ;;  %v9057_v53 = vld [vmem:[%s12681_s12 + $0x170] ss:$8 sps:$4 sm:$0xff]   ;;  %5185 = vmatprep.subr.bf16.mxu0 %v9110_v59 }
 0x645   : > { %v4042_v5 = vadd.f32 %v4041_v34, %v11327_v46  ;;  %v4155_v55 = vadd.f32 %v4154_v62, %v11330_v48  ;;  %v4043_v7 = vpop.f32.mrb[143].mxu1  ;;  %v4156_v47 = vpop.f32.mrb[79].mxu0  ;;  %4744 = vmatmul.mubr.bf16.gmra.mrb[168].mxu1 %v4271_v36  ;;  %v4223_v3 = vmax.f32 %v4038_v13, 0.0  ;;  %v4225_v27 = vmax.f32 %v4151_v56, 0.0  ;;  %v9108_v13 = vld [vmem:[%s12683_s14 + $0x80] ss:$8 sps:$4 sm:$0xff]  }
 0x646   : > { %v4044_v10 = vadd.f32 %v4043_v7, %v11333_v24  ;;  %v4157_v21 = vadd.f32 %v4156_v47, %v11336_v49  ;;  %4813 = vmatpush1.bf16.msra.mxu1 %v9048_v33  ;;  %v4224_v28 = vmax.f32 %v4040_v50, 0.0  ;;  %v4226_v29 = vmax.f32 %v4153_v51, 0.0 }
 0x647   : > { %v4227_v9 = vmax.f32 %v4042_v5, 0.0  ;;  %v4229_v26 = vmax.f32 %v4155_v55, 0.0  ;;  %4814 = vmatprep.subr.bf16.mxu1 %v9053_v23  ;;  %v9113_v23 = vld [vmem:[%s12683_s14 + $0x94] ss:$8 sps:$4 sm:$0xff]   ;;  %v9062_v5 = vld [vmem:[%s12681_s12 + $0x184] ss:$8 sps:$4 sm:$0xff]   ;;  %5186 = vmatpush1.bf16.msra.mxu0 %v9108_v13 }
 0x648   : > { %v4228_v40 = vmax.f32 %v4044_v10, 0.0  ;;  %v4230_v41 = vmax.f32 %v4157_v21, 0.0  ;;  %5187 = vmatprep.subr.bf16.mxu0 %v9113_v23 }
 0x649   : > { %v4275_v54 = vpack.c.bf16 %v4227_v9, %v4223_v3  ;;  %v11463_v30 = vpack.c.bf16 %v4229_v26, %v4225_v27  ;;  %v9060_v26 = vld [vmem:[%s12681_s12 + $0x180] ss:$8 sps:$4 sm:$0xff]  }
 0x64a   : > { %v4276_v52 = vpack.c.bf16 %v4228_v40, %v4224_v28  ;;  %v11468_v19 = vpack.c.bf16 %v4230_v41, %v4226_v29  ;;  %v4047_v1 = vpop.f32.mrb[144].mxu1  ;;  %v4160_v32 = vpop.f32.mrb[80].mxu0  ;;  %4815 = vmatpush1.bf16.msra.mxu1 %v9051_v63  ;;  %v9111_v63 = vld [vmem:[%s12683_s14 + $0x90] ss:$8 sps:$4 sm:$0xff]  }
 0x64b   : > { %v4048_v22 = vadd.f32 %v4047_v1, %v11327_v46  ;;  %v4161_v35 = vadd.f32 %v4160_v32, %v11330_v48  ;;  %v4049_v25 = vpop.f32.mrb[145].mxu1  ;;  %v4162_v8 = vpop.f32.mrb[81].mxu0  ;;  %4816 = vmatprep.subr.bf16.mxu1 %v9056_v44  ;;  %v9116_v44 = vld [vmem:[%s12683_s14 + $0xa4] ss:$8 sps:$4 sm:$0xff]   ;;  %5188 = vmatpush1.bf16.msra.mxu0 %v9111_v63 }
 0x64c   : > { %v4050_v38 = vadd.f32 %v4049_v25, %v11333_v24  ;;  %v4163_v36 = vadd.f32 %v4162_v8, %v11336_v49  ;;  %v4051_v42 = vpop.f32.mrb[146].mxu1  ;;  %v4164_v39 = vpop.f32.mrb[82].mxu0  ;;  %4753 = vmatprep.mubr.bf16.mxu1 %v4276_v52  ;;  %v9114_v25 = vld [vmem:[%s12683_s14 + $0xa0] ss:$8 sps:$4 sm:$0xff]   ;;  %5189 = vmatprep.subr.bf16.mxu0 %v9116_v44 }
 0x64d   : > { %v4052_v43 = vadd.f32 %v4051_v42, %v11327_v46  ;;  %v4165_v0 = vadd.f32 %v4164_v39, %v11330_v48  ;;  %v4053_v33 = vpop.f32.mrb[147].mxu1  ;;  %v4166_v4 = vpop.f32.mrb[83].mxu0  ;;  %4754 = vmatmul.mubr.bf16.gmra.mrb[172].mxu1 %v4275_v54  ;;  %v4231_v50 = vmax.f32 %v4048_v22, 0.0  ;;  %v4233_v51 = vmax.f32 %v4161_v35, 0.0  ;;  %v9065_v54 = vld [vmem:[%s12681_s12 + $0x194] ss:$8 sps:$4 sm:$0xff]  }
 0x64e   : > { %v4054_v56 = vadd.f32 %v4053_v33, %v11333_v24  ;;  %v4167_v57 = vadd.f32 %v4166_v4, %v11336_v49  ;;  %4817 = vmatpush1.bf16.msra.mxu1 %v9054_v18  ;;  %v4232_v55 = vmax.f32 %v4050_v38, 0.0  ;;  %v4234_v7 = vmax.f32 %v4163_v36, 0.0  ;;  %v9063_v38 = vld [vmem:[%s12681_s12 + $0x190] ss:$8 sps:$4 sm:$0xff]   ;;  %v9119_v36 = vld [vmem:[%s12683_s14 + $0xb4] ss:$8 sps:$4 sm:$0xff]  }
 0x64f   : > { %v4235_v34 = vmax.f32 %v4052_v43, 0.0  ;;  %v4237_v62 = vmax.f32 %v4165_v0, 0.0  ;;  %4818 = vmatprep.subr.bf16.mxu1 %v9059_v15  ;;  %v9068_v33 = vld [vmem:[%s12681_s12 + $0x1a4] ss:$8 sps:$4 sm:$0xff]   ;;  %5190 = vmatpush1.bf16.msra.mxu0 %v9114_v25 }
 0x650   : > { %v4236_v47 = vmax.f32 %v4054_v56, 0.0  ;;  %v4238_v61 = vmax.f32 %v4167_v57, 0.0  ;;  %5191 = vmatprep.subr.bf16.mxu0 %v9119_v36  ;;  %v9074_v25 = vld [vmem:[%s12681_s12 + $0x1c4] ss:$8 sps:$4 sm:$0xff]  }
 0x651   : > { %v4279_v10 = vpack.c.bf16 %v4235_v34, %v4231_v50  ;;  %v11499_v21 = vpack.c.bf16 %v4237_v62, %v4233_v51  ;;  %v9117_v50 = vld [vmem:[%s12683_s14 + $0xb0] ss:$8 sps:$4 sm:$0xff]  }
 0x652   : > { %v4280_v2 = vpack.c.bf16 %v4236_v47, %v4232_v55  ;;  %v11504_v3 = vpack.c.bf16 %v4238_v61, %v4234_v7  ;;  %v4057_v27 = vpop.f32.mrb[148].mxu1  ;;  %v4170_v9 = vpop.f32.mrb[84].mxu0  ;;  %4819 = vmatpush1.bf16.msra.mxu1 %v9057_v53  ;;  %v9066_v55 = vld [vmem:[%s12681_s12 + $0x1a0] ss:$8 sps:$4 sm:$0xff]   ;;  %v9122_v7 = vld [vmem:[%s12683_s14 + $0xc4] ss:$8 sps:$4 sm:$0xff]  }
 0x653   : > { %v4058_v28 = vadd.f32 %v4057_v27, %v11327_v46  ;;  %v4171_v29 = vadd.f32 %v4170_v9, %v11330_v48  ;;  %v4059_v40 = vpop.f32.mrb[149].mxu1  ;;  %v4172_v41 = vpop.f32.mrb[85].mxu0  ;;  %4820 = vmatprep.subr.bf16.mxu1 %v9062_v5  ;;  %5192 = vmatpush1.bf16.msra.mxu0 %v9117_v50 }
 0x654   : > { %v4060_v31 = vadd.f32 %v4059_v40, %v11333_v24  ;;  %v4173_v52 = vadd.f32 %v4172_v41, %v11336_v49  ;;  %v4061_v1 = vpop.f32.mrb[150].mxu1  ;;  %v4174_v32 = vpop.f32.mrb[86].mxu0  ;;  %4763 = vmatprep.mubr.bf16.mxu1 %v4280_v2  ;;  %v9071_v2 = vld [vmem:[%s12681_s12 + $0x1b4] ss:$8 sps:$4 sm:$0xff]   ;;  %5193 = vmatprep.subr.bf16.mxu0 %v9122_v7 }
 0x655   : > { %v4062_v18 = vadd.f32 %v4061_v1, %v11327_v46  ;;  %v4175_v59 = vadd.f32 %v4174_v32, %v11330_v48  ;;  %v4063_v22 = vpop.f32.mrb[151].mxu1  ;;  %v4176_v35 = vpop.f32.mrb[87].mxu0  ;;  %4764 = vmatmul.mubr.bf16.gmra.mrb[176].mxu1 %v4279_v10  ;;  %v4239_v42 = vmax.f32 %v4058_v28, 0.0  ;;  %v4241_v39 = vmax.f32 %v4171_v29, 0.0  ;;  %v9069_v1 = vld [vmem:[%s12681_s12 + $0x1b0] ss:$8 sps:$4 sm:$0xff]  }
 0x656   : > { %v4064_v8 = vadd.f32 %v4063_v22, %v11333_v24  ;;  %v4177_v15 = vadd.f32 %v4176_v35, %v11336_v49  ;;  %4821 = vmatpush1.bf16.msra.mxu1 %v9060_v26  ;;  %v4240_v4 = vmax.f32 %v4060_v31, 0.0  ;;  %v4242_v13 = vmax.f32 %v4173_v52, 0.0  ;;  %v9125_v32 = vld [vmem:[%s12683_s14 + $0xd4] ss:$8 sps:$4 sm:$0xff]  }
 0x657   : > { %v4243_v43 = vmax.f32 %v4062_v18, 0.0  ;;  %v4245_v0 = vmax.f32 %v4175_v59, 0.0  ;;  %4822 = vmatprep.subr.bf16.mxu1 %v9065_v54  ;;  %v9120_v54 = vld [vmem:[%s12683_s14 + $0xc0] ss:$8 sps:$4 sm:$0xff]  }
 0x658   : > { %v4244_v56 = vmax.f32 %v4064_v8, 0.0  ;;  %v4246_v57 = vmax.f32 %v4177_v15, 0.0  ;;  %5194 = vmatpush1.bf16.msra.mxu0 %v9120_v54 }
 0x659   : > { %v4283_v53 = vpack.c.bf16 %v4243_v43, %v4239_v42  ;;  %v11535_v23 = vpack.c.bf16 %v4245_v0, %v4241_v39  ;;  %v9123_v43 = vld [vmem:[%s12683_s14 + $0xd0] ss:$8 sps:$4 sm:$0xff]   ;;  %5195 = vmatprep.subr.bf16.mxu0 %v9125_v32  ;;  %v9078_v32 = vld [vmem:[%s12681_s12 + $0x1e0] ss:$8 sps:$4 sm:$0xff]  }
 0x65a   : > { %v4284_v51 = vpack.c.bf16 %v4244_v56, %v4240_v4  ;;  %v11540_v34 = vpack.c.bf16 %v4246_v57, %v4242_v13  ;;  %v4067_v62 = vpop.f32.mrb[152].mxu1  ;;  %v4180_v5 = vpop.f32.mrb[88].mxu0  ;;  %4823 = vmatpush1.bf16.msra.mxu1 %v9063_v38  ;;  %v9072_v56 = vld [vmem:[%s12681_s12 + $0x1c0] ss:$8 sps:$4 sm:$0xff]  }
 0x65b   : > { %v4068_v47 = vadd.f32 %v4067_v62, %v11327_v46  ;;  %v4181_v61 = vadd.f32 %v4180_v5, %v11330_v48  ;;  %v4069_v10 = vpop.f32.mrb[153].mxu1  ;;  %v4182_v63 = vpop.f32.mrb[89].mxu0  ;;  %4824 = vmatprep.subr.bf16.mxu1 %v9068_v33  ;;  %v9077_v62 = vld [vmem:[%s12681_s12 + $0x1d4] ss:$8 sps:$4 sm:$0xff]  }
 0x65c   : > { %v4070_v27 = vadd.f32 %v4069_v10, %v11333_v24  ;;  %v4183_v9 = vadd.f32 %v4182_v63, %v11336_v49  ;;  %v4071_v26 = vpop.f32.mrb[154].mxu1  ;;  %v4184_v44 = vpop.f32.mrb[90].mxu0  ;;  %4773 = vmatprep.mubr.bf16.mxu1 %v4284_v51  ;;  %5196 = vmatpush1.bf16.msra.mxu0 %v9123_v43  ;;  %v9185_v43 = vld [vmem:[%s12685_s16 + $0x1cc] ss:$28 sps:$4 sm:$0xff]  }
 0x65d   : > { %v4072_v28 = vadd.f32 %v4071_v26, %v11327_v46  ;;  %v4185_v29 = vadd.f32 %v4184_v44, %v11330_v48  ;;  %v4073_v40 = vpop.f32.mrb[155].mxu1  ;;  %v4186_v41 = vpop.f32.mrb[91].mxu0  ;;  %4774 = vmatmul.mubr.bf16.gmra.mrb[180].mxu1 %v4283_v53  ;;  %v4247_v18 = vmax.f32 %v4068_v47, 0.0  ;;  %v4249_v59 = vmax.f32 %v4181_v61, 0.0  ;;  %v9075_v26 = vld [vmem:[%s12681_s12 + $0x1d0] ss:$8 sps:$4 sm:$0xff]  }
 0x65e   : > { %v4074_v31 = vadd.f32 %v4073_v40, %v11333_v24  ;;  %v4187_v52 = vadd.f32 %v4186_v41, %v11336_v49  ;;  %4825 = vmatpush1.bf16.msra.mxu1 %v9066_v55  ;;  %v4248_v8 = vmax.f32 %v4070_v27, 0.0  ;;  %v4250_v15 = vmax.f32 %v4183_v9, 0.0 }
 0x65f   : > { %v4251_v22 = vmax.f32 %v4072_v28, 0.0  ;;  %v4253_v35 = vmax.f32 %v4185_v29, 0.0  ;;  %4826 = vmatprep.subr.bf16.mxu1 %v9071_v2 }
 0x660   : > { %v4252_v38 = vmax.f32 %v4074_v31, 0.0  ;;  %v4254_v36 = vmax.f32 %v4187_v52, 0.0 }
 0x661   : > { %v4287_v42 = vpack.c.bf16 %v4251_v22, %v4247_v18  ;;  %v11571_v39 = vpack.c.bf16 %v4253_v35, %v4249_v59  ;;  %v9083_v18 = vld [vmem:[%s12681_s12 + $0x1f4] ss:$8 sps:$4 sm:$0xff]   ;;  %v9081_v59 = vld [vmem:[%s12681_s12 + $0x1f0] ss:$8 sps:$4 sm:$0xff]   ;;  %v9161_v35 = vld [vmem:[%s12685_s16 + $0xec] ss:$28 sps:$4 sm:$0xff]  }
 0x662   : > { %v4288_v0 = vpack.c.bf16 %v4252_v38, %v4248_v8  ;;  %v4290_v33 = vpack.c.bf16 %v4254_v36, %v4250_v15  ;;  %v4077_v4 = vpop.f32.mrb[156].mxu1  ;;  %v4190_v13 = vpop.f32.mrb[92].mxu0  ;;  %4827 = vmatpush1.bf16.msra.mxu1 %v9069_v1  ;;  %v9153_v22 = vld [vmem:[%s12685_s16 + $0xb0] ss:$28 sps:$4 sm:$0xff]   ;;  %v9167_v8 = vld [vmem:[%s12685_s16 + $0x124] ss:$28 sps:$4 sm:$0xff]  }
 0x663   : > { %v4078_v57 = vadd.f32 %v4077_v4, %v11327_v46  ;;  %v4191_v53 = vadd.f32 %v4190_v13, %v11330_v48  ;;  %v4079_v50 = vpop.f32.mrb[157].mxu1  ;;  %v4192_v51 = vpop.f32.mrb[93].mxu0  ;;  %4828 = vmatprep.subr.bf16.mxu1 %v9074_v25  ;;  %v9159_v25 = vld [vmem:[%s12685_s16 + $0xe8] ss:$28 sps:$4 sm:$0xff]   ;;  %v9165_v15 = vld [vmem:[%s12685_s16 + $0x120] ss:$28 sps:$4 sm:$0xff]  }
 0x664   : > { %v4080_v5 = vadd.f32 %v4079_v50, %v11333_v24  ;;  %v4193_v55 = vadd.f32 %v4192_v51, %v11336_v49  ;;  %v4081_v7 = vpop.f32.mrb[158].mxu1  ;;  %v4194_v47 = vpop.f32.mrb[94].mxu0  ;;  %4783 = vmatprep.mubr.bf16.mxu1 %v4288_v0  ;;  %v9173_v38 = vld [vmem:[%s12685_s16 + $0x15c] ss:$28 sps:$4 sm:$0xff]   ;;  %v9183_v0 = vld [vmem:[%s12685_s16 + $0x1c8] ss:$28 sps:$4 sm:$0xff]  }
 0x665   : > { %v4082_v61 = vadd.f32 %v4081_v7, %v11327_v46  ;;  %v4195_v10 = vadd.f32 %v4194_v47, %v11330_v48  ;;  %v4083_v63 = vpop.f32.mrb[159].mxu1  ;;  %v4196_v2 = vpop.f32.mrb[95].mxu0  ;;  %4784 = vmatmul.mubr.bf16.gmra.mrb[184].mxu1 %v4287_v42  ;;  %v4255_v44 = vmax.f32 %v4078_v57, 0.0  ;;  %v4257_v28 = vmax.f32 %v4191_v53, 0.0  ;;  %v9080_v46 = vld [vmem:[%s12681_s12 + $0x1e4] ss:$8 sps:$4 sm:$0xff]  }
 0x666   : > { %v4084_v27 = vadd.f32 %v4083_v63, %v11333_v24  ;;  %v4197_v9 = vadd.f32 %v4196_v2, %v11336_v49  ;;  %4829 = vmatpush1.bf16.msra.mxu1 %v9072_v56  ;;  %v4256_v48 = vmax.f32 %v4080_v5, 0.0  ;;  %v4258_v41 = vmax.f32 %v4193_v55, 0.0  ;;  %v9171_v36 = vld [vmem:[%s12685_s16 + $0x158] ss:$28 sps:$4 sm:$0xff]   ;;  %v9189_v4 = vld [vmem:[%s12685_s16 + $0x200] ss:$28 sps:$4 sm:$0xff]  }
 0x667   : > { %v4259_v29 = vmax.f32 %v4082_v61, 0.0  ;;  %v4261_v40 = vmax.f32 %v4195_v10, 0.0  ;;  %4830 = vmatprep.subr.bf16.mxu1 %v9077_v62  ;;  %v9179_v42 = vld [vmem:[%s12685_s16 + $0x194] ss:$28 sps:$4 sm:$0xff]   ;;  %v9197_v13 = vld [vmem:[%s12685_s16 + $0x23c] ss:$28 sps:$4 sm:$0xff]  }
 0x668   : > { %v4260_v54 = vmax.f32 %v4084_v27, 0.0  ;;  %v4262_v24 = vmax.f32 %v4197_v9, 0.0  ;;  %v9195_v56 = vld [vmem:[%s12685_s16 + $0x238] ss:$28 sps:$4 sm:$0xff]   ;;  %v9201_v53 = vld [vmem:[%s12685_s16 + $0x270] ss:$28 sps:$4 sm:$0xff]  }
 0x669   : > { %v4291_v31 = vpack.c.bf16 %v4259_v29, %v4255_v44  ;;  %v4293_v49 = vpack.c.bf16 %v4261_v40, %v4257_v28  ;;  %v9203_v57 = vld [vmem:[%s12685_s16 + $0x274] ss:$28 sps:$4 sm:$0xff]   ;;  %v9209_v50 = vld [vmem:[%s12685_s16 + $0x2ac] ss:$28 sps:$4 sm:$0xff]   ;;  %v9215_v62 = vld [vmem:[%s12685_s16 + $0x2e4] ss:$28 sps:$4 sm:$0xff]  }
 0x66a   : > { %v4292_v52 = vpack.c.bf16 %v4260_v54, %v4256_v48  ;;  %v4294_v1 = vpack.c.bf16 %v4262_v24, %v4258_v41  ;;  %4831 = vmatpush1.bf16.msra.mxu1 %v9075_v26  ;;  %v9207_v51 = vld [vmem:[%s12685_s16 + $0x2a8] ss:$28 sps:$4 sm:$0xff]   ;;  %v9213_v5 = vld [vmem:[%s12685_s16 + $0x2e0] ss:$28 sps:$4 sm:$0xff]  }
 0x66b   : > { %4832 = vmatprep.subr.bf16.mxu1 %v9080_v46  ;;  %v4359_v55 = vld [vmem:[%s12682_s13] sm:$0x3] }
 0x66c   : > { %4793 = vmatprep.mubr.bf16.mxu1 %v4292_v52  ;;  %v11721_v7 = vrot.slane %v4359_v55, %v10402_v12  ;;  %v11724_v47 = vrot.slane %v4359_v55, %v10408_v14  ;;  %v9132_v24 = vld [vmem:[%s12685_s16] ss:$28 sps:$4 sm:$0xff]  }
 0x66d   : > { %4794 = vmatmul.mubr.bf16.gmra.mrb[188].mxu1 %v4291_v31  ;;  %v9140_v52 = vld [vmem:[%s12685_s16 + $0x3c] ss:$28 sps:$4 sm:$0xff]  }
 0x66e   : > { %4833 = vmatpush1.bf16.msra.mxu1 %v9078_v32  ;;  %4836 = vmatprep.mubr.bf16.mxu1 %v11360_v60  ;;  %v9126_v60 = vld [vmem:[%s12683_s14 + $0xe0] ss:$8 sps:$4 sm:$0xff]  }
 0x66f   : > { %4834 = vmatprep.subr.bf16.mxu1 %v9083_v18 }
 0x672   : > { %4835 = vmatpush1.bf16.msra.mxu1 %v9081_v59 }
 0x675   : > { %4837 = vmatmul.mubr.bf16.vlgmr.msra.gmra.mrb[160].mxu1 %v11355_v37  ;;  %v9128_v37 = vld [vmem:[%s12683_s14 + $0xe4] ss:$8 sps:$4 sm:$0xff]  }
 0x676   : > { %4846 = vmatprep.mubr.bf16.mxu1 %v11396_v6  ;;  %5197 = vmatprep.subr.bf16.mxu0 %v9128_v37  ;;  %v9129_v6 = vld [vmem:[%s12683_s14 + $0xf0] ss:$8 sps:$4 sm:$0xff]  }
 0x677   : > { %5198 = vmatpush1.bf16.msra.mxu0 %v9126_v60  ;;  %v9138_v60 = vld [vmem:[%s12685_s16 + $0x38] ss:$28 sps:$4 sm:$0xff]  }
 0x67d   : > { %4847 = vmatmul.mubr.bf16.gmra.mrb[164].mxu1 %v11391_v45  ;;  %v9131_v45 = vld [vmem:[%s12683_s14 + $0xf4] ss:$8 sps:$4 sm:$0xff]  }
 0x67e   : > { %4856 = vmatprep.mubr.bf16.mxu1 %v11432_v20  ;;  %5199 = vmatprep.subr.bf16.mxu0 %v9131_v45  ;;  %v9135_v20 = vld [vmem:[%s12685_s16 + $0x8] ss:$28 sps:$4 sm:$0xff]  }
 0x67f   : > { %5200 = vmatpush1.bf16.msra.mxu0 %v9129_v6 }
 0x685   : > { %4857 = vmatmul.mubr.bf16.gmra.mrb[168].mxu1 %v11427_v58  ;;  %v9134_v58 = vld [vmem:[%s12685_s16 + $0x4] ss:$28 sps:$4 sm:$0xff]  }
 0x686   : > { %4866 = vmatprep.mubr.bf16.mxu1 %v11468_v19  ;;  %6071 = vmatprep.subr.bf16.mxu0 %v9134_v58  ;;  %v9143_v19 = vld [vmem:[%s12685_s16 + $0x44] ss:$28 sps:$4 sm:$0xff]   ;;  %v9146_v58 = vld [vmem:[%s12685_s16 + $0x74] ss:$28 sps:$4 sm:$0xff]  }
 0x68d   : > { %4867 = vmatmul.mubr.bf16.gmra.mrb[172].mxu1 %v11463_v30  ;;  %v9137_v30 = vld [vmem:[%s12685_s16 + $0xc] ss:$28 sps:$4 sm:$0xff]  }
 0x68e   : > { %4876 = vmatprep.mubr.bf16.mxu1 %v11504_v3  ;;  %6184 = vmatprep.subr.bf16.mxu1 %v9137_v30  ;;  %v9149_v3 = vld [vmem:[%s12685_s16 + $0x7c] ss:$28 sps:$4 sm:$0xff]  }
 0x68f   : > { %6185 = vmatpush1.bf16.msra.mxu1 %v9135_v20 }
 0x690   : > { %6186 = vmatprep.subr.bf16.mxu1 %v9143_v19 }
 0x695   : > { %4877 = vmatmul.mubr.bf16.gmra.mrb[176].mxu1 %v11499_v21  ;;  %v9141_v21 = vld [vmem:[%s12685_s16 + $0x40] ss:$28 sps:$4 sm:$0xff]  }
 0x696   : > { %4886 = vmatprep.mubr.bf16.mxu1 %v11540_v34  ;;  %6187 = vmatpush1.bf16.msra.mxu1 %v9141_v21  ;;  %v9155_v34 = vld [vmem:[%s12685_s16 + $0xb4] ss:$28 sps:$4 sm:$0xff]  }
 0x697   : > { %6188 = vmatprep.subr.bf16.mxu1 %v9149_v3 }
 0x69d   : > { %4887 = vmatmul.mubr.bf16.gmra.mrb[180].mxu1 %v11535_v23  ;;  %v9147_v23 = vld [vmem:[%s12685_s16 + $0x78] ss:$28 sps:$4 sm:$0xff]  }
 0x69e   : > { %4896 = vmatprep.mubr.bf16.mxu1 %v4290_v33  ;;  %6189 = vmatpush1.bf16.msra.mxu1 %v9147_v23  ;;  %v9191_v33 = vld [vmem:[%s12685_s16 + $0x204] ss:$28 sps:$4 sm:$0xff]   ;;  %v9144_v23 = vld [vmem:[%s12685_s16 + $0x70] ss:$28 sps:$4 sm:$0xff]  }
 0x69f   : > { %6190 = vmatprep.subr.bf16.mxu1 %v9155_v34 }
 0x6a2   : > { %6191 = vmatpush1.bf16.msra.mxu1 %v9153_v22 }
 0x6a3   : > { %6192 = vmatprep.subr.bf16.mxu1 %v9161_v35  ;;  %v9152_v35 = vld [vmem:[%s12685_s16 + $0xac] ss:$28 sps:$4 sm:$0xff]  }
 0x6a5   : > { %4897 = vmatmul.mubr.bf16.gmra.mrb[184].mxu1 %v11571_v39  ;;  %v9177_v39 = vld [vmem:[%s12685_s16 + $0x190] ss:$28 sps:$4 sm:$0xff]  }
 0x6a6   : > { %4906 = vmatprep.mubr.bf16.mxu1 %v4294_v1  ;;  %6193 = vmatpush1.bf16.msra.mxu1 %v9159_v25 }
 0x6a7   : > { %6194 = vmatprep.subr.bf16.mxu1 %v9167_v8 }
 0x6aa   : > { %6195 = vmatpush1.bf16.msra.mxu1 %v9165_v15 }
 0x6ab   : > { %6196 = vmatprep.subr.bf16.mxu1 %v9173_v38 }
 0x6ad   : > { %4907 = vmatmul.mubr.bf16.gmra.mrb[188].mxu1 %v4293_v49 }
 0x6ae   : > { %6197 = vmatpush1.bf16.msra.mxu1 %v9171_v36 }
 0x6af   : > { %6198 = vmatprep.subr.bf16.mxu1 %v9179_v42  ;;  %v9150_v42 = vld [vmem:[%s12685_s16 + $0xa8] ss:$28 sps:$4 sm:$0xff]  }
 0x6b2   : > { %6199 = vmatpush1.bf16.msra.mxu1 %v9177_v39 }
 0x6b3   : > { %6200 = vmatprep.subr.bf16.mxu1 %v9185_v43 }
 0x6b6   : > { %6201 = vmatpush1.bf16.msra.mxu1 %v9183_v0  ;;  %v9158_v0 = vld [vmem:[%s12685_s16 + $0xe4] ss:$28 sps:$4 sm:$0xff]  }
 0x6b7   : > { %6202 = vmatprep.subr.bf16.mxu1 %v9191_v33 }
 0x6ba   : > { %6203 = vmatpush1.bf16.msra.mxu1 %v9189_v4 }
 0x6bb   : > { %6204 = vmatprep.subr.bf16.mxu1 %v9197_v13 }
 0x6be   : > { %6205 = vmatpush1.bf16.msra.mxu1 %v9195_v56 }
 0x6bf   : > { %6206 = vmatprep.subr.bf16.mxu1 %v9203_v57 }
 0x6c2   : > { %6207 = vmatpush1.bf16.msra.mxu1 %v9201_v53  ;;  %v9156_v53 = vld [vmem:[%s12685_s16 + $0xe0] ss:$28 sps:$4 sm:$0xff]  }
 0x6c3   : > { %6208 = vmatprep.subr.bf16.mxu1 %v9209_v50 }
 0x6c6   : > { %6209 = vmatpush1.bf16.msra.mxu1 %v9207_v51 }
 0x6c7   : > { %6210 = vmatprep.subr.bf16.mxu1 %v9215_v62  ;;  %v9164_v62 = vld [vmem:[%s12685_s16 + $0x11c] ss:$28 sps:$4 sm:$0xff]  }
 0x6ca   : > { %6211 = vmatpush1.bf16.msra.mxu1 %v9213_v5 }
 0x748   : > { %v4838_v61 = vpop.f32.mrb[160].mxu1 }
 0x749   : > { %v8385_v10 = vadd.f32 %v4838_v61, %v11721_v7  ;;  %v4840_v63 = vpop.f32.mrb[161].mxu1 }
 0x74a   : > { %v8386_v2 = vadd.f32 %v4840_v63, %v11724_v47  ;;  %v4842_v27 = vpop.f32.mrb[162].mxu1 }
 0x74b   : > { %v8387_v9 = vadd.f32 %v4842_v27, %v11721_v7  ;;  %v4844_v26 = vpop.f32.mrb[163].mxu1  ;;  %v4917_v28 = vmax.f32 %v8385_v10, 0.0 }
 0x74c   : > { %v8388_v44 = vadd.f32 %v4844_v26, %v11724_v47  ;;  %v4918_v40 = vmax.f32 %v8386_v2, 0.0  ;;  %v9162_v2 = vld [vmem:[%s12685_s16 + $0x118] ss:$28 sps:$4 sm:$0xff]  }
 0x74d   : > { %v4919_v29 = vmax.f32 %v8387_v9, 0.0  ;;  %v9170_v26 = vld [vmem:[%s12685_s16 + $0x154] ss:$28 sps:$4 sm:$0xff]  }
 0x74e   : > { %v4920_v46 = vmax.f32 %v8388_v44, 0.0 }
 0x74f   : > { %v4949_v48 = vpack.c.bf16 %v4919_v29, %v4917_v28 }
 0x750   : > { %v4950_v41 = vpack.c.bf16 %v4920_v46, %v4918_v40  ;;  %v4848_v54 = vpop.f32.mrb[164].mxu1 }
 0x751   : > { %v8389_v31 = vadd.f32 %v4848_v54, %v11721_v7  ;;  %v4850_v49 = vpop.f32.mrb[165].mxu1 }
 0x752   : > { %v8390_v1 = vadd.f32 %v4850_v49, %v11724_v47  ;;  %v4852_v32 = vpop.f32.mrb[166].mxu1  ;;  %5201 = vmatprep.mubr.bf16.mxu0 %v4950_v41 }
 0x753   : > { %v8391_v18 = vadd.f32 %v4852_v32, %v11721_v7  ;;  %v4854_v59 = vpop.f32.mrb[167].mxu1  ;;  %5202 = vmatmul.mubr.bf16.vlgmr.msra.gmra.mrb[96].mxu0 %v4949_v48  ;;  %v4921_v45 = vmax.f32 %v8389_v31, 0.0  ;;  %v9168_v48 = vld [vmem:[%s12685_s16 + $0x150] ss:$28 sps:$4 sm:$0xff]  }
 0x754   : > { %v8392_v37 = vadd.f32 %v4854_v59, %v11724_v47  ;;  %6072 = vmatpush1.bf16.msra.mxu0 %v9132_v24  ;;  %v4922_v20 = vmax.f32 %v8390_v1, 0.0  ;;  %v9176_v24 = vld [vmem:[%s12685_s16 + $0x18c] ss:$28 sps:$4 sm:$0xff]  }
 0x755   : > { %v4923_v6 = vmax.f32 %v8391_v18, 0.0  ;;  %6073 = vmatprep.subr.bf16.mxu0 %v9140_v52  ;;  %v9174_v18 = vld [vmem:[%s12685_s16 + $0x188] ss:$28 sps:$4 sm:$0xff]  }
 0x756   : > { %v4924_v30 = vmax.f32 %v8392_v37, 0.0 }
 0x757   : > { %v4951_v19 = vpack.c.bf16 %v4923_v6, %v4921_v45 }
 0x758   : > { %v4952_v21 = vpack.c.bf16 %v4924_v30, %v4922_v20  ;;  %v4858_v3 = vpop.f32.mrb[168].mxu1  ;;  %6074 = vmatpush1.bf16.msra.mxu0 %v9138_v60  ;;  %v9182_v60 = vld [vmem:[%s12685_s16 + $0x1c4] ss:$28 sps:$4 sm:$0xff]  }
 0x759   : > { %v8393_v34 = vadd.f32 %v4858_v3, %v11721_v7  ;;  %v4860_v22 = vpop.f32.mrb[169].mxu1  ;;  %6075 = vmatprep.subr.bf16.mxu0 %v9146_v58 }
 0x75a   : > { %v8394_v25 = vadd.f32 %v4860_v22, %v11724_v47  ;;  %v4862_v8 = vpop.f32.mrb[170].mxu1  ;;  %5211 = vmatprep.mubr.bf16.mxu0 %v4952_v21 }
 0x75b   : > { %v8395_v15 = vadd.f32 %v4862_v8, %v11721_v7  ;;  %v4864_v38 = vpop.f32.mrb[171].mxu1  ;;  %5212 = vmatmul.mubr.bf16.gmra.mrb[100].mxu0 %v4951_v19  ;;  %v4925_v39 = vmax.f32 %v8393_v34, 0.0  ;;  %v9180_v19 = vld [vmem:[%s12685_s16 + $0x1c0] ss:$28 sps:$4 sm:$0xff]  }
 0x75c   : > { %v8396_v36 = vadd.f32 %v4864_v38, %v11724_v47  ;;  %6076 = vmatpush1.bf16.msra.mxu0 %v9144_v23  ;;  %v4926_v33 = vmax.f32 %v8394_v25, 0.0  ;;  %v9188_v23 = vld [vmem:[%s12685_s16 + $0x1fc] ss:$28 sps:$4 sm:$0xff]  }
 0x75d   : > { %v4927_v43 = vmax.f32 %v8395_v15, 0.0  ;;  %6077 = vmatprep.subr.bf16.mxu0 %v9152_v35  ;;  %v9186_v15 = vld [vmem:[%s12685_s16 + $0x1f8] ss:$28 sps:$4 sm:$0xff]  }
 0x75e   : > { %v4928_v4 = vmax.f32 %v8396_v36, 0.0 }
 0x75f   : > { %v4953_v13 = vpack.c.bf16 %v4927_v43, %v4925_v39 }
 0x760   : > { %v4954_v56 = vpack.c.bf16 %v4928_v4, %v4926_v33  ;;  %v4868_v57 = vpop.f32.mrb[172].mxu1  ;;  %6078 = vmatpush1.bf16.msra.mxu0 %v9150_v42  ;;  %v9194_v42 = vld [vmem:[%s12685_s16 + $0x234] ss:$28 sps:$4 sm:$0xff]  }
 0x761   : > { %v8397_v50 = vadd.f32 %v4868_v57, %v11721_v7  ;;  %v4870_v51 = vpop.f32.mrb[173].mxu1  ;;  %6079 = vmatprep.subr.bf16.mxu0 %v9158_v0 }
 0x762   : > { %v8398_v5 = vadd.f32 %v4870_v51, %v11724_v47  ;;  %v4872_v55 = vpop.f32.mrb[174].mxu1  ;;  %5221 = vmatprep.mubr.bf16.mxu0 %v4954_v56 }
 0x763   : > { %v8399_v61 = vadd.f32 %v4872_v55, %v11721_v7  ;;  %v4874_v10 = vpop.f32.mrb[175].mxu1  ;;  %5222 = vmatmul.mubr.bf16.gmra.mrb[104].mxu0 %v4953_v13  ;;  %v4929_v27 = vmax.f32 %v8397_v50, 0.0  ;;  %v9192_v13 = vld [vmem:[%s12685_s16 + $0x230] ss:$28 sps:$4 sm:$0xff]  }
 0x764   : > { %v8400_v63 = vadd.f32 %v4874_v10, %v11724_v47  ;;  %6080 = vmatpush1.bf16.msra.mxu0 %v9156_v53  ;;  %v4930_v44 = vmax.f32 %v8398_v5, 0.0  ;;  %v9200_v53 = vld [vmem:[%s12685_s16 + $0x26c] ss:$28 sps:$4 sm:$0xff]  }
 0x765   : > { %v4931_v9 = vmax.f32 %v8399_v61, 0.0  ;;  %6081 = vmatprep.subr.bf16.mxu0 %v9164_v62  ;;  %v9198_v61 = vld [vmem:[%s12685_s16 + $0x268] ss:$28 sps:$4 sm:$0xff]  }
 0x766   : > { %v4932_v28 = vmax.f32 %v8400_v63, 0.0 }
 0x767   : > { %v4955_v29 = vpack.c.bf16 %v4931_v9, %v4929_v27 }
 0x768   : > { %v4956_v40 = vpack.c.bf16 %v4932_v28, %v4930_v44  ;;  %v4878_v46 = vpop.f32.mrb[176].mxu1  ;;  %6082 = vmatpush1.bf16.msra.mxu0 %v9162_v2  ;;  %v9206_v2 = vld [vmem:[%s12685_s16 + $0x2a4] ss:$28 sps:$4 sm:$0xff]  }
 0x769   : > { %v8401_v41 = vadd.f32 %v4878_v46, %v11721_v7  ;;  %v4880_v54 = vpop.f32.mrb[177].mxu1  ;;  %6083 = vmatprep.subr.bf16.mxu0 %v9170_v26 }
 0x76a   : > { %v8402_v31 = vadd.f32 %v4880_v54, %v11724_v47  ;;  %v4882_v49 = vpop.f32.mrb[178].mxu1  ;;  %5231 = vmatprep.mubr.bf16.mxu0 %v4956_v40 }
 0x76b   : > { %v8403_v52 = vadd.f32 %v4882_v49, %v11721_v7  ;;  %v4884_v1 = vpop.f32.mrb[179].mxu1  ;;  %5232 = vmatmul.mubr.bf16.gmra.mrb[108].mxu0 %v4955_v29  ;;  %v4933_v59 = vmax.f32 %v8401_v41, 0.0  ;;  %v9204_v29 = vld [vmem:[%s12685_s16 + $0x2a0] ss:$28 sps:$4 sm:$0xff]  }
 0x76c   : > { %v8404_v32 = vadd.f32 %v4884_v1, %v11724_v47  ;;  %6084 = vmatpush1.bf16.msra.mxu0 %v9168_v48  ;;  %v4934_v45 = vmax.f32 %v8402_v31, 0.0  ;;  %v9212_v48 = vld [vmem:[%s12685_s16 + $0x2dc] ss:$28 sps:$4 sm:$0xff]  }
 0x76d   : > { %v4935_v37 = vmax.f32 %v8403_v52, 0.0  ;;  %6085 = vmatprep.subr.bf16.mxu0 %v9176_v24  ;;  %v9210_v52 = vld [vmem:[%s12685_s16 + $0x2d8] ss:$28 sps:$4 sm:$0xff]  }
 0x76e   : > { %v4936_v6 = vmax.f32 %v8404_v32, 0.0 }
 0x76f   : > { %v4957_v58 = vpack.c.bf16 %v4935_v37, %v4933_v59 }
 0x770   : > { %v4958_v20 = vpack.c.bf16 %v4936_v6, %v4934_v45  ;;  %v4888_v30 = vpop.f32.mrb[180].mxu1  ;;  %6086 = vmatpush1.bf16.msra.mxu0 %v9174_v18  ;;  %v9216_v45 = vld [vmem:[%s12685_s16 + $0x310] ss:$28 sps:$4 sm:$0xff]   ;;  %v9219_v6 = vld [vmem:[%s12685_s16 + $0x318] ss:$28 sps:$4 sm:$0xff]  }
 0x771   : > { %v8405_v21 = vadd.f32 %v4888_v30, %v11721_v7  ;;  %v4890_v3 = vpop.f32.mrb[181].mxu1  ;;  %6087 = vmatprep.subr.bf16.mxu0 %v9182_v60  ;;  %v9222_v30 = vld [vmem:[%s12685_s16 + $0x348] ss:$28 sps:$4 sm:$0xff]  }
 0x772   : > { %v8406_v34 = vadd.f32 %v4890_v3, %v11724_v47  ;;  %v4892_v22 = vpop.f32.mrb[182].mxu1  ;;  %5241 = vmatprep.mubr.bf16.mxu0 %v4958_v20  ;;  %v9227_v20 = vld [vmem:[%s12685_s16 + $0x354] ss:$28 sps:$4 sm:$0xff]  }
 0x773   : > { %v8407_v35 = vadd.f32 %v4892_v22, %v11721_v7  ;;  %v4894_v25 = vpop.f32.mrb[183].mxu1  ;;  %5242 = vmatmul.mubr.bf16.gmra.mrb[112].mxu0 %v4957_v58  ;;  %v4937_v38 = vmax.f32 %v8405_v21, 0.0  ;;  %v9224_v58 = vld [vmem:[%s12685_s16 + $0x34c] ss:$28 sps:$4 sm:$0xff]   ;;  %v9230_v21 = vld [vmem:[%s12685_s16 + $0x14] ss:$28 sps:$4 sm:$0xff]  }
 0x774   : > { %v8408_v8 = vadd.f32 %v4894_v25, %v11724_v47  ;;  %6088 = vmatpush1.bf16.msra.mxu0 %v9180_v19  ;;  %v4938_v39 = vmax.f32 %v8406_v34, 0.0  ;;  %v9225_v19 = vld [vmem:[%s12685_s16 + $0x350] ss:$28 sps:$4 sm:$0xff]   ;;  %v9231_v3 = vld [vmem:[%s12685_s16 + $0x1d8] ss:$28 sps:$4 sm:$0xff]  }
 0x775   : > { %v4939_v36 = vmax.f32 %v8407_v35, 0.0  ;;  %6089 = vmatprep.subr.bf16.mxu0 %v9188_v23  ;;  %v4997_v23 = vld [vmem:[%s12684_s15] sm:$0x3] }
 0x776   : > { %v4940_v43 = vmax.f32 %v8408_v8, 0.0  ;;  %v11873_v34 = vrot.slane %v4997_v23, %v10402_v12  ;;  %v11876_v22 = vrot.slane %v4997_v23, %v10408_v14 }
 0x777   : > { %v4959_v0 = vpack.c.bf16 %v4939_v36, %v4937_v38 }
 0x778   : > { %v4960_v33 = vpack.c.bf16 %v4940_v43, %v4938_v39  ;;  %v4898_v4 = vpop.f32.mrb[184].mxu1  ;;  %6090 = vmatpush1.bf16.msra.mxu0 %v9186_v15 }
 0x779   : > { %v8409_v56 = vadd.f32 %v4898_v4, %v11721_v7  ;;  %v4900_v57 = vpop.f32.mrb[185].mxu1  ;;  %6091 = vmatprep.subr.bf16.mxu0 %v9194_v42 }
 0x77a   : > { %v8410_v50 = vadd.f32 %v4900_v57, %v11724_v47  ;;  %v4902_v51 = vpop.f32.mrb[186].mxu1  ;;  %5251 = vmatprep.mubr.bf16.mxu0 %v4960_v33 }
 0x77b   : > { %v8411_v62 = vadd.f32 %v4902_v51, %v11721_v7  ;;  %v4904_v5 = vpop.f32.mrb[187].mxu1  ;;  %5252 = vmatmul.mubr.bf16.gmra.mrb[116].mxu0 %v4959_v0  ;;  %v4941_v10 = vmax.f32 %v8409_v56, 0.0 }
 0x77c   : > { %v8412_v55 = vadd.f32 %v4904_v5, %v11724_v47  ;;  %6092 = vmatpush1.bf16.msra.mxu0 %v9192_v13  ;;  %v4942_v27 = vmax.f32 %v8410_v50, 0.0  ;;  %v9232_v50 = vld [vmem:[%s12685_s16 + $0x18] ss:$28 sps:$4 sm:$0xff]   ;;  %v9235_v5 = vld [vmem:[%s12685_s16 + $0x4c] ss:$28 sps:$4 sm:$0xff]  }
 0x77d   : > { %v4943_v63 = vmax.f32 %v8411_v62, 0.0  ;;  %6093 = vmatprep.subr.bf16.mxu0 %v9200_v53  ;;  %v9228_v53 = vld [vmem:[%s12685_s16 + $0x10] ss:$28 sps:$4 sm:$0xff]  }
 0x77e   : > { %v4944_v9 = vmax.f32 %v8412_v55, 0.0  ;;  %v9239_v55 = vld [vmem:[%s12685_s16 + $0x210] ss:$28 sps:$4 sm:$0xff]  }
 0x77f   : > { %v4961_v26 = vpack.c.bf16 %v4943_v63, %v4941_v10 }
 0x780   : > { %v4962_v44 = vpack.c.bf16 %v4944_v9, %v4942_v27  ;;  %v4908_v28 = vpop.f32.mrb[188].mxu1  ;;  %6094 = vmatpush1.bf16.msra.mxu0 %v9198_v61  ;;  %v9233_v9 = vld [vmem:[%s12685_s16 + $0x48] ss:$28 sps:$4 sm:$0xff]  }
 0x781   : > { %v8413_v40 = vadd.f32 %v4908_v28, %v11721_v7  ;;  %v4910_v46 = vpop.f32.mrb[189].mxu1  ;;  %6095 = vmatprep.subr.bf16.mxu0 %v9206_v2 }
 0x782   : > { %v8414_v41 = vadd.f32 %v4910_v46, %v11724_v47  ;;  %v4912_v54 = vpop.f32.mrb[190].mxu1  ;;  %5261 = vmatprep.mubr.bf16.mxu0 %v4962_v44 }
 0x783   : > { %v8415_v24 = vadd.f32 %v4912_v54, %v11721_v7  ;;  %v4914_v31 = vpop.f32.mrb[191].mxu1  ;;  %5262 = vmatmul.mubr.bf16.gmra.mrb[120].mxu0 %v4961_v26  ;;  %v4945_v1 = vmax.f32 %v8413_v40, 0.0  ;;  %v9218_v7 = vld [vmem:[%s12685_s16 + $0x314] ss:$28 sps:$4 sm:$0xff]   ;;  %v9247_v40 = vld [vmem:[%s12685_s16 + $0x248] ss:$28 sps:$4 sm:$0xff]  }
 0x784   : > { %v8416_v49 = vadd.f32 %v4914_v31, %v11724_v47  ;;  %6096 = vmatpush1.bf16.msra.mxu0 %v9204_v29  ;;  %v4946_v18 = vmax.f32 %v8414_v41, 0.0  ;;  %v9221_v47 = vld [vmem:[%s12685_s16 + $0x31c] ss:$28 sps:$4 sm:$0xff]   ;;  %v9240_v26 = vld [vmem:[%s12685_s16 + $0x50] ss:$28 sps:$4 sm:$0xff]  }
 0x785   : > { %v4947_v32 = vmax.f32 %v8415_v24, 0.0  ;;  %6097 = vmatprep.subr.bf16.mxu0 %v9212_v48  ;;  %6212 = vmatprep.subr.bf16.mxu1 %v9221_v47  ;;  %v9238_v29 = vld [vmem:[%s12685_s16 + $0x84] ss:$28 sps:$4 sm:$0xff]  }
 0x786   : > { %v4948_v59 = vmax.f32 %v8416_v49, 0.0  ;;  %6213 = vmatpush1.bf16.msra.mxu1 %v9219_v6  ;;  %v9236_v31 = vld [vmem:[%s12685_s16 + $0x80] ss:$28 sps:$4 sm:$0xff]   ;;  %v9248_v49 = vld [vmem:[%s12685_s16 + $0x88] ss:$28 sps:$4 sm:$0xff]  }
 0x787   : > { %v4963_v37 = vpack.c.bf16 %v4947_v32, %v4945_v1  ;;  %6214 = vmatprep.subr.bf16.mxu1 %v9227_v20  ;;  %v9243_v32 = vld [vmem:[%s12685_s16 + $0xbc] ss:$28 sps:$4 sm:$0xff]  }
 0x788   : > { %v4964_v60 = vpack.c.bf16 %v4948_v59, %v4946_v18  ;;  %6098 = vmatpush1.bf16.msra.mxu0 %v9210_v52  ;;  %v9255_v18 = vld [vmem:[%s12685_s16 + $0x280] ss:$28 sps:$4 sm:$0xff]  }
 0x789   : > { %6099 = vmatprep.subr.bf16.mxu0 %v9218_v7  ;;  %v9256_v6 = vld [vmem:[%s12685_s16 + $0xc0] ss:$28 sps:$4 sm:$0xff]  }
 0x78a   : > { %5271 = vmatprep.mubr.bf16.mxu0 %v4964_v60  ;;  %6215 = vmatpush1.bf16.msra.mxu1 %v9225_v19  ;;  %v9263_v19 = vld [vmem:[%s12685_s16 + $0x2b8] ss:$28 sps:$4 sm:$0xff]  }
 0x78b   : > { %5272 = vmatmul.mubr.bf16.gmra.mrb[124].mxu0 %v4963_v37  ;;  %8289 = vmatprep.subr.bf16.mxu1 %v9231_v3 }
 0x78c   : > { %6100 = vmatpush1.bf16.msra.mxu0 %v9216_v45  ;;  %v9241_v45 = vld [vmem:[%s12685_s16 + $0xb8] ss:$28 sps:$4 sm:$0xff]  }
 0x78d   : > { %6101 = vmatprep.subr.bf16.mxu0 %v9224_v58 }
 0x790   : > { %6102 = vmatpush1.bf16.msra.mxu0 %v9222_v30  ;;  %v9246_v30 = vld [vmem:[%s12685_s16 + $0xf4] ss:$28 sps:$4 sm:$0xff]  }
 0x791   : > { %6297 = vmatprep.subr.bf16.mxu0 %v9230_v21 }
 0x826   : > { %v5203_v35 = vpop.f32.mrb[96].mxu0 }
 0x827   : > { %v5204_v25 = vadd.f32 %v5203_v35, %v11873_v34  ;;  %v5205_v8 = vpop.f32.mrb[97].mxu0 }
 0x828   : > { %v5206_v15 = vadd.f32 %v5205_v8, %v11876_v22  ;;  %v5207_v38 = vpop.f32.mrb[98].mxu0  ;;  %v9244_v8 = vld [vmem:[%s12685_s16 + $0xf0] ss:$28 sps:$4 sm:$0xff]  }
 0x829   : > { %v5208_v36 = vadd.f32 %v5207_v38, %v11873_v34  ;;  %v5209_v42 = vpop.f32.mrb[99].mxu0  ;;  %v5282_v43 = vmax.f32 %v5204_v25, 0.0 }
 0x82a   : > { %v5210_v39 = vadd.f32 %v5209_v42, %v11876_v22  ;;  %v5283_v33 = vmax.f32 %v5206_v15, 0.0  ;;  %v9264_v15 = vld [vmem:[%s12685_s16 + $0xf8] ss:$28 sps:$4 sm:$0xff]   ;;  %v9251_v42 = vld [vmem:[%s12685_s16 + $0x12c] ss:$28 sps:$4 sm:$0xff]  }
 0x82b   : > { %v5284_v0 = vmax.f32 %v5208_v36, 0.0 }
 0x82c   : > { %v5285_v4 = vmax.f32 %v5210_v39, 0.0  ;;  %v9271_v39 = vld [vmem:[%s12685_s16 + $0x2f0] ss:$28 sps:$4 sm:$0xff]  }
 0x82d   : > { %v11882_v13 = vpack.c.bf16 %v5284_v0, %v5282_v43 }
 0x82e   : > { %v11884_v56 = vpack.c.bf16 %v5285_v4, %v5283_v33  ;;  %v5213_v57 = vpop.f32.mrb[100].mxu0 }
 0x82f   : > { %v5214_v51 = vadd.f32 %v5213_v57, %v11873_v34  ;;  %v5215_v62 = vpop.f32.mrb[101].mxu0 }
 0x830   : > { %v5216_v61 = vadd.f32 %v5215_v62, %v11876_v22  ;;  %v5217_v10 = vpop.f32.mrb[102].mxu0  ;;  %6103 = vmatprep.mubr.bf16.mxu0 %v11884_v56  ;;  %6216 = vmatprep.mubr.bf16.mxu1 %v11884_v56 }
 0x831   : > { %v5218_v63 = vadd.f32 %v5217_v10, %v11873_v34  ;;  %v5219_v2 = vpop.f32.mrb[103].mxu0  ;;  %6104 = vmatmul.mubr.bf16.vlgmr.msra.gmra.mrb[128].mxu0 %v11882_v13  ;;  %6217 = vmatmul.mubr.bf16.vlgmr.msra.gmra.mrb[192].mxu1 %v11882_v13  ;;  %v5286_v44 = vmax.f32 %v5214_v51, 0.0 }
 0x832   : > { %v5220_v27 = vadd.f32 %v5219_v2, %v11876_v22  ;;  %6298 = vmatpush1.bf16.msra.mxu0 %v9228_v53  ;;  %8290 = vmatpush3.bf16.msra.mxu1 %v9232_v50  ;;  %v5287_v46 = vmax.f32 %v5216_v61, 0.0  ;;  %v9249_v53 = vld [vmem:[%s12685_s16 + $0x128] ss:$28 sps:$4 sm:$0xff]   ;;  %v9272_v50 = vld [vmem:[%s12685_s16 + $0x130] ss:$28 sps:$4 sm:$0xff]  }
 0x833   : > { %v5288_v28 = vmax.f32 %v5218_v63, 0.0  ;;  %6299 = vmatprep.subr.bf16.mxu0 %v9235_v5  ;;  %8291 = vmatprep.subr.bf16.mxu1 %v9239_v55  ;;  %v9254_v5 = vld [vmem:[%s12685_s16 + $0x164] ss:$28 sps:$4 sm:$0xff]  }
 0x834   : > { %v5289_v48 = vmax.f32 %v5220_v27, 0.0  ;;  %v9279_v55 = vld [vmem:[%s12685_s16 + $0x328] ss:$28 sps:$4 sm:$0xff]  }
 0x835   : > { %v11918_v41 = vpack.c.bf16 %v5288_v28, %v5286_v44 }
 0x836   : > { %v11920_v54 = vpack.c.bf16 %v5289_v48, %v5287_v46  ;;  %v5223_v24 = vpop.f32.mrb[104].mxu0  ;;  %6300 = vmatpush1.bf16.msra.mxu0 %v9233_v9  ;;  %8292 = vmatpush3.bf16.msra.mxu1 %v9240_v26  ;;  %v9252_v9 = vld [vmem:[%s12685_s16 + $0x160] ss:$28 sps:$4 sm:$0xff]   ;;  %v9280_v26 = vld [vmem:[%s12685_s16 + $0x168] ss:$28 sps:$4 sm:$0xff]  }
 0x837   : > { %v5224_v52 = vadd.f32 %v5223_v24, %v11873_v34  ;;  %v5225_v1 = vpop.f32.mrb[105].mxu0  ;;  %6301 = vmatprep.subr.bf16.mxu0 %v9238_v29  ;;  %8293 = vmatprep.subr.bf16.mxu1 %v9247_v40  ;;  %v9259_v29 = vld [vmem:[%s12685_s16 + $0x19c] ss:$28 sps:$4 sm:$0xff]  }
 0x838   : > { %v5226_v59 = vadd.f32 %v5225_v1, %v11876_v22  ;;  %v5227_v37 = vpop.f32.mrb[106].mxu0  ;;  %6113 = vmatprep.mubr.bf16.mxu0 %v11920_v54  ;;  %6226 = vmatprep.mubr.bf16.mxu1 %v11920_v54  ;;  %v9287_v40 = vld [vmem:[%s12685_s16 + $0x360] ss:$28 sps:$4 sm:$0xff]  }
 0x839   : > { %v5228_v60 = vadd.f32 %v5227_v37, %v11873_v34  ;;  %v5229_v7 = vpop.f32.mrb[107].mxu0  ;;  %6114 = vmatmul.mubr.bf16.gmra.mrb[132].mxu0 %v11918_v41  ;;  %6227 = vmatmul.mubr.bf16.gmra.mrb[196].mxu1 %v11918_v41  ;;  %v5290_v58 = vmax.f32 %v5224_v52, 0.0  ;;  %v9257_v52 = vld [vmem:[%s12685_s16 + $0x198] ss:$28 sps:$4 sm:$0xff]   ;;  %v9288_v1 = vld [vmem:[%s12685_s16 + $0x1a0] ss:$28 sps:$4 sm:$0xff]  }
 0x83a   : > { %v5230_v47 = vadd.f32 %v5229_v7, %v11876_v22  ;;  %6302 = vmatpush1.bf16.msra.mxu0 %v9236_v31  ;;  %8294 = vmatpush3.bf16.msra.mxu1 %v9248_v49  ;;  %v5291_v21 = vmax.f32 %v5226_v59, 0.0  ;;  %v9262_v59 = vld [vmem:[%s12685_s16 + $0x1d4] ss:$28 sps:$4 sm:$0xff]  }
 0x83b   : > { %v5292_v20 = vmax.f32 %v5228_v60, 0.0  ;;  %6303 = vmatprep.subr.bf16.mxu0 %v9243_v32  ;;  %8295 = vmatprep.subr.bf16.mxu1 %v9255_v18 }
 0x83c   : > { %v5293_v3 = vmax.f32 %v5230_v47, 0.0 }
 0x83d   : > { %v11954_v23 = vpack.c.bf16 %v5292_v20, %v5290_v58 }
 0x83e   : > { %v11956_v35 = vpack.c.bf16 %v5293_v3, %v5291_v21  ;;  %v5233_v25 = vpop.f32.mrb[108].mxu0  ;;  %6304 = vmatpush1.bf16.msra.mxu0 %v9241_v45  ;;  %8296 = vmatpush3.bf16.msra.mxu1 %v9256_v6  ;;  %v9260_v6 = vld [vmem:[%s12685_s16 + $0x1d0] ss:$28 sps:$4 sm:$0xff]  }
 0x83f   : > { %v5234_v38 = vadd.f32 %v5233_v25, %v11873_v34  ;;  %v5235_v36 = vpop.f32.mrb[109].mxu0  ;;  %6305 = vmatprep.subr.bf16.mxu0 %v9246_v30  ;;  %8297 = vmatprep.subr.bf16.mxu1 %v9263_v19  ;;  %v9267_v30 = vld [vmem:[%s12685_s16 + $0x20c] ss:$28 sps:$4 sm:$0xff]  }
 0x840   : > { %v5236_v43 = vadd.f32 %v5235_v36, %v11876_v22  ;;  %v5237_v0 = vpop.f32.mrb[110].mxu0  ;;  %6123 = vmatprep.mubr.bf16.mxu0 %v11956_v35  ;;  %6236 = vmatprep.mubr.bf16.mxu1 %v11956_v35 }
 0x841   : > { %v5238_v33 = vadd.f32 %v5237_v0, %v11873_v34  ;;  %v5239_v4 = vpop.f32.mrb[111].mxu0  ;;  %6124 = vmatmul.mubr.bf16.gmra.mrb[136].mxu0 %v11954_v23  ;;  %6237 = vmatmul.mubr.bf16.gmra.mrb[200].mxu1 %v11954_v23  ;;  %v5294_v51 = vmax.f32 %v5234_v38, 0.0 }
 0x842   : > { %v5240_v57 = vadd.f32 %v5239_v4, %v11876_v22  ;;  %6306 = vmatpush1.bf16.msra.mxu0 %v9244_v8  ;;  %8298 = vmatpush3.bf16.msra.mxu1 %v9264_v15  ;;  %v5295_v61 = vmax.f32 %v5236_v43, 0.0  ;;  %v9265_v15 = vld [vmem:[%s12685_s16 + $0x208] ss:$28 sps:$4 sm:$0xff]  }
 0x843   : > { %v5296_v62 = vmax.f32 %v5238_v33, 0.0  ;;  %6307 = vmatprep.subr.bf16.mxu0 %v9251_v42  ;;  %8299 = vmatprep.subr.bf16.mxu1 %v9271_v39  ;;  %v9270_v42 = vld [vmem:[%s12685_s16 + $0x244] ss:$28 sps:$4 sm:$0xff]  }
 0x844   : > { %v5297_v10 = vmax.f32 %v5240_v57, 0.0  ;;  %v9268_v57 = vld [vmem:[%s12685_s16 + $0x240] ss:$28 sps:$4 sm:$0xff]  }
 0x845   : > { %v11990_v63 = vpack.c.bf16 %v5296_v62, %v5294_v51  ;;  %v9275_v51 = vld [vmem:[%s12685_s16 + $0x27c] ss:$28 sps:$4 sm:$0xff]  }
 0x846   : > { %v11992_v2 = vpack.c.bf16 %v5297_v10, %v5295_v61  ;;  %v5243_v27 = vpop.f32.mrb[112].mxu0  ;;  %6308 = vmatpush1.bf16.msra.mxu0 %v9249_v53  ;;  %8300 = vmatpush3.bf16.msra.mxu1 %v9272_v50 }
 0x847   : > { %v5244_v44 = vadd.f32 %v5243_v27, %v11873_v34  ;;  %v5245_v28 = vpop.f32.mrb[113].mxu0  ;;  %6309 = vmatprep.subr.bf16.mxu0 %v9254_v5  ;;  %8301 = vmatprep.subr.bf16.mxu1 %v9279_v55  ;;  %v9273_v27 = vld [vmem:[%s12685_s16 + $0x278] ss:$28 sps:$4 sm:$0xff]  }
 0x848   : > { %v5246_v46 = vadd.f32 %v5245_v28, %v11876_v22  ;;  %v5247_v48 = vpop.f32.mrb[114].mxu0  ;;  %6133 = vmatprep.mubr.bf16.mxu0 %v11992_v2  ;;  %6246 = vmatprep.mubr.bf16.mxu1 %v11992_v2 }
 0x849   : > { %v5248_v24 = vadd.f32 %v5247_v48, %v11873_v34  ;;  %v5249_v31 = vpop.f32.mrb[115].mxu0  ;;  %6134 = vmatmul.mubr.bf16.gmra.mrb[140].mxu0 %v11990_v63  ;;  %6247 = vmatmul.mubr.bf16.gmra.mrb[204].mxu1 %v11990_v63  ;;  %v5298_v32 = vmax.f32 %v5244_v44, 0.0  ;;  %v9278_v44 = vld [vmem:[%s12685_s16 + $0x2b4] ss:$28 sps:$4 sm:$0xff]  }
 0x84a   : > { %v5250_v49 = vadd.f32 %v5249_v31, %v11876_v22  ;;  %6310 = vmatpush1.bf16.msra.mxu0 %v9252_v9  ;;  %8302 = vmatpush3.bf16.msra.mxu1 %v9280_v26  ;;  %v5299_v37 = vmax.f32 %v5246_v46, 0.0 }
 0x84b   : > { %v5300_v18 = vmax.f32 %v5248_v24, 0.0  ;;  %6311 = vmatprep.subr.bf16.mxu0 %v9259_v29  ;;  %8303 = vmatprep.subr.bf16.mxu1 %v9287_v40  ;;  %v9276_v24 = vld [vmem:[%s12685_s16 + $0x2b0] ss:$28 sps:$4 sm:$0xff]  }
 0x84c   : > { %v5301_v60 = vmax.f32 %v5250_v49, 0.0 }
 0x84d   : > { %v12023_v7 = vpack.c.bf16 %v5300_v18, %v5298_v32 }
 0x84e   : > { %v12025_v47 = vpack.c.bf16 %v5301_v60, %v5299_v37  ;;  %v5253_v45 = vpop.f32.mrb[116].mxu0  ;;  %6312 = vmatpush1.bf16.msra.mxu0 %v9257_v52  ;;  %8304 = vmatpush3.bf16.msra.mxu1 %v9288_v1  ;;  %v9283_v52 = vld [vmem:[%s12685_s16 + $0x2ec] ss:$28 sps:$4 sm:$0xff]  }
 0x84f   : > { %v5254_v58 = vadd.f32 %v5253_v45, %v11873_v34  ;;  %v5255_v20 = vpop.f32.mrb[117].mxu0  ;;  %6313 = vmatprep.subr.bf16.mxu0 %v9262_v59  ;;  %v9281_v60 = vld [vmem:[%s12685_s16 + $0x2e8] ss:$28 sps:$4 sm:$0xff]  }
 0x850   : > { %v5256_v19 = vadd.f32 %v5255_v20, %v11876_v22  ;;  %v5257_v21 = vpop.f32.mrb[118].mxu0  ;;  %6143 = vmatprep.mubr.bf16.mxu0 %v12025_v47  ;;  %6256 = vmatprep.mubr.bf16.mxu1 %v12025_v47 }
 0x851   : > { %v5258_v3 = vadd.f32 %v5257_v21, %v11873_v34  ;;  %v5259_v25 = vpop.f32.mrb[119].mxu0  ;;  %6144 = vmatmul.mubr.bf16.gmra.mrb[144].mxu0 %v12023_v7  ;;  %6257 = vmatmul.mubr.bf16.gmra.mrb[208].mxu1 %v12023_v7  ;;  %v5302_v38 = vmax.f32 %v5254_v58, 0.0  ;;  %v9286_v58 = vld [vmem:[%s12685_s16 + $0x324] ss:$28 sps:$4 sm:$0xff]   ;;  %v9291_v21 = vld [vmem:[%s12685_s16 + $0x35c] ss:$28 sps:$4 sm:$0xff]  }
 0x852   : > { %v5260_v8 = vadd.f32 %v5259_v25, %v11876_v22  ;;  %6314 = vmatpush1.bf16.msra.mxu0 %v9260_v6  ;;  %v5303_v39 = vmax.f32 %v5256_v19, 0.0 }
 0x853   : > { %v5304_v36 = vmax.f32 %v5258_v3, 0.0  ;;  %6315 = vmatprep.subr.bf16.mxu0 %v9267_v30  ;;  %v9289_v3 = vld [vmem:[%s12685_s16 + $0x358] ss:$28 sps:$4 sm:$0xff]  }
 0x854   : > { %v5305_v43 = vmax.f32 %v5260_v8, 0.0 }
 0x855   : > { %v12047_v0 = vpack.c.bf16 %v5304_v36, %v5302_v38 }
 0x856   : > { %v12049_v33 = vpack.c.bf16 %v5305_v43, %v5303_v39  ;;  %v5263_v4 = vpop.f32.mrb[120].mxu0  ;;  %6316 = vmatpush1.bf16.msra.mxu0 %v9265_v15 }
 0x857   : > { %v5264_v53 = vadd.f32 %v5263_v4, %v11873_v34  ;;  %v5265_v50 = vpop.f32.mrb[121].mxu0  ;;  %6317 = vmatprep.subr.bf16.mxu0 %v9270_v42 }
 0x858   : > { %v5266_v62 = vadd.f32 %v5265_v50, %v11876_v22  ;;  %v5267_v5 = vpop.f32.mrb[122].mxu0  ;;  %6153 = vmatprep.mubr.bf16.mxu0 %v12049_v33  ;;  %6266 = vmatprep.mubr.bf16.mxu1 %v12049_v33 }
 0x859   : > { %v5268_v55 = vadd.f32 %v5267_v5, %v11873_v34  ;;  %v5269_v61 = vpop.f32.mrb[123].mxu0  ;;  %6154 = vmatmul.mubr.bf16.gmra.mrb[148].mxu0 %v12047_v0  ;;  %6267 = vmatmul.mubr.bf16.gmra.mrb[212].mxu1 %v12047_v0  ;;  %v5306_v9 = vmax.f32 %v5264_v53, 0.0 }
 0x85a   : > { %v5270_v10 = vadd.f32 %v5269_v61, %v11876_v22  ;;  %6318 = vmatpush1.bf16.msra.mxu0 %v9268_v57  ;;  %v5307_v28 = vmax.f32 %v5266_v62, 0.0 }
 0x85b   : > { %v5308_v26 = vmax.f32 %v5268_v55, 0.0  ;;  %6319 = vmatprep.subr.bf16.mxu0 %v9275_v51 }
 0x85c   : > { %v5309_v29 = vmax.f32 %v5270_v10, 0.0 }
 0x85d   : > { %v12071_v40 = vpack.c.bf16 %v5308_v26, %v5306_v9 }
 0x85e   : > { %v12073_v46 = vpack.c.bf16 %v5309_v29, %v5307_v28  ;;  %v5273_v48 = vpop.f32.mrb[124].mxu0  ;;  %6320 = vmatpush1.bf16.msra.mxu0 %v9273_v27 }
 0x85f   : > { %v5274_v31 = vadd.f32 %v5273_v48, %v11873_v34  ;;  %v5275_v49 = vpop.f32.mrb[125].mxu0  ;;  %6321 = vmatprep.subr.bf16.mxu0 %v9278_v44 }
 0x860   : > { %v5276_v1 = vadd.f32 %v5275_v49, %v11876_v22  ;;  %v5277_v32 = vpop.f32.mrb[126].mxu0  ;;  %6163 = vmatprep.mubr.bf16.mxu0 %v12073_v46  ;;  %6276 = vmatprep.mubr.bf16.mxu1 %v12073_v46 }
 0x861   : > { %v5278_v18 = vadd.f32 %v5277_v32, %v11873_v34  ;;  %v5279_v59 = vpop.f32.mrb[127].mxu0  ;;  %6164 = vmatmul.mubr.bf16.gmra.mrb[152].mxu0 %v12071_v40  ;;  %6277 = vmatmul.mubr.bf16.gmra.mrb[216].mxu1 %v12071_v40  ;;  %v5310_v45 = vmax.f32 %v5274_v31, 0.0 }
 0x862   : > { %v5280_v37 = vadd.f32 %v5279_v59, %v11876_v22  ;;  %6322 = vmatpush1.bf16.msra.mxu0 %v9276_v24  ;;  %v5311_v34 = vmax.f32 %v5276_v1, 0.0  ;;  %v9284_v22 = vld [vmem:[%s12685_s16 + $0x320] ss:$28 sps:$4 sm:$0xff]  }
 0x863   : > { %v5312_v6 = vmax.f32 %v5278_v18, 0.0  ;;  %6323 = vmatprep.subr.bf16.mxu0 %v9283_v52 }
 0x864   : > { %v5313_v20 = vmax.f32 %v5280_v37, 0.0 }
 0x865   : > { %v5328_v30 = vpack.c.bf16 %v5312_v6, %v5310_v45 }
 0x866   : > { %v5329_v19 = vpack.c.bf16 %v5313_v20, %v5311_v34  ;;  %6324 = vmatpush1.bf16.msra.mxu0 %v9281_v60 }
 0x867   : > { %6325 = vmatprep.subr.bf16.mxu0 %v9286_v58 }
 0x868   : > { %6173 = vmatprep.mubr.bf16.mxu0 %v5329_v19  ;;  %6286 = vmatprep.mubr.bf16.mxu1 %v5329_v19 }
 0x869   : > { %6174 = vmatmul.mubr.bf16.gmra.mrb[156].mxu0 %v5328_v30  ;;  %6287 = vmatmul.mubr.bf16.gmra.mrb[220].mxu1 %v5328_v30 }
 0x86a   : > { %6326 = vmatpush1.bf16.msra.mxu0 %v9284_v22  ;;  %6329 = vmatprep.mubr.bf16.mxu0 %v11884_v56 }
 0x86b   : > { %6442 = vmatprep.mubr.bf16.mxu1 %v11884_v56  ;;  %6327 = vmatprep.subr.bf16.mxu0 %v9291_v21 }
 0x86e   : > { %6328 = vmatpush1.bf16.msra.mxu0 %v9289_v3 }
 0x871   : > { %6330 = vmatmul.mubr.bf16.vlgmr.msra.gmra.mrb[160].mxu0 %v11882_v13  ;;  %6443 = vmatmul.mubr.bf16.vlgmr.msra.gmra.mrb[224].mxu1 %v11882_v13  ;;  %v12135_v13 = vld [vmem:[%s12686_s17] sm:$0xff] }
 0x872   : > { %6339 = vmatprep.mubr.bf16.mxu0 %v11920_v54  ;;  %6450 = vmatprep.mubr.bf16.mxu1 %v11920_v54  ;;  %v12139_v56 = vrot.slane %v12135_v13, %v10402_v12  ;;  %v12147_v54 = vrot.slane %v12135_v13, %v10408_v14 }
 0x879   : > { %6340 = vmatmul.mubr.bf16.gmra.mrb[164].mxu0 %v11918_v41  ;;  %6451 = vmatmul.mubr.bf16.gmra.mrb[228].mxu1 %v11918_v41  ;;  %v12143_v41 = vrot.slane %v12135_v13, %v10881_v17 }
 0x87a   : > { %6349 = vmatprep.mubr.bf16.mxu0 %v11956_v35  ;;  %6458 = vmatprep.mubr.bf16.mxu1 %v11956_v35 }
 0x881   : > { %6350 = vmatmul.mubr.bf16.gmra.mrb[168].mxu0 %v11954_v23  ;;  %6459 = vmatmul.mubr.bf16.gmra.mrb[232].mxu1 %v11954_v23  ;;  %v12151_v23 = vrot.slane %v12135_v13, %v10885_v16 }
 0x882   : > { %6359 = vmatprep.mubr.bf16.mxu0 %v11992_v2  ;;  %6466 = vmatprep.mubr.bf16.mxu1 %v11992_v2 }
 0x889   : > { %6360 = vmatmul.mubr.bf16.gmra.mrb[172].mxu0 %v11990_v63  ;;  %6467 = vmatmul.mubr.bf16.gmra.mrb[236].mxu1 %v11990_v63 }
 0x88a   : > { %6369 = vmatprep.mubr.bf16.mxu0 %v12025_v47  ;;  %6474 = vmatprep.mubr.bf16.mxu1 %v12025_v47 }
 0x891   : > { %6370 = vmatmul.mubr.bf16.gmra.mrb[176].mxu0 %v12023_v7  ;;  %6475 = vmatmul.mubr.bf16.gmra.mrb[240].mxu1 %v12023_v7 }
 0x892   : > { %6379 = vmatprep.mubr.bf16.mxu0 %v12049_v33  ;;  %6482 = vmatprep.mubr.bf16.mxu1 %v12049_v33 }
 0x899   : > { %6380 = vmatmul.mubr.bf16.gmra.mrb[180].mxu0 %v12047_v0  ;;  %6483 = vmatmul.mubr.bf16.gmra.mrb[244].mxu1 %v12047_v0 }
 0x89a   : > { %6389 = vmatprep.mubr.bf16.mxu0 %v12073_v46  ;;  %6490 = vmatprep.mubr.bf16.mxu1 %v12073_v46 }
 0x8a1   : > { %6390 = vmatmul.mubr.bf16.gmra.mrb[184].mxu0 %v12071_v40  ;;  %6491 = vmatmul.mubr.bf16.gmra.mrb[248].mxu1 %v12071_v40 }
 0x8a2   : > { %6399 = vmatprep.mubr.bf16.mxu0 %v5329_v19  ;;  %6498 = vmatprep.mubr.bf16.mxu1 %v5329_v19 }
 0x8a9   : > { %6400 = vmatmul.mubr.bf16.gmra.mrb[188].mxu0 %v5328_v30  ;;  %6499 = vmatmul.mubr.bf16.gmra.mrb[252].mxu1 %v5328_v30 }
 0x904   : > { %v6105_v35 = vpop.f32.mrb[128].mxu0  ;;  %v6218_v63 = vpop.f32.mrb[192].mxu1 }
 0x905   : > { %v6106_v2 = vadd.f32 %v6105_v35, %v12139_v56  ;;  %v6219_v7 = vadd.f32 %v6218_v63, %v12143_v41  ;;  %v6107_v12 = vpop.f32.mrb[129].mxu0  ;;  %v6220_v47 = vpop.f32.mrb[193].mxu1 }
 0x906   : > { %v6108_v25 = vadd.f32 %v6107_v12, %v12147_v54  ;;  %v6221_v17 = vadd.f32 %v6220_v47, %v12151_v23  ;;  %v6109_v8 = vpop.f32.mrb[130].mxu0  ;;  %v6222_v15 = vpop.f32.mrb[194].mxu1 }
 0x907   : > { %v8047_v14 = vmul.f32 -1.442695, %v6106_v2  ;;  %v8049_v38 = vmul.f32 -1.442695, %v6219_v7  ;;  %v6110_v36 = vadd.f32 %v6109_v8, %v12139_v56  ;;  %v6223_v16 = vadd.f32 %v6222_v15, %v12143_v41  ;;  %v6111_v42 = vpop.f32.mrb[131].mxu0  ;;  %v6224_v39 = vpop.f32.mrb[195].mxu1 }
 0x908   : > { %v8048_v43 = vmul.f32 -1.442695, %v6108_v25  ;;  %v8050_v0 = vmul.f32 -1.442695, %v6221_v17  ;;  %v6112_v33 = vadd.f32 %v6111_v42, %v12147_v54  ;;  %v6225_v4 = vadd.f32 %v6224_v39, %v12151_v23 }
 0x909   : > { %9324 = vpow2.f32 %v8047_v14  ;;  %v8054_v57 = vmul.f32 -1.442695, %v6110_v36  ;;  %v8056_v53 = vmul.f32 -1.442695, %v6223_v16 }
 0x90a   : > { %9326 = vpow2.f32 %v8049_v38  ;;  %v8055_v50 = vmul.f32 -1.442695, %v6112_v33  ;;  %v8057_v51 = vmul.f32 -1.442695, %v6225_v4 }
 0x90b   : > { %9328 = vpow2.f32 %v8048_v43 }
 0x90c   : > { %9330 = vpow2.f32 %v8050_v0  ;;  %v6115_v62 = vpop.f32.mrb[132].mxu0  ;;  %v6228_v5 = vpop.f32.mrb[196].mxu1 }
 0x90d   : > { %9332 = vpow2.f32 %v8054_v57  ;;  %v6116_v55 = vadd.f32 %v6115_v62, %v12139_v56  ;;  %v6229_v61 = vadd.f32 %v6228_v5, %v12143_v41  ;;  %v6117_v10 = vpop.f32.mrb[133].mxu0  ;;  %v6230_v27 = vpop.f32.mrb[197].mxu1 }
 0x90e   : > { %9334 = vpow2.f32 %v8056_v53  ;;  %v6118_v9 = vadd.f32 %v6117_v10, %v12147_v54  ;;  %v6231_v26 = vadd.f32 %v6230_v27, %v12151_v23  ;;  %v6119_v44 = vpop.f32.mrb[134].mxu0  ;;  %v6232_v28 = vpop.f32.mrb[198].mxu1 }
 0x90f   : > { %9336 = vpow2.f32 %v8055_v50  ;;  %v8061_v29 = vmul.f32 -1.442695, %v6116_v55  ;;  %v8063_v40 = vmul.f32 -1.442695, %v6229_v61  ;;  %v6120_v46 = vadd.f32 %v6119_v44, %v12139_v56  ;;  %v6121_v48 = vpop.f32.mrb[135].mxu0  ;;  %v6234_v24 = vpop.f32.mrb[199].mxu1 }
 0x910   : > { %9338 = vpow2.f32 %v8057_v51  ;;  %v8062_v31 = vmul.f32 -1.442695, %v6118_v9  ;;  %v8064_v49 = vmul.f32 -1.442695, %v6231_v26  ;;  %v6233_v15 = vadd.f32 %v6232_v28, %v12143_v41 }
 0x911   : > { %9340 = vpow2.f32 %v8061_v29  ;;  %v8068_v52 = vmul.f32 -1.442695, %v6120_v46  ;;  %v6122_v36 = vadd.f32 %v6121_v48, %v12147_v54  ;;  %v6235_v43 = vadd.f32 %v6234_v24, %v12151_v23 }
 0x912   : > { %9342 = vpow2.f32 %v8063_v40  ;;  %v8070_v55 = vmul.f32 -1.442695, %v6233_v15 }
 0x913   : > { %v9325_v1 = vpop.eup %9324  ;;  %9344 = vpow2.f32 %v8062_v31  ;;  %v8069_v44 = vmul.f32 -1.442695, %v6122_v36  ;;  %v8071_v46 = vmul.f32 -1.442695, %v6235_v43 }
 0x914   : > { %v9327_v32 = vpop.eup %9326  ;;  %v6843_v18 = vadd.f32 1.0, %v9325_v1  ;;  %9346 = vpow2.f32 %v8064_v49  ;;  %v6125_v59 = vpop.f32.mrb[136].mxu0 }
 0x915   : > { %v6238_v37 = vpop.f32.mrb[200].mxu1  ;;  %v9329_v60 = vpop.eup %9328  ;;  %v6845_v45 = vadd.f32 1.0, %v9327_v32  ;;  %9348 = vpow2.f32 %v8068_v52  ;;  %v6126_v53 = vadd.f32 %v6125_v59, %v12139_v56 }
 0x916   : > { %v6127_v6 = vpop.f32.mrb[137].mxu0  ;;  %v6240_v58 = vpop.f32.mrb[201].mxu1  ;;  %9350 = vrcp.f32 %v6843_v18  ;;  %v6844_v20 = vadd.f32 1.0, %v9329_v60  ;;  %v6239_v61 = vadd.f32 %v6238_v37, %v12143_v41 }
 0x917   : > { %v9331_v34 = vpop.eup %9330  ;;  %v6129_v30 = vpop.f32.mrb[138].mxu0  ;;  %9352 = vrcp.f32 %v6845_v45  ;;  %v6128_v28 = vadd.f32 %v6127_v6, %v12147_v54  ;;  %v6241_v48 = vadd.f32 %v6240_v58, %v12151_v23  ;;  %v8075_v31 = vmul.f32 -1.442695, %v6126_v53 }
 0x918   : > { %v12166_v19 = vpop.f32.mrb[202].mxu1  ;;  %v9333_v22 = vpop.eup %9332  ;;  %v6846_v21 = vadd.f32 1.0, %v9331_v34  ;;  %9354 = vrcp.f32 %v6844_v20  ;;  %v6130_v49 = vadd.f32 %v6129_v30, %v12139_v56  ;;  %v8077_v1 = vmul.f32 -1.442695, %v6239_v61 }
 0x919   : > { %v12168_v3 = vpop.f32.mrb[139].mxu0  ;;  %v9335_v35 = vpop.eup %9334  ;;  %v6850_v63 = vadd.f32 1.0, %v9333_v22  ;;  %v6243_v32 = vadd.f32 %v12166_v19, %v12143_v41  ;;  %v8076_v59 = vmul.f32 -1.442695, %v6128_v28  ;;  %v8078_v58 = vmul.f32 -1.442695, %v6241_v48 }
 0x91a   : > { %v12170_v2 = vpop.f32.mrb[203].mxu1  ;;  %v9337_v7 = vpop.eup %9336  ;;  %9356 = vrcp.f32 %v6846_v21  ;;  %v6852_v12 = vadd.f32 1.0, %v9335_v35  ;;  %v6132_v37 = vadd.f32 %v12168_v3, %v12147_v54  ;;  %v8082_v22 = vmul.f32 -1.442695, %v6130_v49 }
 0x91b   : > { %v9339_v47 = vpop.eup %9338  ;;  %9358 = vrcp.f32 %v6850_v63  ;;  %v6851_v25 = vadd.f32 1.0, %v9337_v7  ;;  %v6245_v34 = vadd.f32 %v12170_v2, %v12151_v23  ;;  %v8084_v2 = vmul.f32 -1.442695, %v6243_v32 }
 0x91c   : > { %v9341_v17 = vpop.eup %9340  ;;  %9360 = vrcp.f32 %v6852_v12  ;;  %v6853_v8 = vadd.f32 1.0, %v9339_v47  ;;  %v6135_v16 = vpop.f32.mrb[140].mxu0 }
 0x91d   : > { %v9343_v14 = vpop.eup %9342  ;;  %9362 = vrcp.f32 %v6851_v25  ;;  %v6857_v38 = vadd.f32 1.0, %v9341_v17  ;;  %v6248_v0 = vpop.f32.mrb[204].mxu1  ;;  %v6136_v21 = vadd.f32 %v6135_v16, %v12139_v56  ;;  %v8083_v17 = vmul.f32 -1.442695, %v6132_v37 }
 0x91e   : > { %v9345_v42 = vpop.eup %9344  ;;  %9364 = vrcp.f32 %v6853_v8  ;;  %v6859_v39 = vadd.f32 1.0, %v9343_v14  ;;  %v12176_v33 = vpop.f32.mrb[141].mxu0  ;;  %v6249_v7 = vadd.f32 %v6248_v0, %v12143_v41  ;;  %v8085_v15 = vmul.f32 -1.442695, %v6245_v34 }
 0x91f   : > { %v9347_v4 = vpop.eup %9346  ;;  %9366 = vrcp.f32 %v6857_v38  ;;  %v6858_v57 = vadd.f32 1.0, %v9345_v42  ;;  %v12184_v50 = vpop.f32.mrb[205].mxu1  ;;  %v8089_v36 = vmul.f32 -1.442695, %v6136_v21  ;;  %v6138_v48 = vadd.f32 %v12176_v33, %v12147_v54 }
 0x920   : > { %v12186_v51 = vpop.f32.mrb[142].mxu0  ;;  %v9349_v62 = vpop.eup %9348  ;;  %9368 = vrcp.f32 %v6859_v39  ;;  %v6860_v5 = vadd.f32 1.0, %v9347_v4  ;;  %v8091_v42 = vmul.f32 -1.442695, %v6249_v7 }
 0x921   : > { %v12189_v10 = vpop.f32.mrb[206].mxu1  ;;  %v12191_v27 = vpop.f32.mrb[143].mxu0  ;;  %9370 = vrcp.f32 %v6858_v57  ;;  %v6864_v26 = vadd.f32 1.0, %v9349_v62  ;;  %v6140_v7 = vadd.f32 %v12186_v51, %v12139_v56 }
 0x922   : > { %v9351_v9 = vpop.eup %9350  ;;  %v12194_v29 = vpop.f32.mrb[207].mxu1  ;;  %9372 = vrcp.f32 %v6860_v5 }
 0x923   : > { %v9353_v40 = vpop.eup %9352  ;;  %7179 = vst [vmem:[%s12181_s20] sm:$0xff] %v9351_v9  ;;  %9374 = vrcp.f32 %v6864_v26 }
 0x924   : > { %v9355_v24 = vpop.eup %9354  ;;  %7181 = vst [vmem:[%s12181_s20 + $0x10] sm:$0xff] %v9353_v40  ;;  %9376 = vpow2.f32 %v8070_v55  ;;  %v12206_v60 = vpop.f32.mrb[144].mxu0 }
 0x925   : > { %v9357_v52 = vpop.eup %9356  ;;  %7180 = vst [vmem:[%s12181_s20 + $0x8] sm:$0xff] %v9355_v24  ;;  %9378 = vpow2.f32 %v8069_v44  ;;  %v12208_v45 = vpop.f32.mrb[208].mxu1 }
 0x926   : > { %v9359_v18 = vpop.eup %9358  ;;  %7182 = vst [vmem:[%s12181_s20 + $0x18] sm:$0xff] %v9357_v52  ;;  %9380 = vpow2.f32 %v8071_v46  ;;  %v12213_v20 = vpop.f32.mrb[145].mxu0  ;;  %v6251_v52 = vadd.f32 %v12184_v50, %v12151_v23 }
 0x927   : > { %v9361_v6 = vpop.eup %9360  ;;  %7186 = vst [vmem:[%s12181_s20 + $0x38] sm:$0xff] %v9359_v18  ;;  %v12215_v30 = vpop.f32.mrb[209].mxu1  ;;  %9382 = vpow2.f32 %v8075_v31 }
 0x928   : > { %v9363_v19 = vpop.eup %9362  ;;  %7188 = vst [vmem:[%s12181_s20 + $0x48] sm:$0xff] %v9361_v6  ;;  %v12219_v3 = vpop.f32.mrb[146].mxu0  ;;  %9384 = vpow2.f32 %v8077_v1 }
 0x929   : > { %v12221_v35 = vpop.f32.mrb[210].mxu1  ;;  %v9365_v63 = vpop.eup %9364  ;;  %7187 = vst [vmem:[%s12181_s20 + $0x40] sm:$0xff] %v9363_v19  ;;  %9386 = vpow2.f32 %v8076_v59 }
 0x92a   : > { %v12225_v12 = vpop.f32.mrb[147].mxu0  ;;  %v6264_v47 = vpop.f32.mrb[211].mxu1  ;;  %7189 = vst [vmem:[%s12181_s20 + $0x50] sm:$0xff] %v9365_v63  ;;  %9388 = vpow2.f32 %v8078_v58 }
 0x92b   : > { %v9367_v25 = vpop.eup %9366  ;;  %v12230_v14 = vadd.f32 %v6264_v47, %v12151_v23  ;;  %9390 = vpow2.f32 %v8082_v22  ;;  %v8090_v22 = vmul.f32 -1.442695, %v6138_v48 }
 0x92c   : > { %v9369_v8 = vpop.eup %9368  ;;  %7193 = vst [vmem:[%s12181_s20 + $0x70] sm:$0xff] %v9367_v25  ;;  %9392 = vpow2.f32 %v8084_v2  ;;  %v6155_v43 = vpop.f32.mrb[148].mxu0  ;;  %v12264_v2 = vmul.f32 -1.442695, %v6251_v52 }
 0x92d   : > { %v9371_v38 = vpop.eup %9370  ;;  %7195 = vst [vmem:[%s12181_s20 + $0x80] sm:$0xff] %v9369_v8  ;;  %9394 = vpow2.f32 %v8083_v17  ;;  %v6268_v0 = vpop.f32.mrb[212].mxu1  ;;  %v12237_v57 = vadd.f32 %v6155_v43, %v12139_v56  ;;  %v6253_v8 = vadd.f32 %v12189_v10, %v12143_v41  ;;  %v6142_v10 = vadd.f32 %v12191_v27, %v12147_v54 }
 0x92e   : > { %v9373_v16 = vpop.eup %9372  ;;  %7194 = vst [vmem:[%s12181_s20 + $0x78] sm:$0xff] %v9371_v38  ;;  %9396 = vpow2.f32 %v8085_v15  ;;  %v12240_v53 = vadd.f32 %v6268_v0, %v12143_v41  ;;  %v6157_v62 = vpop.f32.mrb[149].mxu0  ;;  %v6146_v27 = vadd.f32 %v12206_v60, %v12139_v56  ;;  %v6259_v60 = vadd.f32 %v12208_v45, %v12143_v41 }
 0x92f   : > { %v9375_v39 = vpop.eup %9374  ;;  %7196 = vst [vmem:[%s12181_s20 + $0x88] sm:$0xff] %v9373_v16  ;;  %v6270_v5 = vpop.f32.mrb[213].mxu1  ;;  %9398 = vpow2.f32 %v8089_v36  ;;  %v12243_v9 = vadd.f32 %v6157_v62, %v12147_v54  ;;  %v6261_v45 = vadd.f32 %v12215_v30, %v12151_v23 }
 0x930   : > { %v9377_v4 = vpop.eup %9376  ;;  %7200 = vst [vmem:[%s12181_s20 + $0xa8] sm:$0xff] %v9375_v39  ;;  %v12246_v26 = vadd.f32 %v6270_v5, %v12151_v23  ;;  %v6159_v44 = vpop.f32.mrb[150].mxu0  ;;  %9400 = vpow2.f32 %v8091_v42 }
 0x931   : > { %v9379_v55 = vpop.eup %9378  ;;  %v6866_v61 = vadd.f32 1.0, %v9377_v4  ;;  %v6272_v28 = vpop.f32.mrb[214].mxu1  ;;  %v12253_v59 = vadd.f32 %v6159_v44, %v12139_v56 }
 0x932   : > { %v9381_v40 = vpop.eup %9380  ;;  %v6865_v46 = vadd.f32 1.0, %v9379_v55  ;;  %v6161_v24 = vpop.f32.mrb[151].mxu0  ;;  %v12256_v37 = vadd.f32 %v6272_v28, %v12143_v41 }
 0x933   : > { %v9383_v31 = vpop.eup %9382  ;;  %9402 = vrcp.f32 %v6866_v61  ;;  %v6867_v49 = vadd.f32 1.0, %v9381_v40  ;;  %v6274_v1 = vpop.f32.mrb[215].mxu1  ;;  %v12259_v58 = vadd.f32 %v6161_v24, %v12147_v54  ;;  %v8096_v40 = vmul.f32 -1.442695, %v6140_v7 }
 0x934   : > { %v9385_v32 = vpop.eup %9384  ;;  %9404 = vrcp.f32 %v6865_v46  ;;  %v6871_v18 = vadd.f32 1.0, %v9383_v31  ;;  %v12262_v34 = vadd.f32 %v6274_v1, %v12151_v23  ;;  %v6165_v47 = vpop.f32.mrb[152].mxu0  ;;  %v6255_v46 = vadd.f32 %v12194_v29, %v12151_v23 }
 0x935   : > { %v9387_v6 = vpop.eup %9386  ;;  %9406 = vrcp.f32 %v6867_v49  ;;  %v6873_v33 = vadd.f32 1.0, %v9385_v32  ;;  %v12271_v15 = vadd.f32 %v6165_v47, %v12139_v56  ;;  %v6278_v38 = vpop.f32.mrb[216].mxu1 }
 0x936   : > { %v9389_v50 = vpop.eup %9388  ;;  %9408 = vrcp.f32 %v6871_v18  ;;  %v6872_v19 = vadd.f32 1.0, %v9387_v6  ;;  %v6167_v36 = vpop.f32.mrb[153].mxu0  ;;  %v12274_v39 = vadd.f32 %v6278_v38, %v12143_v41  ;;  %v8098_v6 = vmul.f32 -1.442695, %v6253_v8 }
 0x937   : > { %v9391_v21 = vpop.eup %9390  ;;  %9410 = vrcp.f32 %v6873_v33  ;;  %v6874_v63 = vadd.f32 1.0, %v9389_v50  ;;  %v12277_v51 = vadd.f32 %v6167_v36, %v12147_v54  ;;  %v6280_v43 = vpop.f32.mrb[217].mxu1 }
 0x938   : > { %v9393_v25 = vpop.eup %9392  ;;  %9412 = vrcp.f32 %v6872_v19  ;;  %v6878_v17 = vadd.f32 1.0, %v9391_v21  ;;  %v6169_v0 = vpop.f32.mrb[154].mxu0  ;;  %v12282_v5 = vadd.f32 %v6280_v43, %v12151_v23  ;;  %v8097_v19 = vmul.f32 -1.442695, %v6142_v10 }
 0x939   : > { %v9395_v16 = vpop.eup %9394  ;;  %9414 = vrcp.f32 %v6874_v63  ;;  %v6880_v42 = vadd.f32 1.0, %v9393_v25  ;;  %v6282_v55 = vpop.f32.mrb[218].mxu1  ;;  %v12289_v49 = vadd.f32 %v6169_v0, %v12139_v56  ;;  %v8099_v21 = vmul.f32 -1.442695, %v6255_v46 }
 0x93a   : > { %v9397_v4 = vpop.eup %9396  ;;  %9416 = vrcp.f32 %v6878_v17  ;;  %v6879_v62 = vadd.f32 1.0, %v9395_v16  ;;  %v6171_v61 = vpop.f32.mrb[155].mxu0  ;;  %v12292_v32 = vadd.f32 %v6282_v55, %v12143_v41  ;;  %v6148_v63 = vadd.f32 %v12213_v20, %v12147_v54 }
 0x93b   : > { %v9399_v44 = vpop.eup %9398  ;;  %9418 = vrcp.f32 %v6880_v42  ;;  %v6881_v28 = vadd.f32 1.0, %v9397_v4  ;;  %v6284_v48 = vpop.f32.mrb[219].mxu1  ;;  %v12295_v18 = vadd.f32 %v6171_v61, %v12147_v54  ;;  %v8103_v20 = vmul.f32 -1.442695, %v6146_v27 }
 0x93c   : > { %v9401_v24 = vpop.eup %9400  ;;  %9420 = vrcp.f32 %v6879_v62  ;;  %v6885_v31 = vadd.f32 1.0, %v9399_v44  ;;  %v12301_v33 = vadd.f32 %v6284_v48, %v12151_v23  ;;  %v6175_v7 = vpop.f32.mrb[156].mxu0  ;;  %v8105_v4 = vmul.f32 -1.442695, %v6259_v60 }
 0x93d   : > { %v9403_v52 = vpop.eup %9402  ;;  %9422 = vrcp.f32 %v6881_v28  ;;  %v6887_v1 = vadd.f32 1.0, %v9401_v24  ;;  %v6288_v47 = vpop.f32.mrb[220].mxu1  ;;  %v12310_v17 = vadd.f32 %v6175_v7, %v12139_v56  ;;  %v6150_v62 = vadd.f32 %v12219_v3, %v12139_v56 }
 0x93e   : > { %v9405_v29 = vpop.eup %9404  ;;  %7202 = vst [vmem:[%s12181_s20 + $0xb8] sm:$0xff] %v9403_v52  ;;  %9424 = vrcp.f32 %v6885_v31  ;;  %v12313_v8 = vadd.f32 %v6288_v47, %v12143_v41  ;;  %v6177_v38 = vpop.f32.mrb[157].mxu0  ;;  %v8104_v44 = vmul.f32 -1.442695, %v6148_v63  ;;  %v6263_v28 = vadd.f32 %v12221_v35, %v12143_v41 }
 0x93f   : > { %v9407_v50 = vpop.eup %9406  ;;  %7201 = vst [vmem:[%s12181_s20 + $0xb0] sm:$0xff] %v9405_v29  ;;  %9426 = vrcp.f32 %v6887_v1  ;;  %v6290_v36 = vpop.f32.mrb[221].mxu1  ;;  %v12318_v42 = vadd.f32 %v6177_v38, %v12147_v54  ;;  %v8106_v35 = vmul.f32 -1.442695, %v6261_v45  ;;  %v8110_v31 = vmul.f32 -1.442695, %v6150_v62 }
 0x940   : > { %v9409_v25 = vpop.eup %9408  ;;  %7203 = vst [vmem:[%s12181_s20 + $0xc0] sm:$0xff] %v9407_v50  ;;  %9428 = vpow2.f32 %v8090_v22  ;;  %v12321_v22 = vadd.f32 %v6290_v36, %v12151_v23  ;;  %v6179_v30 = vpop.f32.mrb[158].mxu0 }
 0x941   : > { %v9411_v16 = vpop.eup %9410  ;;  %7207 = vst [vmem:[%s12181_s20 + $0xe0] sm:$0xff] %v9409_v25  ;;  %9430 = vpow2.f32 %v12264_v2  ;;  %v6292_v43 = vpop.f32.mrb[222].mxu1  ;;  %v12327_v10 = vadd.f32 %v6179_v30, %v12139_v56  ;;  %v6152_v56 = vadd.f32 %v12225_v12, %v12147_v54  ;;  %v8112_v12 = vmul.f32 -1.442695, %v6263_v28 }
 0x942   : > { %v9413_v0 = vpop.eup %9412  ;;  %7209 = vst [vmem:[%s12181_s20 + $0xf0] sm:$0xff] %v9411_v16  ;;  %9432 = vpow2.f32 %v8096_v40  ;;  %v6181_v2 = vpop.f32.mrb[159].mxu0  ;;  %v12333_v40 = vadd.f32 %v6292_v43, %v12143_v41 }
 0x943   : > { %v6294_v55 = vpop.f32.mrb[223].mxu1  ;;  %v9415_v61 = vpop.eup %9414  ;;  %7208 = vst [vmem:[%s12181_s20 + $0xe8] sm:$0xff] %v9413_v0  ;;  %9434 = vpow2.f32 %v8098_v6  ;;  %v12339_v3 = vadd.f32 %v6181_v2, %v12147_v54  ;;  %v8111_v1 = vmul.f32 -1.442695, %v6152_v56 }
 0x944   : > { %v9417_v46 = vpop.eup %9416  ;;  %7210 = vst [vmem:[%s12181_s20 + $0xf8] sm:$0xff] %v9415_v61  ;;  %9436 = vpow2.f32 %v8097_v19  ;;  %v12342_v48 = vadd.f32 %v6294_v55, %v12151_v23  ;;  %v12347_v54 = vpop.f32.mrb[160].mxu0 }
 0x945   : > { %v9419_v24 = vpop.eup %9418  ;;  %7214 = vst [vmem:[%s12181_s20 + $0x118] sm:$0xff] %v9417_v46  ;;  %9438 = vpow2.f32 %v8099_v21  ;;  %v8305_v52 = vpop.f32.mrb[224].mxu1 }
 0x946   : > { %v9421_v41 = vpop.eup %9420  ;;  %7216 = vst [vmem:[%s12181_s20 + $0x128] sm:$0xff] %v9419_v24  ;;  %9440 = vpow2.f32 %v8103_v20  ;;  %v12350_v29 = vpop.f32.mrb[161].mxu0 }
 0x947   : > { %v9423_v27 = vpop.eup %9422  ;;  %7215 = vst [vmem:[%s12181_s20 + $0x120] sm:$0xff] %v9421_v41  ;;  %9442 = vpow2.f32 %v8105_v4  ;;  %v8306_v6 = vpop.f32.mrb[225].mxu1 }
 0x948   : > { %v9425_v23 = vpop.eup %9424  ;;  %7217 = vst [vmem:[%s12181_s20 + $0x130] sm:$0xff] %v9423_v27  ;;  %9444 = vpow2.f32 %v8104_v44  ;;  %v12353_v50 = vadd.f32 %v8306_v6, %v8305_v52  ;;  %v12355_v19 = vpop.f32.mrb[162].mxu0 }
 0x949   : > { %v9427_v60 = vpop.eup %9426  ;;  %7221 = vst [vmem:[%s12181_s20 + $0x150] sm:$0xff] %v9425_v23  ;;  %9446 = vpow2.f32 %v8106_v35  ;;  %v8308_v21 = vpop.f32.mrb[226].mxu1 }
 0x94a   : > { %v9429_v63 = vpop.eup %9428  ;;  %7223 = vst [vmem:[%s12181_s20 + $0x160] sm:$0xff] %v9427_v60  ;;  %9448 = vpow2.f32 %v8110_v31  ;;  %v12358_v7 = vpop.f32.mrb[163].mxu0 }
 0x94b   : > { %v8309_v47 = vpop.f32.mrb[227].mxu1  ;;  %v9431_v25 = vpop.eup %9430  ;;  %v6886_v45 = vadd.f32 1.0, %v9429_v63  ;;  %9450 = vpow2.f32 %v8112_v12 }
 0x94c   : > { %v9433_v38 = vpop.eup %9432  ;;  %v6888_v36 = vadd.f32 1.0, %v9431_v25  ;;  %9452 = vpow2.f32 %v8111_v1  ;;  %v12360_v30 = vadd.f32 %v8309_v47, %v8308_v21  ;;  %v12362_v2 = vpop.f32.mrb[164].mxu0 }
 0x94d   : > { %v9435_v16 = vpop.eup %9434  ;;  %9454 = vrcp.f32 %v6886_v45  ;;  %v6892_v20 = vadd.f32 1.0, %v9433_v38  ;;  %v8311_v55 = vpop.f32.mrb[228].mxu1 }
 0x94e   : > { %v9437_v43 = vpop.eup %9436  ;;  %9456 = vrcp.f32 %v6888_v36  ;;  %v6894_v0 = vadd.f32 1.0, %v9435_v16  ;;  %v12364_v28 = vpop.f32.mrb[165].mxu0  ;;  %v8113_v36 = vmul.f32 -1.442695, %v12230_v14  ;;  %v8118_v14 = vmul.f32 -1.442695, %v12243_v9 }
 0x94f   : > { %v9439_v4 = vpop.eup %9438  ;;  %9458 = vrcp.f32 %v6892_v20  ;;  %v6893_v62 = vadd.f32 1.0, %v9437_v43  ;;  %v8312_v46 = vpop.f32.mrb[229].mxu1  ;;  %v8117_v43 = vmul.f32 -1.442695, %v12237_v57  ;;  %v8124_v9 = vmul.f32 -1.442695, %v12253_v59 }
 0x950   : > { %v9441_v61 = vpop.eup %9440  ;;  %9460 = vrcp.f32 %v6894_v0  ;;  %v6895_v44 = vadd.f32 1.0, %v9439_v4  ;;  %v12366_v35 = vpop.f32.mrb[166].mxu0  ;;  %v12368_v12 = vadd.f32 %v8312_v46, %v8311_v55  ;;  %v8119_v55 = vmul.f32 -1.442695, %v12240_v53 }
 0x951   : > { %v9443_v56 = vpop.eup %9442  ;;  %9462 = vrcp.f32 %v6893_v62  ;;  %v6899_v24 = vadd.f32 1.0, %v9441_v61  ;;  %v8314_v41 = vpop.f32.mrb[230].mxu1  ;;  %v8120_v53 = vmul.f32 -1.442695, %v12246_v26  ;;  %v8125_v26 = vmul.f32 -1.442695, %v12259_v58 }
 0x952   : > { %v9445_v31 = vpop.eup %9444  ;;  %9464 = vrcp.f32 %v6895_v44  ;;  %v6901_v27 = vadd.f32 1.0, %v9443_v56  ;;  %v12370_v52 = vpop.f32.mrb[167].mxu0  ;;  %v8133_v58 = vmul.f32 -1.442695, %v12274_v39  ;;  %v8134_v39 = vmul.f32 -1.442695, %v12282_v5 }
 0x953   : > { %v8315_v23 = vpop.f32.mrb[231].mxu1  ;;  %v9447_v1 = vpop.eup %9446  ;;  %9466 = vrcp.f32 %v6899_v24  ;;  %v6900_v6 = vadd.f32 1.0, %v9445_v31 }
 0x954   : > { %v9449_v60 = vpop.eup %9448  ;;  %9468 = vrcp.f32 %v6901_v27  ;;  %v6902_v21 = vadd.f32 1.0, %v9447_v1  ;;  %v12372_v25 = vadd.f32 %v8315_v23, %v8314_v41  ;;  %v12376_v0 = vpop.f32.mrb[168].mxu0 }
 0x955   : > { %v9451_v63 = vpop.eup %9450  ;;  %9470 = vrcp.f32 %v6900_v6  ;;  %v6906_v47 = vadd.f32 1.0, %v9449_v60  ;;  %v8317_v4 = vpop.f32.mrb[232].mxu1  ;;  %v8126_v6 = vmul.f32 -1.442695, %v12256_v37 }
 0x956   : > { %v9453_v45 = vpop.eup %9452  ;;  %9472 = vrcp.f32 %v6902_v21  ;;  %v6908_v38 = vadd.f32 1.0, %v9451_v63  ;;  %v12380_v61 = vpop.f32.mrb[169].mxu0 }
 0x957   : > { %v9455_v16 = vpop.eup %9454  ;;  %9474 = vrcp.f32 %v6906_v47  ;;  %v6907_v20 = vadd.f32 1.0, %v9453_v45  ;;  %v8318_v44 = vpop.f32.mrb[233].mxu1  ;;  %v8127_v47 = vmul.f32 -1.442695, %v12262_v34  ;;  %v8131_v45 = vmul.f32 -1.442695, %v12271_v15 }
 0x958   : > { %v9457_v62 = vpop.eup %9456  ;;  %7222 = vst [vmem:[%s12181_s20 + $0x158] sm:$0xff] %v9455_v16  ;;  %9476 = vrcp.f32 %v6908_v38  ;;  %v12384_v57 = vadd.f32 %v8318_v44, %v8317_v4  ;;  %v12386_v56 = vpop.f32.mrb[170].mxu0  ;;  %v8132_v34 = vmul.f32 -1.442695, %v12277_v51  ;;  %v5478_v51 = vsub.s32 4, %v10399_v11 }
 0x959   : > { %v9459_v46 = vpop.eup %9458  ;;  %7224 = vst [vmem:[%s12181_s20 + $0x168] sm:$0xff] %v9457_v62  ;;  %9478 = vrcp.f32 %v6907_v20  ;;  %v8320_v24 = vpop.f32.mrb[234].mxu1 }
 0x95a   : > { %v9461_v41 = vpop.eup %9460  ;;  %7228 = vst [vmem:[%s12181_s20 + $0x188] sm:$0xff] %v9459_v46  ;;  %9480 = vpow2.f32 %v8113_v36  ;;  %v12390_v31 = vpop.f32.mrb[171].mxu0 }
 0x95b   : > { %v8321_v27 = vpop.f32.mrb[235].mxu1  ;;  %v9463_v23 = vpop.eup %9462  ;;  %7230 = vst [vmem:[%s12181_s20 + $0x198] sm:$0xff] %v9461_v41  ;;  %9482 = vpow2.f32 %v8117_v43 }
 0x95c   : > { %v9465_v1 = vpop.eup %9464  ;;  %7229 = vst [vmem:[%s12181_s20 + $0x190] sm:$0xff] %v9463_v23  ;;  %9484 = vpow2.f32 %v8119_v55  ;;  %v12396_v60 = vadd.f32 %v8321_v27, %v8320_v24  ;;  %v12404_v37 = vpop.f32.mrb[172].mxu0 }
 0x95d   : > { %v9467_v21 = vpop.eup %9466  ;;  %7231 = vst [vmem:[%s12181_s20 + $0x1a0] sm:$0xff] %v9465_v1  ;;  %9486 = vpow2.f32 %v8118_v14  ;;  %v8323_v38 = vpop.f32.mrb[236].mxu1 }
 0x95e   : > { %v9469_v63 = vpop.eup %9468  ;;  %7235 = vst [vmem:[%s12181_s20 + $0x1c0] sm:$0xff] %v9467_v21  ;;  %9488 = vpow2.f32 %v8120_v53  ;;  %v12408_v16 = vpop.f32.mrb[173].mxu0 }
 0x95f   : > { %v9471_v59 = vpop.eup %9470  ;;  %7237 = vst [vmem:[%s12181_s20 + $0x1d0] sm:$0xff] %v9469_v63  ;;  %9490 = vpow2.f32 %v8124_v9  ;;  %v8324_v20 = vpop.f32.mrb[237].mxu1 }
 0x960   : > { %v9473_v36 = vpop.eup %9472  ;;  %7236 = vst [vmem:[%s12181_s20 + $0x1c8] sm:$0xff] %v9471_v59  ;;  %9492 = vpow2.f32 %v8126_v6  ;;  %v12412_v15 = vadd.f32 %v8324_v20, %v8323_v38  ;;  %v12414_v4 = vpop.f32.mrb[174].mxu0 }
 0x961   : > { %v9475_v43 = vpop.eup %9474  ;;  %7238 = vst [vmem:[%s12181_s20 + $0x1d8] sm:$0xff] %v9473_v36  ;;  %9494 = vpow2.f32 %v8125_v26  ;;  %v8326_v62 = vpop.f32.mrb[238].mxu1 }
 0x962   : > { %v9477_v55 = vpop.eup %9476  ;;  %7242 = vst [vmem:[%s12181_s20 + $0x1f8] sm:$0xff] %v9475_v43  ;;  %9496 = vpow2.f32 %v8127_v47  ;;  %v12418_v44 = vpop.f32.mrb[175].mxu0  ;;  %v12428_v47 = vrot.slane %v12135_v13, %v5478_v51 }
 0x963   : > { %v8327_v46 = vpop.f32.mrb[239].mxu1  ;;  %v9479_v14 = vpop.eup %9478  ;;  %7244 = vst [vmem:[%s12181_s20 + $0x208] sm:$0xff] %v9477_v55  ;;  %9498 = vpow2.f32 %v8131_v45 }
 0x964   : > { %v9481_v24 = vpop.eup %9480  ;;  %7243 = vst [vmem:[%s12181_s20 + $0x200] sm:$0xff] %v9479_v14  ;;  %9500 = vpow2.f32 %v8133_v58  ;;  %v12423_v41 = vadd.f32 %v8327_v46, %v8326_v62  ;;  %v12425_v6 = vpop.f32.mrb[176].mxu0 }
 0x965   : > { %v9483_v53 = vpop.eup %9482  ;;  %v6909_v27 = vadd.f32 1.0, %v9481_v24  ;;  %9502 = vpow2.f32 %v8132_v34  ;;  %v8329_v21 = vpop.f32.mrb[240].mxu1 }
 0x966   : > { %v9485_v23 = vpop.eup %9484  ;;  %v6913_v9 = vadd.f32 1.0, %v9483_v53  ;;  %9504 = vpow2.f32 %v8134_v39  ;;  %v12430_v59 = vpop.f32.mrb[177].mxu0 }
 0x967   : > { %v9487_v5 = vpop.eup %9486  ;;  %9506 = vrcp.f32 %v6909_v27  ;;  %v6915_v1 = vadd.f32 1.0, %v9485_v23  ;;  %v8330_v45 = vpop.f32.mrb[241].mxu1 }
 0x968   : > { %v9489_v26 = vpop.eup %9488  ;;  %9508 = vrcp.f32 %v6913_v9  ;;  %v6914_v63 = vadd.f32 1.0, %v9487_v5  ;;  %v12432_v58 = vadd.f32 %v8330_v45, %v8329_v21  ;;  %v6375_v20 = vpop.f32.mrb[178].mxu0 }
 0x969   : > { %v9491_v38 = vpop.eup %9490  ;;  %9510 = vrcp.f32 %v6915_v1  ;;  %v6916_v36 = vadd.f32 1.0, %v9489_v26  ;;  %v8332_v43 = vpop.f32.mrb[242].mxu1  ;;  %v12435_v55 = vadd.f32 %v6375_v20, %v12428_v47 }
 0x96a   : > { %v9493_v34 = vpop.eup %9492  ;;  %9512 = vrcp.f32 %v6914_v63  ;;  %v6920_v62 = vadd.f32 1.0, %v9491_v38  ;;  %v12437_v39 = vpop.f32.mrb[179].mxu0 }
 0x96b   : > { %v8333_v13 = vpop.f32.mrb[243].mxu1  ;;  %v9495_v46 = vpop.eup %9494  ;;  %9514 = vrcp.f32 %v6916_v36  ;;  %v6922_v14 = vadd.f32 1.0, %v9493_v34  ;;  %v8138_v36 = vmul.f32 -1.442695, %v12289_v49  ;;  %v8139_v49 = vmul.f32 -1.442695, %v12295_v18 }
 0x96c   : > { %v9497_v24 = vpop.eup %9496  ;;  %9516 = vrcp.f32 %v6920_v62  ;;  %v6921_v51 = vadd.f32 1.0, %v9495_v46  ;;  %v12439_v23 = vadd.f32 %v8333_v13, %v8332_v43  ;;  %v6381_v26 = vpop.f32.mrb[180].mxu0  ;;  %v8140_v46 = vmul.f32 -1.442695, %v12292_v32 }
 0x96d   : > { %v9499_v53 = vpop.eup %9498  ;;  %9518 = vrcp.f32 %v6922_v14  ;;  %v6923_v27 = vadd.f32 1.0, %v9497_v24  ;;  %v8335_v63 = vpop.f32.mrb[244].mxu1  ;;  %v12443_v20 = vadd.f32 %v6381_v26, %v12428_v47  ;;  %v8141_v32 = vmul.f32 -1.442695, %v12301_v33 }
 0x96e   : > { %v9501_v9 = vpop.eup %9500  ;;  %9520 = vrcp.f32 %v6921_v51  ;;  %v6927_v5 = vadd.f32 1.0, %v9499_v53  ;;  %v12445_v34 = vpop.f32.mrb[181].mxu0  ;;  %v8145_v18 = vmul.f32 -1.442695, %v12310_v17  ;;  %v8146_v33 = vmul.f32 -1.442695, %v12318_v42 }
 0x96f   : > { %v9503_v1 = vpop.eup %9502  ;;  %9522 = vrcp.f32 %v6923_v27  ;;  %v6929_v21 = vadd.f32 1.0, %v9501_v9  ;;  %v8336_v43 = vpop.f32.mrb[245].mxu1  ;;  %v5486_v17 = vsub.s32 6, %v10399_v11 }
 0x970   : > { %v9505_v45 = vpop.eup %9504  ;;  %9524 = vrcp.f32 %v6927_v5  ;;  %v6928_v38 = vadd.f32 1.0, %v9503_v1  ;;  %v6385_v14 = vpop.f32.mrb[182].mxu0  ;;  %v12450_v53 = vadd.f32 %v8336_v43, %v8335_v63 }
 0x971   : > { %v9507_v62 = vpop.eup %9506  ;;  %9526 = vrcp.f32 %v6929_v21  ;;  %v6930_v13 = vadd.f32 1.0, %v9505_v45  ;;  %v8338_v24 = vpop.f32.mrb[246].mxu1  ;;  %v12453_v27 = vadd.f32 %v6385_v14, %v12428_v47  ;;  %v8147_v45 = vmul.f32 -1.442695, %v12313_v8 }
 0x972   : > { %v9509_v51 = vpop.eup %9508  ;;  %7245 = vst [vmem:[%s12181_s20 + $0x210] sm:$0xff] %v9507_v62  ;;  %9528 = vrcp.f32 %v6928_v38  ;;  %v12455_v9 = vpop.f32.mrb[183].mxu0  ;;  %v5482_v38 = vsub.s32 5, %v10399_v11  ;;  %v8152_v8 = vmul.f32 -1.442695, %v12327_v10 }
 0x973   : > { %v8339_v5 = vpop.f32.mrb[247].mxu1  ;;  %v9511_v1 = vpop.eup %9510  ;;  %7249 = vst [vmem:[%s12181_s20 + $0x230] sm:$0xff] %v9509_v51  ;;  %9530 = vrcp.f32 %v6930_v13  ;;  %v8154_v11 = vmul.f32 -1.442695, %v12333_v40 }
 0x974   : > { %v12459_v21 = vadd.f32 %v8339_v5, %v8338_v24  ;;  %v9513_v26 = vpop.eup %9512  ;;  %7251 = vst [vmem:[%s12181_s20 + $0x240] sm:$0xff] %v9511_v1  ;;  %9532 = vpow2.f32 %v8138_v36  ;;  %v8148_v36 = vmul.f32 -1.442695, %v12321_v22  ;;  %v6391_v13 = vpop.f32.mrb[184].mxu0  ;;  %v6332_v24 = vadd.f32 %v12347_v54, %v12428_v47  ;;  %v9772_v5 = vld [vmem:[%s12686_s17] sm:$0xff] }
 0x975   : > { %v9515_v63 = vpop.eup %9514  ;;  %7250 = vst [vmem:[%s12181_s20 + $0x238] sm:$0xff] %v9513_v26  ;;  %9534 = vpow2.f32 %v8140_v46  ;;  %v8341_v14 = vpop.f32.mrb[248].mxu1  ;;  %v12476_v42 = vadd.f32 %v6391_v13, %v12428_v47  ;;  %v12485_v10 = vrot.slane %v9772_v5, %v5482_v38  ;;  %v8155_v38 = vmul.f32 -1.442695, %v12342_v48 }
 0x976   : > { %v9517_v43 = vpop.eup %9516  ;;  %7252 = vst [vmem:[%s12181_s20 + $0x248] sm:$0xff] %v9515_v63  ;;  %9536 = vpow2.f32 %v8139_v49  ;;  %v12478_v51 = vpop.f32.mrb[185].mxu0 }
 0x977   : > { %v9519_v62 = vpop.eup %9518  ;;  %7256 = vst [vmem:[%s12181_s20 + $0x268] sm:$0xff] %v9517_v43  ;;  %9538 = vpow2.f32 %v8141_v32  ;;  %v8342_v49 = vpop.f32.mrb[249].mxu1 }
 0x978   : > { %v9521_v46 = vpop.eup %9520  ;;  %7258 = vst [vmem:[%s12181_s20 + $0x278] sm:$0xff] %v9519_v62  ;;  %9540 = vpow2.f32 %v8145_v18  ;;  %v12487_v1 = vadd.f32 %v8342_v49, %v8341_v14  ;;  %v6395_v54 = vpop.f32.mrb[186].mxu0  ;;  %v8153_v18 = vmul.f32 -1.442695, %v12339_v3  ;;  %v12500_v3 = vrot.slane %v9772_v5, %v5486_v17 }
 0x979   : > { %v9523_v22 = vpop.eup %9522  ;;  %7257 = vst [vmem:[%s12181_s20 + $0x270] sm:$0xff] %v9521_v46  ;;  %9542 = vpow2.f32 %v8147_v45  ;;  %v8344_v32 = vpop.f32.mrb[250].mxu1  ;;  %v12492_v63 = vadd.f32 %v6395_v54, %v12428_v47 }
 0x97a   : > { %v9525_v26 = vpop.eup %9524  ;;  %7259 = vst [vmem:[%s12181_s20 + $0x280] sm:$0xff] %v9523_v22  ;;  %9544 = vpow2.f32 %v8146_v33  ;;  %v6397_v40 = vpop.f32.mrb[187].mxu0  ;;  %v8051_v33 = vmul.f32 -1.442695, %v6332_v24 }
 0x97b   : > { %v8345_v45 = vpop.f32.mrb[251].mxu1  ;;  %v9527_v43 = vpop.eup %9526  ;;  %7263 = vst [vmem:[%s12181_s20 + $0x2a0] sm:$0xff] %v9525_v26  ;;  %9546 = vpow2.f32 %v8148_v36  ;;  %v12497_v62 = vadd.f32 %v6397_v40, %v12485_v10 }
 0x97c   : > { %v9529_v13 = vpop.eup %9528  ;;  %7265 = vst [vmem:[%s12181_s20 + $0x2b0] sm:$0xff] %v9527_v43  ;;  %9548 = vpow2.f32 %v8152_v8  ;;  %v8346_v14 = vadd.f32 %v8345_v45, %v8344_v32  ;;  %v6401_v54 = vpop.f32.mrb[188].mxu0 }
 0x97d   : > { %v9531_v46 = vpop.eup %9530  ;;  %7264 = vst [vmem:[%s12181_s20 + $0x2a8] sm:$0xff] %v9529_v13  ;;  %9550 = vpow2.f32 %v8154_v11  ;;  %v8347_v26 = vpop.f32.mrb[252].mxu1  ;;  %v12508_v17 = vadd.f32 %v6401_v54, %v12428_v47 }
 0x97e   : > { %v9533_v49 = vpop.eup %9532  ;;  %7266 = vst [vmem:[%s12181_s20 + $0x2b8] sm:$0xff] %v9531_v46  ;;  %9552 = vpow2.f32 %v8153_v18  ;;  %v12505_v36 = vadd.f32 %v8346_v14, %v12500_v3  ;;  %v6403_v24 = vpop.f32.mrb[189].mxu0 }
 0x97f   : > { %v9535_v48 = vpop.eup %9534  ;;  %v6934_v22 = vadd.f32 1.0, %v9533_v49  ;;  %9554 = vpow2.f32 %v8155_v38  ;;  %v8348_v5 = vpop.f32.mrb[253].mxu1  ;;  %v12511_v18 = vadd.f32 %v6403_v24, %v12485_v10 }
 0x980   : > { %v9537_v40 = vpop.eup %9536  ;;  %v6936_v8 = vadd.f32 1.0, %v9535_v48  ;;  %9556 = vpow2.f32 %v8051_v33  ;;  %v8349_v45 = vadd.f32 %v8348_v5, %v8347_v26  ;;  %v6405_v43 = vpop.f32.mrb[190].mxu0 }
 0x981   : > { %v9539_v11 = vpop.eup %9538  ;;  %9558 = vrcp.f32 %v6934_v22  ;;  %v6935_v32 = vadd.f32 1.0, %v9537_v40  ;;  %v8350_v13 = vpop.f32.mrb[254].mxu1  ;;  %v12514_v46 = vadd.f32 %v6405_v43, %v12428_v47 }
 0x982   : > { %v9541_v38 = vpop.eup %9540  ;;  %9560 = vrcp.f32 %v6936_v8  ;;  %v6937_v14 = vadd.f32 1.0, %v9539_v11  ;;  %v6407_v33 = vpop.f32.mrb[191].mxu0  ;;  %v12517_v22 = vadd.f32 %v8349_v45, %v12500_v3 }
 0x983   : > { %12698 = vst [vmem:[#allocation2_spill] sm:$0xff] %v12514_v46  ;;  %v8351_v49 = vpop.f32.mrb[255].mxu1  ;;  %v9543_v48 = vpop.eup %9542  ;;  %9562 = vrcp.f32 %v6935_v32  ;;  %v6941_v54 = vadd.f32 1.0, %v9541_v38  ;;  %v12520_v26 = vadd.f32 %v6407_v33, %v12485_v10  ;;  %v6334_v32 = vadd.f32 %v12350_v29, %v12485_v10 }
 0x984   : > { %v9545_v40 = vpop.eup %9544  ;;  %9564 = vrcp.f32 %v6937_v14  ;;  %v6943_v24 = vadd.f32 1.0, %v9543_v48  ;;  %v8352_v11 = vadd.f32 %v8351_v49, %v8350_v13  ;;  %v6445_v14 = vadd.f32 %v12353_v50, %v12500_v3 }
 0x985   : > { %v9547_v5 = vpop.eup %9546  ;;  %9566 = vrcp.f32 %v6941_v54  ;;  %v6942_v8 = vadd.f32 1.0, %v9545_v40  ;;  %v6336_v13 = vadd.f32 %v12355_v19, %v12428_v47  ;;  %v6338_v29 = vadd.f32 %v12358_v7, %v12485_v10 }
 0x986   : > { %v9549_v43 = vpop.eup %9548  ;;  %9568 = vrcp.f32 %v6943_v24  ;;  %v6944_v46 = vadd.f32 1.0, %v9547_v5  ;;  %v12527_v48 = vadd.f32 %v8352_v11, %v12500_v3  ;;  %v8052_v5 = vmul.f32 -1.442695, %v6334_v32 }
 0x987   : > { %v9551_v38 = vpop.eup %9550  ;;  %9570 = vrcp.f32 %v6942_v8  ;;  %v6948_v45 = vadd.f32 1.0, %v9549_v43  ;;  %v6448_v8 = vadd.f32 %v12360_v30, %v12500_v3  ;;  %v8053_v19 = vmul.f32 -1.442695, %v6445_v14 }
 0x988   : > { %v9553_v33 = vpop.eup %9552  ;;  %9572 = vrcp.f32 %v6944_v46  ;;  %v6950_v54 = vadd.f32 1.0, %v9551_v38  ;;  %v6342_v43 = vadd.f32 %v12362_v2, %v12428_v47  ;;  %v8058_v7 = vmul.f32 -1.442695, %v6336_v13 }
 0x989   : > { %v9555_v49 = vpop.eup %9554  ;;  %9574 = vrcp.f32 %v6948_v45  ;;  %v6949_v40 = vadd.f32 1.0, %v9553_v33  ;;  %v6344_v45 = vadd.f32 %v12364_v28, %v12485_v10  ;;  %v8059_v30 = vmul.f32 -1.442695, %v6338_v29 }
 0x98a   : > { %v9557_v24 = vpop.eup %9556  ;;  %9576 = vrcp.f32 %v6950_v54  ;;  %v6951_v50 = vadd.f32 1.0, %v9555_v49  ;;  %v6453_v33 = vadd.f32 %v12368_v12, %v12500_v3  ;;  %v8060_v2 = vmul.f32 -1.442695, %v6448_v8 }
 0x98b   : > { %v9559_v46 = vpop.eup %9558  ;;  %9578 = vrcp.f32 %v6949_v40  ;;  %v6847_v11 = vadd.f32 1.0, %v9557_v24  ;;  %v6346_v54 = vadd.f32 %v12366_v35, %v12428_v47  ;;  %v8065_v28 = vmul.f32 -1.442695, %v6342_v43 }
 0x98c   : > { %v9561_v38 = vpop.eup %9560  ;;  %7270 = vst [vmem:[%s12181_s20 + $0x2d8] sm:$0xff] %v9559_v46  ;;  %9580 = vrcp.f32 %v6951_v50  ;;  %v6348_v49 = vadd.f32 %v12370_v52, %v12485_v10  ;;  %v8066_v12 = vmul.f32 -1.442695, %v6344_v45  ;;  %v6456_v29 = vadd.f32 %v12372_v25, %v12500_v3 }
 0x98d   : > { %v9563_v32 = vpop.eup %9562  ;;  %7272 = vst [vmem:[%s12181_s20 + $0x2e8] sm:$0xff] %v9561_v38  ;;  %9582 = vrcp.f32 %v6847_v11  ;;  %v8067_v35 = vmul.f32 -1.442695, %v6453_v33  ;;  %v6352_v50 = vadd.f32 %v12376_v0, %v12428_v47  ;;  %v8072_v52 = vmul.f32 -1.442695, %v6346_v54 }
 0x98e   : > { %v9565_v14 = vpop.eup %9564  ;;  %7271 = vst [vmem:[%s12181_s20 + $0x2e0] sm:$0xff] %v9563_v32  ;;  %9584 = vpow2.f32 %v8052_v5  ;;  %v6354_v8 = vadd.f32 %v12380_v61, %v12485_v10  ;;  %v8073_v25 = vmul.f32 -1.442695, %v6348_v49 }
 0x98f   : > { %v9567_v13 = vpop.eup %9566  ;;  %7273 = vst [vmem:[%s12181_s20 + $0x2f0] sm:$0xff] %v9565_v14  ;;  %9586 = vpow2.f32 %v8053_v19  ;;  %v8074_v19 = vmul.f32 -1.442695, %v6456_v29  ;;  %v8079_v0 = vmul.f32 -1.442695, %v6352_v50 }
 0x990   : > { %v9569_v40 = vpop.eup %9568  ;;  %7277 = vst [vmem:[%s12181_s20 + $0x310] sm:$0xff] %v9567_v13  ;;  %9588 = vpow2.f32 %v8058_v7  ;;  %v8080_v7 = vmul.f32 -1.442695, %v6354_v8 }
 0x991   : > { %v9571_v24 = vpop.eup %9570  ;;  %7279 = vst [vmem:[%s12181_s20 + $0x320] sm:$0xff] %v9569_v40  ;;  %9590 = vpow2.f32 %v8059_v30 }
 0x992   : > { %v9573_v5 = vpop.eup %9572  ;;  %7278 = vst [vmem:[%s12181_s20 + $0x318] sm:$0xff] %v9571_v24  ;;  %9592 = vpow2.f32 %v8060_v2 }
 0x993   : > { %v9575_v46 = vpop.eup %9574  ;;  %7280 = vst [vmem:[%s12181_s20 + $0x328] sm:$0xff] %v9573_v5  ;;  %9594 = vpow2.f32 %v8065_v28 }
 0x994   : > { %v9577_v11 = vpop.eup %9576  ;;  %7284 = vst [vmem:[%s12181_s20 + $0x348] sm:$0xff] %v9575_v46  ;;  %9596 = vpow2.f32 %v8066_v12 }
 0x995   : > { %v9579_v43 = vpop.eup %9578  ;;  %7286 = vst [vmem:[%s12181_s20 + $0x358] sm:$0xff] %v9577_v11  ;;  %9598 = vpow2.f32 %v8067_v35 }
 0x996   : > { %v9581_v38 = vpop.eup %9580  ;;  %7285 = vst [vmem:[%s12181_s20 + $0x350] sm:$0xff] %v9579_v43  ;;  %9600 = vpow2.f32 %v8072_v52  ;;  %v6461_v52 = vadd.f32 %v12384_v57, %v12500_v3  ;;  %v6358_v43 = vadd.f32 %v12390_v31, %v12485_v10 }
 0x997   : > { %v9583_v45 = vpop.eup %9582  ;;  %7287 = vst [vmem:[%s12181_s20 + $0x360] sm:$0xff] %v9581_v38  ;;  %9602 = vpow2.f32 %v8073_v25  ;;  %v6356_v25 = vadd.f32 %v12386_v56, %v12428_v47  ;;  %v6362_v56 = vadd.f32 %v12404_v37, %v12428_v47 }
 0x998   : > { %v9585_v61 = vpop.eup %9584  ;;  %7183 = vst [vmem:[%s12181_s20 + $0x20] sm:$0xff] %v9583_v45  ;;  %9604 = vpow2.f32 %v8074_v19 }
 0x999   : > { %v9587_v32 = vpop.eup %9586  ;;  %v6848_v30 = vadd.f32 1.0, %v9585_v61  ;;  %9606 = vpow2.f32 %v8079_v0  ;;  %v8081_v61 = vmul.f32 -1.442695, %v6461_v52  ;;  %v8086_v31 = vmul.f32 -1.442695, %v6356_v25 }
 0x99a   : > { %v9589_v33 = vpop.eup %9588  ;;  %v6849_v14 = vadd.f32 1.0, %v9587_v32  ;;  %9608 = vpow2.f32 %v8080_v7  ;;  %v6464_v7 = vadd.f32 %v12396_v60, %v12500_v3  ;;  %v8087_v60 = vmul.f32 -1.442695, %v6358_v43 }
 0x99b   : > { %v9591_v2 = vpop.eup %9590  ;;  %9610 = vrcp.f32 %v6848_v30  ;;  %v6854_v54 = vadd.f32 1.0, %v9589_v33  ;;  %v6364_v33 = vadd.f32 %v12408_v16, %v12485_v10  ;;  %v8093_v16 = vmul.f32 -1.442695, %v6362_v56 }
 0x99c   : > { %v9593_v13 = vpop.eup %9592  ;;  %9612 = vrcp.f32 %v6849_v14  ;;  %v6855_v28 = vadd.f32 1.0, %v9591_v2  ;;  %v6469_v2 = vadd.f32 %v12412_v15, %v12500_v3  ;;  %v8088_v37 = vmul.f32 -1.442695, %v6464_v7 }
 0x99d   : > { %v9595_v49 = vpop.eup %9594  ;;  %9614 = vrcp.f32 %v6854_v54  ;;  %v6856_v40 = vadd.f32 1.0, %v9593_v13  ;;  %v6366_v13 = vadd.f32 %v12414_v4, %v12428_v47  ;;  %v8094_v15 = vmul.f32 -1.442695, %v6364_v33 }
 0x99e   : > { %v9597_v12 = vpop.eup %9596  ;;  %9616 = vrcp.f32 %v6855_v28  ;;  %v6861_v29 = vadd.f32 1.0, %v9595_v49  ;;  %v6368_v49 = vadd.f32 %v12418_v44, %v12485_v10  ;;  %v8095_v4 = vmul.f32 -1.442695, %v6469_v2 }
 0x99f   : > { %v9599_v24 = vpop.eup %9598  ;;  %9618 = vrcp.f32 %v6856_v40  ;;  %v6862_v35 = vadd.f32 1.0, %v9597_v12  ;;  %v6472_v12 = vadd.f32 %v12423_v41, %v12500_v3  ;;  %v8100_v44 = vmul.f32 -1.442695, %v6366_v13 }
 0x9a0   : > { %v9601_v50 = vpop.eup %9600  ;;  %9620 = vrcp.f32 %v6861_v29  ;;  %v6863_v5 = vadd.f32 1.0, %v9599_v24  ;;  %v6372_v24 = vadd.f32 %v12425_v6, %v12428_v47  ;;  %v8101_v41 = vmul.f32 -1.442695, %v6368_v49 }
 0x9a1   : > { %v9603_v8 = vpop.eup %9602  ;;  %9622 = vrcp.f32 %v6862_v35  ;;  %v6868_v46 = vadd.f32 1.0, %v9601_v50  ;;  %v6374_v50 = vadd.f32 %v12430_v59, %v12485_v10  ;;  %v6477_v52 = vadd.f32 %v12432_v58, %v12500_v3 }
 0x9a2   : > { %v9605_v11 = vpop.eup %9604  ;;  %9624 = vrcp.f32 %v6863_v5  ;;  %v6869_v19 = vadd.f32 1.0, %v9603_v8  ;;  %v8102_v6 = vmul.f32 -1.442695, %v6472_v12 }
 0x9a3   : > { %v9607_v0 = vpop.eup %9606  ;;  %9626 = vrcp.f32 %v6868_v46  ;;  %v6870_v38 = vadd.f32 1.0, %v9605_v11  ;;  %v8107_v46 = vmul.f32 -1.442695, %v6372_v24  ;;  %v8108_v59 = vmul.f32 -1.442695, %v6374_v50 }
 0x9a4   : > { %v9609_v57 = vpop.eup %9608  ;;  %9628 = vrcp.f32 %v6869_v19  ;;  %v6875_v45 = vadd.f32 1.0, %v9607_v0  ;;  %v8109_v19 = vmul.f32 -1.442695, %v6477_v52 }
 0x9a5   : > { %v9611_v32 = vpop.eup %9610  ;;  %9630 = vrcp.f32 %v6870_v38  ;;  %v6876_v30 = vadd.f32 1.0, %v9609_v57 }
 0x9a6   : > { %v9613_v14 = vpop.eup %9612  ;;  %7184 = vst [vmem:[%s12181_s20 + $0x28] sm:$0xff] %v9611_v32  ;;  %9632 = vrcp.f32 %v6875_v45 }
 0x9a7   : > { %v9615_v54 = vpop.eup %9614  ;;  %7185 = vst [vmem:[%s12181_s20 + $0x30] sm:$0xff] %v9613_v14  ;;  %9634 = vrcp.f32 %v6876_v30 }
 0x9a8   : > { %v9617_v28 = vpop.eup %9616  ;;  %7190 = vst [vmem:[%s12181_s20 + $0x58] sm:$0xff] %v9615_v54  ;;  %9636 = vpow2.f32 %v8081_v61 }
 0x9a9   : > { %v9619_v40 = vpop.eup %9618  ;;  %7191 = vst [vmem:[%s12181_s20 + $0x60] sm:$0xff] %v9617_v28  ;;  %9638 = vpow2.f32 %v8086_v31 }
 0x9aa   : > { %v9621_v29 = vpop.eup %9620  ;;  %7192 = vst [vmem:[%s12181_s20 + $0x68] sm:$0xff] %v9619_v40  ;;  %9640 = vpow2.f32 %v8087_v60 }
 0x9ab   : > { %v9623_v35 = vpop.eup %9622  ;;  %7197 = vst [vmem:[%s12181_s20 + $0x90] sm:$0xff] %v9621_v29  ;;  %9642 = vpow2.f32 %v8088_v37 }
 0x9ac   : > { %v9625_v5 = vpop.eup %9624  ;;  %7198 = vst [vmem:[%s12181_s20 + $0x98] sm:$0xff] %v9623_v35  ;;  %9644 = vpow2.f32 %v8093_v16  ;;  %v6378_v16 = vadd.f32 %v12437_v39, %v12485_v10  ;;  %v8114_v35 = vmul.f32 -1.442695, %v12435_v55  ;;  %v8121_v55 = vmul.f32 -1.442695, %v12443_v20 }
 0x9ad   : > { %v9627_v8 = vpop.eup %9626  ;;  %7199 = vst [vmem:[%s12181_s20 + $0xa0] sm:$0xff] %v9625_v5  ;;  %9646 = vpow2.f32 %v8094_v15  ;;  %v6480_v15 = vadd.f32 %v12439_v23, %v12500_v3  ;;  %v6485_v23 = vadd.f32 %v12450_v53, %v12500_v3  ;;  %v6488_v53 = vadd.f32 %v12459_v21, %v12500_v3 }
 0x9ae   : > { %v9629_v47 = vpop.eup %9628  ;;  %7204 = vst [vmem:[%s12181_s20 + $0xc8] sm:$0xff] %v9627_v8  ;;  %9648 = vpow2.f32 %v8095_v4  ;;  %v8115_v5 = vmul.f32 -1.442695, %v6378_v16  ;;  %v8128_v20 = vmul.f32 -1.442695, %v12453_v27 }
 0x9af   : > { %v9631_v25 = vpop.eup %9630  ;;  %7205 = vst [vmem:[%s12181_s20 + $0xd0] sm:$0xff] %v9629_v47  ;;  %9650 = vpow2.f32 %v8100_v44  ;;  %v6384_v44 = vadd.f32 %v12445_v34, %v12485_v10  ;;  %v8116_v52 = vmul.f32 -1.442695, %v6480_v15  ;;  %v6388_v34 = vadd.f32 %v12455_v9, %v12485_v10 }
 0x9b0   : > { %v9633_v11 = vpop.eup %9632  ;;  %7206 = vst [vmem:[%s12181_s20 + $0xd8] sm:$0xff] %v9631_v25  ;;  %9652 = vpow2.f32 %v8101_v41  ;;  %v8123_v25 = vmul.f32 -1.442695, %v6485_v23  ;;  %v6394_v9 = vadd.f32 %v12478_v51, %v12485_v10  ;;  %v8135_v27 = vmul.f32 -1.442695, %v12476_v42 }
 0x9b1   : > { %v9635_v43 = vpop.eup %9634  ;;  %7211 = vst [vmem:[%s12181_s20 + $0x100] sm:$0xff] %v9633_v11  ;;  %9654 = vpow2.f32 %v8102_v6  ;;  %v8122_v47 = vmul.f32 -1.442695, %v6384_v44  ;;  %v8129_v21 = vmul.f32 -1.442695, %v6388_v34 }
 0x9b2   : > { %v9637_v58 = vpop.eup %9636  ;;  %7212 = vst [vmem:[%s12181_s20 + $0x108] sm:$0xff] %v9635_v43  ;;  %9656 = vpow2.f32 %v8107_v46  ;;  %v8136_v10 = vmul.f32 -1.442695, %v6394_v9  ;;  %v8143_v44 = vmul.f32 -1.442695, %v12497_v62 }
 0x9b3   : > { %v9639_v0 = vpop.eup %9638  ;;  %v6877_v38 = vadd.f32 1.0, %v9637_v58  ;;  %9658 = vpow2.f32 %v8108_v59  ;;  %v8130_v58 = vmul.f32 -1.442695, %v6488_v53  ;;  %v8151_v62 = vmul.f32 -1.442695, %v12517_v22 }
 0x9b4   : > { %v9641_v7 = vpop.eup %9640  ;;  %v6882_v57 = vadd.f32 1.0, %v9639_v0  ;;  %9660 = vpow2.f32 %v8109_v19  ;;  %v6493_v19 = vadd.f32 %v12487_v1, %v12500_v3  ;;  %v8158_v53 = vmul.f32 -1.442695, %v12527_v48 }
 0x9b5   : > { %v9643_v45 = vpop.eup %9642  ;;  %9662 = vrcp.f32 %v6877_v38  ;;  %v6883_v61 = vadd.f32 1.0, %v9641_v7  ;;  %v8142_v7 = vmul.f32 -1.442695, %v12492_v63 }
 0x9b6   : > { %v9645_v56 = vpop.eup %9644  ;;  %9664 = vrcp.f32 %v6882_v57  ;;  %v6884_v32 = vadd.f32 1.0, %v9643_v45  ;;  %v8137_v1 = vmul.f32 -1.442695, %v6493_v19 }
 0x9b7   : > { %v9647_v30 = vpop.eup %9646  ;;  %9666 = vrcp.f32 %v6883_v61  ;;  %v6889_v31 = vadd.f32 1.0, %v9645_v56 }
 0x9b8   : > { %v9649_v33 = vpop.eup %9648  ;;  %9668 = vrcp.f32 %v6884_v32  ;;  %v6890_v14 = vadd.f32 1.0, %v9647_v30 }
 0x9b9   : > { %v9651_v60 = vpop.eup %9650  ;;  %9670 = vrcp.f32 %v6889_v31  ;;  %v6891_v2 = vadd.f32 1.0, %v9649_v33 }
 0x9ba   : > { %v9653_v54 = vpop.eup %9652  ;;  %9672 = vrcp.f32 %v6890_v14  ;;  %v6896_v37 = vadd.f32 1.0, %v9651_v60 }
 0x9bb   : > { %v9655_v13 = vpop.eup %9654  ;;  %9674 = vrcp.f32 %v6891_v2  ;;  %v6897_v28 = vadd.f32 1.0, %v9653_v54 }
 0x9bc   : > { %v9657_v49 = vpop.eup %9656  ;;  %9676 = vrcp.f32 %v6896_v37  ;;  %v6898_v40 = vadd.f32 1.0, %v9655_v13 }
 0x9bd   : > { %v9659_v12 = vpop.eup %9658  ;;  %9678 = vrcp.f32 %v6897_v28  ;;  %v6903_v29 = vadd.f32 1.0, %v9657_v49 }
 0x9be   : > { %v9661_v4 = vpop.eup %9660  ;;  %9680 = vrcp.f32 %v6898_v40  ;;  %v6904_v24 = vadd.f32 1.0, %v9659_v12 }
 0x9bf   : > { %v9663_v39 = vpop.eup %9662  ;;  %9682 = vrcp.f32 %v6903_v29  ;;  %v6905_v50 = vadd.f32 1.0, %v9661_v4 }
 0x9c0   : > { %v9665_v41 = vpop.eup %9664  ;;  %7213 = vst [vmem:[%s12181_s20 + $0x110] sm:$0xff] %v9663_v39  ;;  %9684 = vrcp.f32 %v6904_v24 }
 0x9c1   : > { %v9667_v8 = vpop.eup %9666  ;;  %7218 = vst [vmem:[%s12181_s20 + $0x138] sm:$0xff] %v9665_v41  ;;  %9686 = vrcp.f32 %v6905_v50  ;;  %v8149_v41 = vmul.f32 -1.442695, %v12508_v17 }
 0x9c2   : > { %v9669_v6 = vpop.eup %9668  ;;  %7219 = vst [vmem:[%s12181_s20 + $0x140] sm:$0xff] %v9667_v8  ;;  %9688 = vpow2.f32 %v8114_v35  ;;  %v8150_v8 = vmul.f32 -1.442695, %v12511_v18 }
 0x9c3   : > { %v9671_v46 = vpop.eup %9670  ;;  %7220 = vst [vmem:[%s12181_s20 + $0x148] sm:$0xff] %v9669_v6  ;;  %9690 = vpow2.f32 %v8115_v5  ;;  %v8144_v5 = vmul.f32 -1.442695, %v12505_v36  ;;  %v12699_v36 = vld [vmem:[#allocation2_spill] sm:$0xff] }
 0x9c4   : > { %v9673_v59 = vpop.eup %9672  ;;  %7225 = vst [vmem:[%s12181_s20 + $0x170] sm:$0xff] %v9671_v46  ;;  %9692 = vpow2.f32 %v8116_v52  ;;  %v8156_v6 = vmul.f32 -1.442695, %v12699_v36 }
 0x9c5   : > { %v9675_v11 = vpop.eup %9674  ;;  %7226 = vst [vmem:[%s12181_s20 + $0x178] sm:$0xff] %v9673_v59  ;;  %9694 = vpow2.f32 %v8121_v55 }
 0x9c6   : > { %v9677_v43 = vpop.eup %9676  ;;  %7227 = vst [vmem:[%s12181_s20 + $0x180] sm:$0xff] %v9675_v11  ;;  %9696 = vpow2.f32 %v8122_v47  ;;  %v8157_v47 = vmul.f32 -1.442695, %v12520_v26 }
 0x9c7   : > { %v9679_v0 = vpop.eup %9678  ;;  %7232 = vst [vmem:[%s12181_s20 + $0x1a8] sm:$0xff] %v9677_v43  ;;  %9698 = vpow2.f32 %v8123_v25 }
 0x9c8   : > { %v9681_v51 = vpop.eup %9680  ;;  %7233 = vst [vmem:[%s12181_s20 + $0x1b0] sm:$0xff] %v9679_v0  ;;  %9700 = vpow2.f32 %v8128_v20 }
 0x9c9   : > { %v9683_v38 = vpop.eup %9682  ;;  %7234 = vst [vmem:[%s12181_s20 + $0x1b8] sm:$0xff] %v9681_v51  ;;  %9702 = vpow2.f32 %v8129_v21 }
 0x9ca   : > { %v9685_v3 = vpop.eup %9684  ;;  %7239 = vst [vmem:[%s12181_s20 + $0x1e0] sm:$0xff] %v9683_v38  ;;  %9704 = vpow2.f32 %v8130_v58 }
 0x9cb   : > { %v9687_v57 = vpop.eup %9686  ;;  %7240 = vst [vmem:[%s12181_s20 + $0x1e8] sm:$0xff] %v9685_v3  ;;  %9706 = vpow2.f32 %v8135_v27 }
 0x9cc   : > { %v9689_v45 = vpop.eup %9688  ;;  %7241 = vst [vmem:[%s12181_s20 + $0x1f0] sm:$0xff] %v9687_v57  ;;  %9708 = vpow2.f32 %v8136_v10 }
 0x9cd   : > { %v9691_v42 = vpop.eup %9690  ;;  %v6910_v61 = vadd.f32 1.0, %v9689_v45  ;;  %9710 = vpow2.f32 %v8137_v1 }
 0x9ce   : > { %v9693_v56 = vpop.eup %9692  ;;  %v6911_v32 = vadd.f32 1.0, %v9691_v42  ;;  %9712 = vpow2.f32 %v8142_v7 }
 0x9cf   : > { %v9695_v30 = vpop.eup %9694  ;;  %9714 = vrcp.f32 %v6910_v61  ;;  %v6912_v31 = vadd.f32 1.0, %v9693_v56 }
 0x9d0   : > { %v9697_v33 = vpop.eup %9696  ;;  %9716 = vrcp.f32 %v6911_v32  ;;  %v6917_v14 = vadd.f32 1.0, %v9695_v30 }
 0x9d1   : > { %v9699_v60 = vpop.eup %9698  ;;  %9718 = vrcp.f32 %v6912_v31  ;;  %v6918_v63 = vadd.f32 1.0, %v9697_v33 }
 0x9d2   : > { %v9701_v2 = vpop.eup %9700  ;;  %9720 = vrcp.f32 %v6917_v14  ;;  %v6919_v54 = vadd.f32 1.0, %v9699_v60 }
 0x9d3   : > { %v9703_v37 = vpop.eup %9702  ;;  %9722 = vrcp.f32 %v6918_v63  ;;  %v6924_v13 = vadd.f32 1.0, %v9701_v2 }
 0x9d4   : > { %v9705_v28 = vpop.eup %9704  ;;  %9724 = vrcp.f32 %v6919_v54  ;;  %v6925_v16 = vadd.f32 1.0, %v9703_v37 }
 0x9d5   : > { %v9707_v49 = vpop.eup %9706  ;;  %9726 = vrcp.f32 %v6924_v13  ;;  %v6926_v40 = vadd.f32 1.0, %v9705_v28 }
 0x9d6   : > { %v9709_v15 = vpop.eup %9708  ;;  %9728 = vrcp.f32 %v6925_v16  ;;  %v6931_v12 = vadd.f32 1.0, %v9707_v49 }
 0x9d7   : > { %v9711_v29 = vpop.eup %9710  ;;  %9730 = vrcp.f32 %v6926_v40  ;;  %v6932_v4 = vadd.f32 1.0, %v9709_v15 }
 0x9d8   : > { %v9713_v24 = vpop.eup %9712  ;;  %9732 = vrcp.f32 %v6931_v12  ;;  %v6933_v35 = vadd.f32 1.0, %v9711_v29 }
 0x9d9   : > { %v9715_v39 = vpop.eup %9714  ;;  %9734 = vrcp.f32 %v6932_v4  ;;  %v6938_v50 = vadd.f32 1.0, %v9713_v24 }
 0x9da   : > { %v9717_v23 = vpop.eup %9716  ;;  %7246 = vst [vmem:[%s12181_s20 + $0x218] sm:$0xff] %v9715_v39  ;;  %9736 = vrcp.f32 %v6933_v35 }
 0x9db   : > { %v9719_v52 = vpop.eup %9718  ;;  %7247 = vst [vmem:[%s12181_s20 + $0x220] sm:$0xff] %v9717_v23  ;;  %9738 = vrcp.f32 %v6938_v50 }
 0x9dc   : > { %v9721_v55 = vpop.eup %9720  ;;  %7248 = vst [vmem:[%s12181_s20 + $0x228] sm:$0xff] %v9719_v52  ;;  %9740 = vpow2.f32 %v8143_v44 }
 0x9dd   : > { %v9723_v34 = vpop.eup %9722  ;;  %7253 = vst [vmem:[%s12181_s20 + $0x250] sm:$0xff] %v9721_v55  ;;  %9742 = vpow2.f32 %v8144_v5 }
 0x9de   : > { %v9725_v17 = vpop.eup %9724  ;;  %7254 = vst [vmem:[%s12181_s20 + $0x258] sm:$0xff] %v9723_v34  ;;  %9744 = vpow2.f32 %v8149_v41 }
 0x9df   : > { %v9727_v18 = vpop.eup %9726  ;;  %7255 = vst [vmem:[%s12181_s20 + $0x260] sm:$0xff] %v9725_v17  ;;  %9746 = vpow2.f32 %v8150_v8 }
 0x9e0   : > { %v9729_v22 = vpop.eup %9728  ;;  %7260 = vst [vmem:[%s12181_s20 + $0x288] sm:$0xff] %v9727_v18  ;;  %9748 = vpow2.f32 %v8151_v62 }
 0x9e1   : > { %v9731_v46 = vpop.eup %9730  ;;  %7261 = vst [vmem:[%s12181_s20 + $0x290] sm:$0xff] %v9729_v22  ;;  %9750 = vpow2.f32 %v8156_v6 }
 0x9e2   : > { %v9733_v25 = vpop.eup %9732  ;;  %7262 = vst [vmem:[%s12181_s20 + $0x298] sm:$0xff] %v9731_v46  ;;  %9752 = vpow2.f32 %v8157_v47 }
 0x9e3   : > { %v9735_v59 = vpop.eup %9734  ;;  %7267 = vst [vmem:[%s12181_s20 + $0x2c0] sm:$0xff] %v9733_v25  ;;  %9754 = vpow2.f32 %v8158_v53 }
 0x9e4   : > { %v9737_v26 = vpop.eup %9736  ;;  %7268 = vst [vmem:[%s12181_s20 + $0x2c8] sm:$0xff] %v9735_v59 }
 0x9e5   : > { %v9739_v20 = vpop.eup %9738  ;;  %7269 = vst [vmem:[%s12181_s20 + $0x2d0] sm:$0xff] %v9737_v26 }
 0x9e6   : > { %v9741_v9 = vpop.eup %9740  ;;  %7274 = vst [vmem:[%s12181_s20 + $0x2f8] sm:$0xff] %v9739_v20 }
 0x9e7   : > { %v9743_v48 = vpop.eup %9742  ;;  %v6939_v11 = vadd.f32 1.0, %v9741_v9 }
 0x9e8   : > { %v9745_v21 = vpop.eup %9744  ;;  %v6940_v19 = vadd.f32 1.0, %v9743_v48 }
 0x9e9   : > { %v9747_v43 = vpop.eup %9746  ;;  %9756 = vrcp.f32 %v6939_v11  ;;  %v6945_v58 = vadd.f32 1.0, %v9745_v21 }
 0x9ea   : > { %v9749_v0 = vpop.eup %9748  ;;  %9758 = vrcp.f32 %v6940_v19  ;;  %v6946_v27 = vadd.f32 1.0, %v9747_v43 }
 0x9eb   : > { %v9751_v51 = vpop.eup %9750  ;;  %9760 = vrcp.f32 %v6945_v58  ;;  %v6947_v10 = vadd.f32 1.0, %v9749_v0 }
 0x9ec   : > { %v9753_v38 = vpop.eup %9752  ;;  %9762 = vrcp.f32 %v6946_v27  ;;  %v6952_v1 = vadd.f32 1.0, %v9751_v51 }
 0x9ed   : > { %v9755_v3 = vpop.eup %9754  ;;  %9764 = vrcp.f32 %v6947_v10  ;;  %v6953_v7 = vadd.f32 1.0, %v9753_v38 }
 0x9ee   : > { %9766 = vrcp.f32 %v6952_v1  ;;  %v6954_v57 = vadd.f32 1.0, %v9755_v3 }
 0x9ef   : > { %9768 = vrcp.f32 %v6953_v7 }
 0x9f0   : > { %9770 = vrcp.f32 %v6954_v57 }
 0x9f3   : > { %v9757_v45 = vpop.eup %9756 }
 0x9f4   : > { %v9759_v42 = vpop.eup %9758  ;;  %7275 = vst [vmem:[%s12181_s20 + $0x300] sm:$0xff] %v9757_v45 }
 0x9f5   : > { %v9761_v61 = vpop.eup %9760  ;;  %7276 = vst [vmem:[%s12181_s20 + $0x308] sm:$0xff] %v9759_v42 }
 0x9f6   : > { %v9763_v56 = vpop.eup %9762  ;;  %7281 = vst [vmem:[%s12181_s20 + $0x330] sm:$0xff] %v9761_v61 }
 0x9f7   : > { %v9765_v32 = vpop.eup %9764  ;;  %7282 = vst [vmem:[%s12181_s20 + $0x338] sm:$0xff] %v9763_v56 }
 0x9f8   : > { %v9767_v30 = vpop.eup %9766  ;;  %7283 = vst [vmem:[%s12181_s20 + $0x340] sm:$0xff] %v9765_v32 }
 0x9f9   : > { %v9769_v31 = vpop.eup %9768  ;;  %7288 = vst [vmem:[%s12181_s20 + $0x368] sm:$0xff] %v9767_v30 }
 0x9fa   : > { %v9771_v33 = vpop.eup %9770  ;;  %7289 = vst [vmem:[%s12181_s20 + $0x370] sm:$0xff] %v9769_v31 }
 0x9fb   : > { %7290 = vst [vmem:[%s12181_s20 + $0x378] sm:$0xff] %v9771_v33 }
 0x9fc PF: > { %s30_s0 = sadd.s32 1, %s9779_s0  }
 0x9fd   : > { %p27_p4 = scmp.ge.s32.totalorder %s30_s0, 4  }
 0x9ff   :  { %29 = sbr.rel (!%p27_p4) target bundleno = 5 (0x5), region = 137 }

</bundles_post_ra>
